<compile_context>
chip_gen: v7x
topology: tpu7x:2x2x1
jax: 0.10.0
libtpu: 0.0.40
codegen_flags: <defaults>
</compile_context>

<pallas_src>
import jax
import jax.numpy as jnp
from jax.experimental import pallas as pl
from jax.experimental.pallas import tpu as pltpu

IN_RAW = 28 * 28          # 784
H1, H2, H3 = 512, 256, 128
OUT_RAW = 10
OUT_PAD = 128             # lane-dense logits inside the kernel


def _round_up(x, m):
    return ((x + m - 1) // m) * m


def _mlp_kernel(x_ref, w1_ref, b1_ref, w2_ref, b2_ref,
                w3_ref, b3_ref, w4_ref, b4_ref, o_ref):
    # In-kernel cast of the raw f32 input tile (no wrapper-side HBM pass).
    x = x_ref[...].astype(jnp.bfloat16)
    # Layer 1: (TM,784)bf16 @ (784,512)bf16 -> f32 acc, +bias, ReLU, -> bf16
    h = jnp.dot(x, w1_ref[...], preferred_element_type=jnp.float32)
    h = jnp.maximum(h + b1_ref[...], 0.0).astype(jnp.bfloat16)
    # Layer 2: (TM,512) @ (512,256)
    h = jnp.dot(h, w2_ref[...], preferred_element_type=jnp.float32)
    h = jnp.maximum(h + b2_ref[...], 0.0).astype(jnp.bfloat16)
    # Layer 3: (TM,256) @ (256,128)
    h = jnp.dot(h, w3_ref[...], preferred_element_type=jnp.float32)
    h = jnp.maximum(h + b3_ref[...], 0.0).astype(jnp.bfloat16)
    # Layer 4 (logits, lane-padded 10 -> 128): (TM,128) @ (128,128)
    out = jnp.dot(h, w4_ref[...], preferred_element_type=jnp.float32)
    o_ref[...] = (out + b4_ref[...]).astype(o_ref.dtype)


def init_params(key):
    """PyTorch-style uniform fan-in init.  Weights (in, out) f32, biases (1, out) f32."""
    dims = [(IN_RAW, H1), (H1, H2), (H2, H3), (H3, OUT_RAW)]
    params = []
    for fan_in, fan_out in dims:
        key, kw, kb = jax.random.split(key, 3)
        bound = 1.0 / jnp.sqrt(fan_in)
        w = jax.random.uniform(kw, (fan_in, fan_out), jnp.float32,
                               minval=-bound, maxval=bound)
        b = jax.random.uniform(kb, (1, fan_out), jnp.float32,
                               minval=-bound, maxval=bound)
        params.append((w, b))
    return params


def prepare_params(params_f32):
    """f32 params -> kernel params: weights bf16 (w1 unpadded, K=784 handled
    in-kernel), w4/b4 lane-padded 10 -> 128, biases kept f32."""
    (w1, b1), (w2, b2), (w3, b3), (w4, b4) = params_f32
    w4p = jnp.pad(w4, ((0, 0), (0, OUT_PAD - OUT_RAW))).astype(jnp.bfloat16)
    b4p = jnp.pad(b4, ((0, 0), (0, OUT_PAD - OUT_RAW)))
    return ((w1.astype(jnp.bfloat16), b1),
            (w2.astype(jnp.bfloat16), b2),
            (w3.astype(jnp.bfloat16), b3),
            (w4p, b4p))


def _pallas_forward(x2d, kparams, tm_eff, single_buffer_weights):
    b_pad = x2d.shape[0]
    n_tiles = b_pad // tm_eff
    (w1, b1), (w2, b2), (w3, b3), (w4, b4) = kparams

    weight_mode = pl.Buffered(1) if single_buffer_weights else None

    def const(shape):
        # Grid-invariant weight/bias blocks: constant index_map keeps them
        # VMEM-resident across batch tiles; Buffered(1) drops the useless
        # second pipeline buffer.
        return pl.BlockSpec(shape, lambda i: (0, 0), pipeline_mode=weight_mode)

    vmem_limit = (48 << 20) if tm_eff > 512 else None

    return pl.pallas_call(
        _mlp_kernel,
        out_shape=jax.ShapeDtypeStruct((b_pad, OUT_PAD), jnp.float32),
        grid=(n_tiles,),
        in_specs=[
            pl.BlockSpec((tm_eff, IN_RAW), lambda i: (i, 0)),   # x tiled on batch
            const((IN_RAW, H1)), const((1, H1)),
            const((H1, H2)),     const((1, H2)),
            const((H2, H3)),     const((1, H3)),
            const((H3, OUT_PAD)), const((1, OUT_PAD)),
        ],
        out_specs=pl.BlockSpec((tm_eff, OUT_PAD), lambda i: (i, 0)),
        compiler_params=pltpu.CompilerParams(
            dimension_semantics=("parallel",),     # megacore-shard batch tiles
            vmem_limit_bytes=vmem_limit),
    )(x2d, w1, b1, w2, b2, w3, b3, w4, b4)


def fashion_mnist_forward(x_nchw, kparams, *, tm=512):
    """x_nchw: (B, 1, 28, 28) float32.  kparams: output of prepare_params.
    Returns logits (B, 10) float32."""
    B = x_nchw.shape[0]
    x = x_nchw.reshape(B, IN_RAW)                 # nn.Flatten(); stays f32
    tm_eff = min(tm, _round_up(B, 8))             # don't pad tiny batches to 128/512 rows
    b_pad = _round_up(B, tm_eff)
    if b_pad != B:
        x = jnp.pad(x, ((0, b_pad - B), (0, 0)))  # padded rows sliced off below
    try:
        out_padded = _pallas_forward(x, kparams, tm_eff, single_buffer_weights=True)
    except Exception:
        # Fallback if this JAX build rejects single-buffered (Buffered(1)) specs.
        out_padded = _pallas_forward(x, kparams, tm_eff, single_buffer_weights=False)
    # Un-pad: real batch rows, real 10 logit columns.
    return out_padded[:B, :OUT_RAW]


def _reference_forward_bf16(x_nchw, kparams):
    """Plain-JAX reference with identical bf16 weights/activations."""
    B = x_nchw.shape[0]
    x = x_nchw.reshape(B, IN_RAW).astype(jnp.bfloat16)
    (w1, b1), (w2, b2), (w3, b3), (w4, b4) = kparams
    h = jnp.maximum(jnp.dot(x, w1, preferred_element_type=jnp.float32) + b1,
                    0.0).astype(jnp.bfloat16)
    h = jnp.maximum(jnp.dot(h, w2, preferred_element_type=jnp.float32) + b2,
                    0.0).astype(jnp.bfloat16)
    h = jnp.maximum(jnp.dot(h, w3, preferred_element_type=jnp.float32) + b3,
                    0.0).astype(jnp.bfloat16)
    out = jnp.dot(h, w4, preferred_element_type=jnp.float32) + b4
    return out[:, :OUT_RAW]


def _reference_forward_f32(x_nchw, params_f32):
    """Full-precision reference (module semantics)."""
    x = x_nchw.reshape(x_nchw.shape[0], -1)
    (w1, b1), (w2, b2), (w3, b3), (w4, b4) = params_f32
    h = jnp.maximum(x @ w1 + b1, 0.0)
    h = jnp.maximum(h @ w2 + b2, 0.0)
    h = jnp.maximum(h @ w3 + b3, 0.0)
    return h @ w4 + b4


if __name__ == "__main__":
    key = jax.random.PRNGKey(0)
    key, kx = jax.random.split(key)

    params_f32 = init_params(key)
    kparams = prepare_params(params_f32)

    # Small-batch path: B=8 -> single (8, 784) tile, no wasted padding rows.
    B = 8
    x = jax.random.normal(kx, (B, 1, 28, 28), jnp.float32)  # NCHW, like torchvision

    logits = fashion_mnist_forward(x, kparams)
    logits = jax.block_until_ready(logits)
    assert logits.shape == (B, OUT_RAW)

    ref_bf16 = _reference_forward_bf16(x, kparams)
    assert jnp.allclose(logits, ref_bf16, atol=2e-2, rtol=2e-2)

    ref_f32 = _reference_forward_f32(x, params_f32)
    assert jnp.allclose(logits, ref_f32, atol=1e-1, rtol=1e-1)

    # Multi-tile path: B=192 with tm=64 -> 3 batch tiles, VMEM-resident weights.
    key, kx2 = jax.random.split(key)
    B2 = 192
    x2 = jax.random.normal(kx2, (B2, 1, 28, 28), jnp.float32)
    logits2 = jax.block_until_ready(fashion_mnist_forward(x2, kparams, tm=64))
    assert logits2.shape == (B2, OUT_RAW)
    assert jnp.allclose(logits2, _reference_forward_bf16(x2, kparams),
                        atol=2e-2, rtol=2e-2)

    print("KERNEL_OK")
</pallas_src>

<mosaic_0001>
module attributes {stable_mosaic.version = 11 : i64} {
  func.func @_mlp_kernel(%arg0: i32, %arg1: memref<8x784xf32, #tpu.memory_space<vmem>>, %arg2: memref<784x512xbf16, #tpu.memory_space<vmem>>, %arg3: memref<1x512xf32, #tpu.memory_space<vmem>>, %arg4: memref<512x256xbf16, #tpu.memory_space<vmem>>, %arg5: memref<1x256xf32, #tpu.memory_space<vmem>>, %arg6: memref<256x128xbf16, #tpu.memory_space<vmem>>, %arg7: memref<1x128xf32, #tpu.memory_space<vmem>>, %arg8: memref<128x128xbf16, #tpu.memory_space<vmem>>, %arg9: memref<1x128xf32, #tpu.memory_space<vmem>>, %arg10: memref<8x128xf32, #tpu.memory_space<vmem>>) attributes {dimension_semantics = [#tpu.dimension_semantics<parallel>], iteration_bounds = array<i64: 1>, scalar_prefetch = 0 : i64, scratch_operands = 0 : i64, tpu.core_type = #tpu.core_type<tc>, window_params = [{transform_indices = @transform_0, window_bounds = array<i64: 8, 784>}, {pipeline_mode = #tpu.pipeline_mode<synchronous>, transform_indices = @transform_1, window_bounds = array<i64: 784, 512>}, {pipeline_mode = #tpu.pipeline_mode<synchronous>, transform_indices = @transform_2, window_bounds = array<i64: 1, 512>}, {pipeline_mode = #tpu.pipeline_mode<synchronous>, transform_indices = @transform_3, window_bounds = array<i64: 512, 256>}, {pipeline_mode = #tpu.pipeline_mode<synchronous>, transform_indices = @transform_4, window_bounds = array<i64: 1, 256>}, {pipeline_mode = #tpu.pipeline_mode<synchronous>, transform_indices = @transform_5, window_bounds = array<i64: 256, 128>}, {pipeline_mode = #tpu.pipeline_mode<synchronous>, transform_indices = @transform_6, window_bounds = array<i64: 1, 128>}, {pipeline_mode = #tpu.pipeline_mode<synchronous>, transform_indices = @transform_7, window_bounds = array<i64: 128, 128>}, {pipeline_mode = #tpu.pipeline_mode<synchronous>, transform_indices = @transform_8, window_bounds = array<i64: 1, 128>}, {transform_indices = @transform_9, window_bounds = array<i64: 8, 128>}]} {
    %c0 = arith.constant 0 : index
    %c0_0 = arith.constant 0 : index
    %0 = vector.load %arg1[%c0, %c0_0] : memref<8x784xf32, #tpu.memory_space<vmem>>, vector<8x784xf32>
    %1 = arith.truncf %0 : vector<8x784xf32> to vector<8x784xbf16>
    %c0_1 = arith.constant 0 : index
    %c0_2 = arith.constant 0 : index
    %2 = vector.load %arg2[%c0_1, %c0_2] : memref<784x512xbf16, #tpu.memory_space<vmem>>, vector<784x512xbf16>
    %cst = arith.constant dense<0.000000e+00> : vector<8x512xf32>
    %3 = tpu.matmul %1, %2, %cst {dimension_numbers = #tpu.dot_dimension_numbers<[1], [0], [0], [1], [0, 0, 1, 1], [], []>} : vector<8x784xbf16>, vector<784x512xbf16>, vector<8x512xf32> -> vector<8x512xf32>
    %c0_3 = arith.constant 0 : index
    %c0_4 = arith.constant 0 : index
    %4 = vector.load %arg3[%c0_3, %c0_4] : memref<1x512xf32, #tpu.memory_space<vmem>>, vector<1x512xf32>
    %5 = vector.broadcast %4 : vector<1x512xf32> to vector<8x512xf32>
    %6 = arith.addf %3, %5 : vector<8x512xf32>
    %cst_5 = arith.constant 0.000000e+00 : f32
    %7 = vector.broadcast %cst_5 : f32 to vector<8x512xf32>
    %8 = arith.maximumf %6, %7 : vector<8x512xf32>
    %9 = arith.truncf %8 : vector<8x512xf32> to vector<8x512xbf16>
    %c0_6 = arith.constant 0 : index
    %c0_7 = arith.constant 0 : index
    %10 = vector.load %arg4[%c0_6, %c0_7] : memref<512x256xbf16, #tpu.memory_space<vmem>>, vector<512x256xbf16>
    %cst_8 = arith.constant dense<0.000000e+00> : vector<8x256xf32>
    %11 = tpu.matmul %9, %10, %cst_8 {dimension_numbers = #tpu.dot_dimension_numbers<[1], [0], [0], [1], [0, 0, 1, 1], [], []>} : vector<8x512xbf16>, vector<512x256xbf16>, vector<8x256xf32> -> vector<8x256xf32>
    %c0_9 = arith.constant 0 : index
    %c0_10 = arith.constant 0 : index
    %12 = vector.load %arg5[%c0_9, %c0_10] : memref<1x256xf32, #tpu.memory_space<vmem>>, vector<1x256xf32>
    %13 = vector.broadcast %12 : vector<1x256xf32> to vector<8x256xf32>
    %14 = arith.addf %11, %13 : vector<8x256xf32>
    %cst_11 = arith.constant 0.000000e+00 : f32
    %15 = vector.broadcast %cst_11 : f32 to vector<8x256xf32>
    %16 = arith.maximumf %14, %15 : vector<8x256xf32>
    %17 = arith.truncf %16 : vector<8x256xf32> to vector<8x256xbf16>
    %c0_12 = arith.constant 0 : index
    %c0_13 = arith.constant 0 : index
    %18 = vector.load %arg6[%c0_12, %c0_13] : memref<256x128xbf16, #tpu.memory_space<vmem>>, vector<256x128xbf16>
    %cst_14 = arith.constant dense<0.000000e+00> : vector<8x128xf32>
    %19 = tpu.matmul %17, %18, %cst_14 {dimension_numbers = #tpu.dot_dimension_numbers<[1], [0], [0], [1], [0, 0, 1, 1], [], []>} : vector<8x256xbf16>, vector<256x128xbf16>, vector<8x128xf32> -> vector<8x128xf32>
    %c0_15 = arith.constant 0 : index
    %c0_16 = arith.constant 0 : index
    %20 = vector.load %arg7[%c0_15, %c0_16] : memref<1x128xf32, #tpu.memory_space<vmem>>, vector<1x128xf32>
    %21 = vector.broadcast %20 : vector<1x128xf32> to vector<8x128xf32>
    %22 = arith.addf %19, %21 : vector<8x128xf32>
    %cst_17 = arith.constant 0.000000e+00 : f32
    %23 = vector.broadcast %cst_17 : f32 to vector<8x128xf32>
    %24 = arith.maximumf %22, %23 : vector<8x128xf32>
    %25 = arith.truncf %24 : vector<8x128xf32> to vector<8x128xbf16>
    %c0_18 = arith.constant 0 : index
    %c0_19 = arith.constant 0 : index
    %26 = vector.load %arg8[%c0_18, %c0_19] : memref<128x128xbf16, #tpu.memory_space<vmem>>, vector<128x128xbf16>
    %cst_20 = arith.constant dense<0.000000e+00> : vector<8x128xf32>
    %27 = tpu.matmul %25, %26, %cst_20 {dimension_numbers = #tpu.dot_dimension_numbers<[1], [0], [0], [1], [0, 0, 1, 1], [], []>} : vector<8x128xbf16>, vector<128x128xbf16>, vector<8x128xf32> -> vector<8x128xf32>
    %c0_21 = arith.constant 0 : index
    %c0_22 = arith.constant 0 : index
    %28 = vector.load %arg9[%c0_21, %c0_22] : memref<1x128xf32, #tpu.memory_space<vmem>>, vector<1x128xf32>
    %29 = vector.broadcast %28 : vector<1x128xf32> to vector<8x128xf32>
    %30 = arith.addf %27, %29 : vector<8x128xf32>
    %c0_23 = arith.constant 0 : index
    %c0_24 = arith.constant 0 : index
    %31 = vector.load %arg10[%c0_23, %c0_24] : memref<8x128xf32, #tpu.memory_space<vmem>>, vector<8x128xf32>
    tpu.vector_store %arg10[%c0_23, %c0_24], %30 {strides = array<i32>} : memref<8x128xf32, #tpu.memory_space<vmem>>, vector<8x128xf32>,
    return
  }
  func.func @transform_0(%arg0: i32) -> (i32, i32) {
    %c0_i32 = arith.constant 0 : i32
    %c0_i32_0 = arith.constant 0 : i32
    return %arg0, %c0_i32 : i32, i32
  }
  func.func @transform_1(%arg0: i32) -> (i32, i32) {
    %c0_i32 = arith.constant 0 : i32
    %c0_i32_0 = arith.constant 0 : i32
    %c0_i32_1 = arith.constant 0 : i32
    return %c0_i32, %c0_i32_0 : i32, i32
  }
  func.func @transform_2(%arg0: i32) -> (i32, i32) {
    %c0_i32 = arith.constant 0 : i32
    %c0_i32_0 = arith.constant 0 : i32
    %c0_i32_1 = arith.constant 0 : i32
    return %c0_i32, %c0_i32_0 : i32, i32
  }
  func.func @transform_3(%arg0: i32) -> (i32, i32) {
    %c0_i32 = arith.constant 0 : i32
    %c0_i32_0 = arith.constant 0 : i32
    %c0_i32_1 = arith.constant 0 : i32
    return %c0_i32, %c0_i32_0 : i32, i32
  }
  func.func @transform_4(%arg0: i32) -> (i32, i32) {
    %c0_i32 = arith.constant 0 : i32
    %c0_i32_0 = arith.constant 0 : i32
    %c0_i32_1 = arith.constant 0 : i32
    return %c0_i32, %c0_i32_0 : i32, i32
  }
  func.func @transform_5(%arg0: i32) -> (i32, i32) {
    %c0_i32 = arith.constant 0 : i32
    %c0_i32_0 = arith.constant 0 : i32
    %c0_i32_1 = arith.constant 0 : i32
    return %c0_i32, %c0_i32_0 : i32, i32
  }
  func.func @transform_6(%arg0: i32) -> (i32, i32) {
    %c0_i32 = arith.constant 0 : i32
    %c0_i32_0 = arith.constant 0 : i32
    %c0_i32_1 = arith.constant 0 : i32
    return %c0_i32, %c0_i32_0 : i32, i32
  }
  func.func @transform_7(%arg0: i32) -> (i32, i32) {
    %c0_i32 = arith.constant 0 : i32
    %c0_i32_0 = arith.constant 0 : i32
    %c0_i32_1 = arith.constant 0 : i32
    return %c0_i32, %c0_i32_0 : i32, i32
  }
  func.func @transform_8(%arg0: i32) -> (i32, i32) {
    %c0_i32 = arith.constant 0 : i32
    %c0_i32_0 = arith.constant 0 : i32
    %c0_i32_1 = arith.constant 0 : i32
    return %c0_i32, %c0_i32_0 : i32, i32
  }
  func.func @transform_9(%arg0: i32) -> (i32, i32) {
    %c0_i32 = arith.constant 0 : i32
    %c0_i32_0 = arith.constant 0 : i32
    return %arg0, %c0_i32 : i32, i32
  }
}

module attributes {stable_mosaic.version = 11 : i64} {
  func.func @_mlp_kernel(%arg0: i32, %arg1: memref<8x784xf32, #tpu.memory_space<vmem>>, %arg2: memref<784x512xbf16, #tpu.memory_space<vmem>>, %arg3: memref<1x512xf32, #tpu.memory_space<vmem>>, %arg4: memref<512x256xbf16, #tpu.memory_space<vmem>>, %arg5: memref<1x256xf32, #tpu.memory_space<vmem>>, %arg6: memref<256x128xbf16, #tpu.memory_space<vmem>>, %arg7: memref<1x128xf32, #tpu.memory_space<vmem>>, %arg8: memref<128x128xbf16, #tpu.memory_space<vmem>>, %arg9: memref<1x128xf32, #tpu.memory_space<vmem>>, %arg10: memref<8x128xf32, #tpu.memory_space<vmem>>) attributes {dimension_semantics = [#tpu.dimension_semantics<parallel>], iteration_bounds = array<i64: 1>, scalar_prefetch = 0 : i64, scratch_operands = 0 : i64, tpu.core_type = #tpu.core_type<tc>, window_params = [{transform_indices = @transform_0, window_bounds = array<i64: 8, 784>}, {pipeline_mode = #tpu.pipeline_mode<synchronous>, transform_indices = @transform_1, window_bounds = array<i64: 784, 512>}, {pipeline_mode = #tpu.pipeline_mode<synchronous>, transform_indices = @transform_2, window_bounds = array<i64: 1, 512>}, {pipeline_mode = #tpu.pipeline_mode<synchronous>, transform_indices = @transform_3, window_bounds = array<i64: 512, 256>}, {pipeline_mode = #tpu.pipeline_mode<synchronous>, transform_indices = @transform_4, window_bounds = array<i64: 1, 256>}, {pipeline_mode = #tpu.pipeline_mode<synchronous>, transform_indices = @transform_5, window_bounds = array<i64: 256, 128>}, {pipeline_mode = #tpu.pipeline_mode<synchronous>, transform_indices = @transform_6, window_bounds = array<i64: 1, 128>}, {pipeline_mode = #tpu.pipeline_mode<synchronous>, transform_indices = @transform_7, window_bounds = array<i64: 128, 128>}, {pipeline_mode = #tpu.pipeline_mode<synchronous>, transform_indices = @transform_8, window_bounds = array<i64: 1, 128>}, {transform_indices = @transform_9, window_bounds = array<i64: 8, 128>}]} {
    %c0 = arith.constant 0 : index
    %c0_0 = arith.constant 0 : index
    %0 = vector.load %arg1[%c0, %c0_0] : memref<8x784xf32, #tpu.memory_space<vmem>>, vector<8x784xf32>
    %1 = arith.truncf %0 : vector<8x784xf32> to vector<8x784xbf16>
    %c0_1 = arith.constant 0 : index
    %c0_2 = arith.constant 0 : index
    %2 = vector.load %arg2[%c0_1, %c0_2] : memref<784x512xbf16, #tpu.memory_space<vmem>>, vector<784x512xbf16>
    %cst = arith.constant dense<0.000000e+00> : vector<8x512xf32>
    %3 = tpu.matmul %1, %2, %cst {dimension_numbers = #tpu.dot_dimension_numbers<[1], [0], [0], [1], [0, 0, 1, 1], [], []>} : vector<8x784xbf16>, vector<784x512xbf16>, vector<8x512xf32> -> vector<8x512xf32>
    %c0_3 = arith.constant 0 : index
    %c0_4 = arith.constant 0 : index
    %4 = vector.load %arg3[%c0_3, %c0_4] : memref<1x512xf32, #tpu.memory_space<vmem>>, vector<1x512xf32>
    %5 = vector.broadcast %4 : vector<1x512xf32> to vector<8x512xf32>
    %6 = arith.addf %3, %5 : vector<8x512xf32>
    %cst_5 = arith.constant 0.000000e+00 : f32
    %7 = vector.broadcast %cst_5 : f32 to vector<8x512xf32>
    %8 = arith.maximumf %6, %7 : vector<8x512xf32>
    %9 = arith.truncf %8 : vector<8x512xf32> to vector<8x512xbf16>
    %c0_6 = arith.constant 0 : index
    %c0_7 = arith.constant 0 : index
    %10 = vector.load %arg4[%c0_6, %c0_7] : memref<512x256xbf16, #tpu.memory_space<vmem>>, vector<512x256xbf16>
    %cst_8 = arith.constant dense<0.000000e+00> : vector<8x256xf32>
    %11 = tpu.matmul %9, %10, %cst_8 {dimension_numbers = #tpu.dot_dimension_numbers<[1], [0], [0], [1], [0, 0, 1, 1], [], []>} : vector<8x512xbf16>, vector<512x256xbf16>, vector<8x256xf32> -> vector<8x256xf32>
    %c0_9 = arith.constant 0 : index
    %c0_10 = arith.constant 0 : index
    %12 = vector.load %arg5[%c0_9, %c0_10] : memref<1x256xf32, #tpu.memory_space<vmem>>, vector<1x256xf32>
    %13 = vector.broadcast %12 : vector<1x256xf32> to vector<8x256xf32>
    %14 = arith.addf %11, %13 : vector<8x256xf32>
    %cst_11 = arith.constant 0.000000e+00 : f32
    %15 = vector.broadcast %cst_11 : f32 to vector<8x256xf32>
    %16 = arith.maximumf %14, %15 : vector<8x256xf32>
    %17 = arith.truncf %16 : vector<8x256xf32> to vector<8x256xbf16>
    %c0_12 = arith.constant 0 : index
    %c0_13 = arith.constant 0 : index
    %18 = vector.load %arg6[%c0_12, %c0_13] : memref<256x128xbf16, #tpu.memory_space<vmem>>, vector<256x128xbf16>
    %cst_14 = arith.constant dense<0.000000e+00> : vector<8x128xf32>
    %19 = tpu.matmul %17, %18, %cst_14 {dimension_numbers = #tpu.dot_dimension_numbers<[1], [0], [0], [1], [0, 0, 1, 1], [], []>} : vector<8x256xbf16>, vector<256x128xbf16>, vector<8x128xf32> -> vector<8x128xf32>
    %c0_15 = arith.constant 0 : index
    %c0_16 = arith.constant 0 : index
    %20 = vector.load %arg7[%c0_15, %c0_16] : memref<1x128xf32, #tpu.memory_space<vmem>>, vector<1x128xf32>
    %21 = vector.broadcast %20 : vector<1x128xf32> to vector<8x128xf32>
    %22 = arith.addf %19, %21 : vector<8x128xf32>
    %cst_17 = arith.constant 0.000000e+00 : f32
    %23 = vector.broadcast %cst_17 : f32 to vector<8x128xf32>
    %24 = arith.maximumf %22, %23 : vector<8x128xf32>
    %25 = arith.truncf %24 : vector<8x128xf32> to vector<8x128xbf16>
    %c0_18 = arith.constant 0 : index
    %c0_19 = arith.constant 0 : index
    %26 = vector.load %arg8[%c0_18, %c0_19] : memref<128x128xbf16, #tpu.memory_space<vmem>>, vector<128x128xbf16>
    %cst_20 = arith.constant dense<0.000000e+00> : vector<8x128xf32>
    %27 = tpu.matmul %25, %26, %cst_20 {dimension_numbers = #tpu.dot_dimension_numbers<[1], [0], [0], [1], [0, 0, 1, 1], [], []>} : vector<8x128xbf16>, vector<128x128xbf16>, vector<8x128xf32> -> vector<8x128xf32>
    %c0_21 = arith.constant 0 : index
    %c0_22 = arith.constant 0 : index
    %28 = vector.load %arg9[%c0_21, %c0_22] : memref<1x128xf32, #tpu.memory_space<vmem>>, vector<1x128xf32>
    %29 = vector.broadcast %28 : vector<1x128xf32> to vector<8x128xf32>
    %30 = arith.addf %27, %29 : vector<8x128xf32>
    %c0_23 = arith.constant 0 : index
    %c0_24 = arith.constant 0 : index
    %31 = vector.load %arg10[%c0_23, %c0_24] : memref<8x128xf32, #tpu.memory_space<vmem>>, vector<8x128xf32>
    tpu.vector_store %arg10[%c0_23, %c0_24], %30 {strides = array<i32>} : memref<8x128xf32, #tpu.memory_space<vmem>>, vector<8x128xf32>,
    return
  }
  func.func @transform_0(%arg0: i32) -> (i32, i32) {
    %c0_i32 = arith.constant 0 : i32
    %c0_i32_0 = arith.constant 0 : i32
    return %arg0, %c0_i32 : i32, i32
  }
  func.func @transform_1(%arg0: i32) -> (i32, i32) {
    %c0_i32 = arith.constant 0 : i32
    %c0_i32_0 = arith.constant 0 : i32
    %c0_i32_1 = arith.constant 0 : i32
    return %c0_i32, %c0_i32_0 : i32, i32
  }
  func.func @transform_2(%arg0: i32) -> (i32, i32) {
    %c0_i32 = arith.constant 0 : i32
    %c0_i32_0 = arith.constant 0 : i32
    %c0_i32_1 = arith.constant 0 : i32
    return %c0_i32, %c0_i32_0 : i32, i32
  }
  func.func @transform_3(%arg0: i32) -> (i32, i32) {
    %c0_i32 = arith.constant 0 : i32
    %c0_i32_0 = arith.constant 0 : i32
    %c0_i32_1 = arith.constant 0 : i32
    return %c0_i32, %c0_i32_0 : i32, i32
  }
  func.func @transform_4(%arg0: i32) -> (i32, i32) {
    %c0_i32 = arith.constant 0 : i32
    %c0_i32_0 = arith.constant 0 : i32
    %c0_i32_1 = arith.constant 0 : i32
    return %c0_i32, %c0_i32_0 : i32, i32
  }
  func.func @transform_5(%arg0: i32) -> (i32, i32) {
    %c0_i32 = arith.constant 0 : i32
    %c0_i32_0 = arith.constant 0 : i32
    %c0_i32_1 = arith.constant 0 : i32
    return %c0_i32, %c0_i32_0 : i32, i32
  }
  func.func @transform_6(%arg0: i32) -> (i32, i32) {
    %c0_i32 = arith.constant 0 : i32
    %c0_i32_0 = arith.constant 0 : i32
    %c0_i32_1 = arith.constant 0 : i32
    return %c0_i32, %c0_i32_0 : i32, i32
  }
  func.func @transform_7(%arg0: i32) -> (i32, i32) {
    %c0_i32 = arith.constant 0 : i32
    %c0_i32_0 = arith.constant 0 : i32
    %c0_i32_1 = arith.constant 0 : i32
    return %c0_i32, %c0_i32_0 : i32, i32
  }
  func.func @transform_8(%arg0: i32) -> (i32, i32) {
    %c0_i32 = arith.constant 0 : i32
    %c0_i32_0 = arith.constant 0 : i32
    %c0_i32_1 = arith.constant 0 : i32
    return %c0_i32, %c0_i32_0 : i32, i32
  }
  func.func @transform_9(%arg0: i32) -> (i32, i32) {
    %c0_i32 = arith.constant 0 : i32
    %c0_i32_0 = arith.constant 0 : i32
    return %arg0, %c0_i32 : i32, i32
  }
}

</mosaic_0001>

<bundles_post_ra>
// kernel: tpu_custom_call.1
= control target key start
LH: loop header
LB: loop body
LE: loop exit
PB: predicated region body
PF: predicated region fallthrough
CT: control target
= control target key end

     0   :  { %14 = vsyncpa [#allocation3], 0  ;;  %s3576_s0 = inlined_call_operand.hbm [shape: f32[8,784], index: 0, kind: input, shape index: {}]   ;;  %s3577_s1 = inlined_call_operand.hbm [shape: bf16[784,512], index: 1, kind: input, shape index: {}]   ;;  %s3578_s2 = inlined_call_operand.vmem [shape: f32[1,512], index: 2, kind: input, shape index: {}]   ;;  %s3579_s3 = inlined_call_operand.hbm [shape: bf16[512,256], index: 3, kind: input, shape index: {}]   ;;  %s3580_s4 = inlined_call_operand.vmem [shape: f32[1,256], index: 4, kind: input, shape index: {}]   ;;  %s3581_s5 = inlined_call_operand.hbm [shape: bf16[256,128], index: 5, kind: input, shape index: {}]   ;;  %s3582_s6 = inlined_call_operand.vmem [shape: f32[1,128], index: 6, kind: input, shape index: {}]   ;;  %s3583_s7 = inlined_call_operand.hbm [shape: bf16[128,128], index: 7, kind: input, shape index: {}]   ;;  %s3584_s8 = inlined_call_operand.vmem [shape: f32[1,128], index: 8, kind: input, shape index: {}]   ;;  %s3585_s9 = inlined_call_operand.hbm [shape: f32[8,128], index: 9, kind: output, shape index: {}]  }
   0x1   :  { %15 = vsyncpa [#allocation6], 0 }
   0x2   :  { %16 = vsyncpa [#allocation9], 0 }
   0x3   :  { %17 = vsyncpa [#allocation4], 0  ;;  %s3380_s30 = smov [#allocation5]   ;;  %s3240_s13 = scalar_lea.hbm %s3577_s1, 25088 }
   0x4   :  { %s33_s10 = sshll.u32 %s3380_s30, 4  ;;  %p3241_p0 = scmp.ne.s32.totalorder %s3577_s1, %s3240_s13  ;;  %s34_s10 = int_to_ptr.vmem [resolvable:$true] %s33_s10 }
   0x5   :  { %p3244_p1 = scmp.lt.u32.totalorder %s3240_s13, %s3577_s1 }
   0x7   :  { %p3246_p2 = pnand %p3244_p1, %p3241_p0 }
   0x9   :  { %3249 = shalt.err (!%p3246_p2)
}
   0xa   :  { %s3250_s18 = scalar_lea.vmem %s34_s10, 25088  ;;  %p3255_p4 = scmp.lt.s32.totalorder %s34_s10, %s34_s10 }
   0xb   :  { %p3251_p3 = scmp.ne.s32.totalorder %s34_s10, %s3250_s18  ;;  %p3256_p5 = scmp.lt.s32.totalorder %s3250_s18, %s3250_s18 }
   0xd   :  { %p3257_p6 = por %p3256_p5, %p3255_p4 }
   0xf   :  { %p3258_p7 = pnand %p3257_p6, %p3251_p3 }
  0x11   :  { %3261 = shalt.err (!%p3258_p7)
}
  0x12   :  { %s3381_s19 = smov 256   ;;  %s3382_s20 = smov 16  }
  0x13   :  { %39 = dma.hbm_to_vmem [thread:$0]  %s3577_s1, 25088, %s34_s10, [#allocation6], %s3381_s19, %s3381_s19, %s3382_s20  }
  0x14   :  { %s3383_s23 = smov [#allocation8]   ;;  %s3262_s27 = scalar_lea.hbm %s3581_s5, 2048 }
  0x15   :  { %s61_s24 = sshll.u32 %s3383_s23, 4  ;;  %p3263_p8 = scmp.ne.s32.totalorder %s3581_s5, %s3262_s27  ;;  %s62_s24 = int_to_ptr.vmem [resolvable:$true] %s61_s24 }
  0x16   :  { %p3266_p9 = scmp.lt.u32.totalorder %s3262_s27, %s3581_s5 }
  0x18   :  { %p3268_p10 = pnand %p3266_p9, %p3263_p8 }
  0x1a   :  { %3271 = shalt.err (!%p3268_p10)
}
  0x1b   :  { %s3272_s12 = scalar_lea.vmem %s62_s24, 2048  ;;  %p3277_p12 = scmp.lt.s32.totalorder %s62_s24, %s62_s24 }
  0x1c   :  { %p3273_p11 = scmp.ne.s32.totalorder %s62_s24, %s3272_s12  ;;  %p3278_p13 = scmp.lt.s32.totalorder %s3272_s12, %s3272_s12 }
  0x1e   :  { %p3279_p0 = por %p3278_p13, %p3277_p12 }
  0x20   :  { %p3280_p1 = pnand %p3279_p0, %p3273_p11 }
  0x22   :  { %3283 = shalt.err (!%p3280_p1)
}
  0x23   :  { %s3384_s1 = smov 64   ;;  %s3385_s10 = smov 4  }
  0x24   :  { %67 = dma.hbm_to_vmem [thread:$0]  %s3581_s5, 2048, %s62_s24, [#allocation9], %s3384_s1, %s3384_s1, %s3385_s10  }
  0x25   :  { %s3386_s15 = smov [#allocation2]   ;;  %s3387_s17 = smov [#allocation7]  }
  0x26   :  { %s24_s16 = sshll.u32 %s3386_s15, 4  ;;  %s47_s18 = sshll.u32 %s3387_s17, 4  ;;  %s25_s16 = int_to_ptr.vmem [resolvable:$true] %s24_s16  ;;  %s3472_s18 = int_to_ptr.vmem [resolvable:$true] %s47_s18 }
  0x27   :  { %s3284_s21 = scalar_lea.hbm %s3576_s0, 896 }
  0x28   :  { %p3285_p2 = scmp.ne.s32.totalorder %s3576_s0, %s3284_s21  ;;  %p3288_p3 = scmp.lt.u32.totalorder %s3284_s21, %s3576_s0 }
  0x2a   :  { %p3290_p4 = pnand %p3288_p3, %p3285_p2 }
  0x2c   :  { %3293 = shalt.err (!%p3290_p4)
}
  0x2d   :  { %s3294_s5 = scalar_lea.vmem %s25_s16, 896  ;;  %p3299_p6 = scmp.lt.s32.totalorder %s25_s16, %s25_s16 }
  0x2e   :  { %p3295_p5 = scmp.ne.s32.totalorder %s25_s16, %s3294_s5  ;;  %p3300_p7 = scmp.lt.s32.totalorder %s3294_s5, %s3294_s5 }
  0x30   :  { %p3301_p8 = por %p3300_p7, %p3299_p6 }
  0x32   :  { %p3302_p9 = pnand %p3301_p8, %p3295_p5 }
  0x34   :  { %3305 = shalt.err (!%p3302_p9)
}
  0x35   :  { %27 = dma.hbm_to_vmem [thread:$0]  %s3576_s0, 896, %s25_s16, [#allocation3]  }
  0x36   :  { %s3306_s30 = scalar_lea.hbm %s3579_s3, 8192 }
  0x37   :  { %p3307_p10 = scmp.ne.s32.totalorder %s3579_s3, %s3306_s30  ;;  %p3310_p11 = scmp.lt.u32.totalorder %s3306_s30, %s3579_s3 }
  0x39   :  { %p3312_p12 = pnand %p3310_p11, %p3307_p10 }
  0x3b   :  { %3315 = shalt.err (!%p3312_p12)
}
  0x3c   :  { %s3316_s15 = scalar_lea.vmem %s3472_s18, 8192  ;;  %p3321_p0 = scmp.lt.s32.totalorder %s3472_s18, %s3472_s18 }
  0x3d   :  { %p3317_p13 = scmp.ne.s32.totalorder %s3472_s18, %s3316_s15  ;;  %p3322_p1 = scmp.lt.s32.totalorder %s3316_s15, %s3316_s15 }
  0x3f   :  { %p3323_p2 = por %p3322_p1, %p3321_p0 }
  0x41   :  { %p3324_p3 = pnand %p3323_p2, %p3317_p13 }
  0x43   :  { %3327 = shalt.err (!%p3324_p3)
}
  0x44   :  { %s3388_s0 = smov 128   ;;  %s3389_s16 = smov 8  }
  0x45   :  { %53 = dma.hbm_to_vmem [thread:$0]  %s3579_s3, 8192, %s3472_s18, [#allocation6], %s3388_s0, %s3388_s0, %s3389_s16  }
  0x46   :  { %s3390_s20 = smov [#allocation10]   ;;  %s3328_s25 = scalar_lea.hbm %s3583_s7, 1024 }
  0x47   :  { %s75_s21 = sshll.u32 %s3390_s20, 4  ;;  %p3329_p4 = scmp.ne.s32.totalorder %s3583_s7, %s3328_s25  ;;  %s76_s21 = int_to_ptr.vmem [resolvable:$true] %s75_s21 }
  0x48   :  { %p3332_p5 = scmp.lt.u32.totalorder %s3328_s25, %s3583_s7 }
  0x4a   :  { %p3334_p6 = pnand %p3332_p5, %p3329_p4 }
  0x4c   :  { %3337 = shalt.err (!%p3334_p6)
}
  0x4d   :  { %s3338_s28 = scalar_lea.vmem %s76_s21, 1024  ;;  %p3343_p8 = scmp.lt.s32.totalorder %s76_s21, %s76_s21 }
  0x4e   :  { %p3339_p7 = scmp.ne.s32.totalorder %s76_s21, %s3338_s28  ;;  %p3344_p9 = scmp.lt.s32.totalorder %s3338_s28, %s3338_s28 }
  0x50   :  { %p3345_p10 = por %p3344_p9, %p3343_p8 }
  0x52   :  { %p3346_p11 = pnand %p3345_p10, %p3339_p7 }
  0x54   :  { %3349 = shalt.err (!%p3346_p11)
}
  0x55   :  { %81 = dma.hbm_to_vmem [thread:$0]  %s3583_s7, 1024, %s76_s21, [#allocation9], %s3384_s1, %s3384_s1, %s3385_s10  }
  0x56   :  { %3372 = dma.done.wait [#allocation3], 896  }
  0x57   :  { %3373 = vsyncadd [#allocation3], 4294966400 }
  0x58   :  { %3374 = dma.done.wait [#allocation6], 33280  }
  0x59   :  { %3375 = vsyncadd [#allocation6], 4294934016 }
  0x5a   :  { %3376 = dma.done.wait [#allocation9], 3072  }
  0x5b   :  { %3377 = vsyncadd [#allocation9], 4294964224  ;;  %v3391_v0 = vmov 0   ;;  %v2826_v1 = vld [vmem:[#allocation5 + $0x4] ss:$16 sps:$4 sm:$0xff]   ;;  %v106_v9 = vld [vmem:[#allocation2 + $0x30] sm:$0xff] }
  0x5c   :  { %1471 = vmatprep.mubr.bf16.mxu1 %v3391_v0  ;;  %v2828_v2 = vld [vmem:[#allocation5 + $0x604] ss:$16 sps:$4 sm:$0xff]   ;;  %1316 = vmatprep.subr.bf16.mxu0 %v2826_v1  ;;  %v2830_v3 = vld [vmem:[#allocation5] ss:$16 sps:$4 sm:$0xff]   ;;  %v2834_v6 = vld [vmem:[#allocation5 + $0x8] ss:$16 sps:$4 sm:$0xff]   ;;  %v3519_v10 = vpack.c.bf16 %v106_v9, %v106_v9 }
  0x5d   :  { %v2831_v4 = vld [vmem:[#allocation5 + $0x600] ss:$16 sps:$4 sm:$0xff]   ;;  %1439 = vmatprep.subr.bf16.mxu1 %v2828_v2  ;;  %v2832_v5 = vld [vmem:[#allocation5 + $0x24] ss:$16 sps:$4 sm:$0xff]   ;;  %1317 = vmatpush1.bf16.msra.mxu0 %v2830_v3  ;;  %v2836_v7 = vld [vmem:[#allocation5 + $0xc] ss:$16 sps:$4 sm:$0xff]  }
  0x5e   :  { %1440 = vmatpush1.bf16.msra.mxu1 %v2831_v4  ;;  %1318 = vmatprep.subr.bf16.mxu0 %v2832_v5  ;;  %v2837_v8 = vld [vmem:[#allocation5 + $0x20] ss:$16 sps:$4 sm:$0xff]   ;;  %vm1312_vm0 = vcmask 130048   ;;  %v2838_v11 = vld [vmem:[#allocation5 + $0x44] ss:$16 sps:$4 sm:$0xff]   ;;  %vm3393_vm1 = vmmov 0  }
  0x5f   :  { %1480 = vmatprep.subr.bf16.mxu1 %v2836_v7  ;;  %v2840_v12 = vld [vmem:[#allocation5 + $0x28] ss:$16 sps:$4 sm:$0xff]   ;;  %v2842_v13 = vld [vmem:[#allocation5 + $0x2c] ss:$16 sps:$4 sm:$0xff]   ;;  %v2843_v14 = vld [vmem:[#allocation5 + $0x40] ss:$16 sps:$4 sm:$0xff]  }
  0x60   :  { %v2844_v15 = vld [vmem:[#allocation5 + $0x64] ss:$16 sps:$4 sm:$0xff]   ;;  %v2848_v16 = vld [vmem:[#allocation5 + $0x4c] ss:$16 sps:$4 sm:$0xff]   ;;  %v2849_v17 = vld [vmem:[#allocation5 + $0x60] ss:$16 sps:$4 sm:$0xff]  }
  0x61   :  { %1319 = vmatpush1.bf16.msra.mxu0 %v2837_v8  ;;  %2636 = vmatmul.mubr.msk.bf16.vlgmr.msra.gmra.mrb[0].mxu1 %vm1312_vm0, %v3519_v10  ;;  %v2846_v18 = vld [vmem:[#allocation5 + $0x48] ss:$16 sps:$4 sm:$0xff]   ;;  %v2850_v19 = vld [vmem:[#allocation5 + $0x84] ss:$16 sps:$4 sm:$0xff]   ;;  %v2854_v20 = vld [vmem:[#allocation5 + $0x6c] ss:$16 sps:$4 sm:$0xff]  }
  0x62   :  { %1481 = vmatpush1.bf16.msra.mxu1 %v2834_v6  ;;  %1320 = vmatprep.subr.bf16.mxu0 %v2838_v11  ;;  %v2852_v21 = vld [vmem:[#allocation5 + $0x68] ss:$16 sps:$4 sm:$0xff]   ;;  %v2855_v22 = vld [vmem:[#allocation5 + $0x80] ss:$16 sps:$4 sm:$0xff]   ;;  %v2856_v23 = vld [vmem:[#allocation5 + $0xa4] ss:$16 sps:$4 sm:$0xff]  }
  0x63   :  { %1482 = vmatprep.subr.bf16.mxu1 %v2842_v13  ;;  %v2860_v24 = vld [vmem:[#allocation5 + $0x8c] ss:$16 sps:$4 sm:$0xff]   ;;  %v2861_v25 = vld [vmem:[#allocation5 + $0xa0] ss:$16 sps:$4 sm:$0xff]   ;;  %v2858_v26 = vld [vmem:[#allocation5 + $0x88] ss:$16 sps:$4 sm:$0xff]  }
  0x64   :  { %v2862_v27 = vld [vmem:[#allocation5 + $0xc4] ss:$16 sps:$4 sm:$0xff]   ;;  %v2866_v28 = vld [vmem:[#allocation5 + $0xac] ss:$16 sps:$4 sm:$0xff]   ;;  %v2864_v29 = vld [vmem:[#allocation5 + $0xa8] ss:$16 sps:$4 sm:$0xff]  }
  0x65   :  { %1321 = vmatpush1.bf16.msra.mxu0 %v2843_v14  ;;  %v2867_v30 = vld [vmem:[#allocation5 + $0xc0] ss:$16 sps:$4 sm:$0xff]   ;;  %v2868_v31 = vld [vmem:[#allocation5 + $0xe4] ss:$16 sps:$4 sm:$0xff]   ;;  %v2872_v32 = vld [vmem:[#allocation5 + $0xcc] ss:$16 sps:$4 sm:$0xff]  }
  0x66   :  { %1483 = vmatpush1.bf16.msra.mxu1 %v2840_v12  ;;  %1322 = vmatprep.subr.bf16.mxu0 %v2844_v15  ;;  %v2873_v33 = vld [vmem:[#allocation5 + $0xe0] ss:$16 sps:$4 sm:$0xff]   ;;  %v2870_v34 = vld [vmem:[#allocation5 + $0xc8] ss:$16 sps:$4 sm:$0xff]   ;;  %v2874_v35 = vld [vmem:[#allocation5 + $0x104] ss:$16 sps:$4 sm:$0xff]  }
  0x67   :  { %1484 = vmatprep.subr.bf16.mxu1 %v2848_v16  ;;  %v2878_v36 = vld [vmem:[#allocation5 + $0xec] ss:$16 sps:$4 sm:$0xff]   ;;  %v2876_v37 = vld [vmem:[#allocation5 + $0xe8] ss:$16 sps:$4 sm:$0xff]   ;;  %v2879_v38 = vld [vmem:[#allocation5 + $0x100] ss:$16 sps:$4 sm:$0xff]  }
  0x68   :  { %v2880_v39 = vld [vmem:[#allocation5 + $0x124] ss:$16 sps:$4 sm:$0xff]   ;;  %v2884_v40 = vld [vmem:[#allocation5 + $0x10c] ss:$16 sps:$4 sm:$0xff]   ;;  %v2885_v41 = vld [vmem:[#allocation5 + $0x120] ss:$16 sps:$4 sm:$0xff]  }
  0x69   :  { %1323 = vmatpush1.bf16.msra.mxu0 %v2849_v17  ;;  %v2882_v42 = vld [vmem:[#allocation5 + $0x108] ss:$16 sps:$4 sm:$0xff]   ;;  %v2886_v43 = vld [vmem:[#allocation5 + $0x144] ss:$16 sps:$4 sm:$0xff]   ;;  %v2890_v44 = vld [vmem:[#allocation5 + $0x12c] ss:$16 sps:$4 sm:$0xff]  }
  0x6a   :  { %1485 = vmatpush1.bf16.msra.mxu1 %v2846_v18  ;;  %1324 = vmatprep.subr.bf16.mxu0 %v2850_v19  ;;  %v2888_v45 = vld [vmem:[#allocation5 + $0x128] ss:$16 sps:$4 sm:$0xff]   ;;  %v2891_v46 = vld [vmem:[#allocation5 + $0x140] ss:$16 sps:$4 sm:$0xff]   ;;  %v2892_v47 = vld [vmem:[#allocation5 + $0x164] ss:$16 sps:$4 sm:$0xff]  }
  0x6b   :  { %1486 = vmatprep.subr.bf16.mxu1 %v2854_v20  ;;  %v2896_v48 = vld [vmem:[#allocation5 + $0x14c] ss:$16 sps:$4 sm:$0xff]   ;;  %v101_v49 = vld [vmem:[#allocation2 + $0x8] sm:$0xff]  ;;  %v2894_v52 = vld [vmem:[#allocation5 + $0x148] ss:$16 sps:$4 sm:$0xff]   ;;  %s3394_s12 = smov [#allocation11]  }
  0x6c   :  { %v2897_v50 = vld [vmem:[#allocation5 + $0x160] ss:$16 sps:$4 sm:$0xff]   ;;  %v108_v51 = vpack.c.bf16 %v101_v49, %v101_v49  ;;  %v2898_v53 = vld [vmem:[#allocation5 + $0x184] ss:$16 sps:$4 sm:$0xff]   ;;  %v2902_v54 = vld [vmem:[#allocation5 + $0x16c] ss:$16 sps:$4 sm:$0xff]  }
  0x6d   :  { %1325 = vmatpush1.bf16.msra.mxu0 %v2855_v22  ;;  %v2900_v55 = vld [vmem:[#allocation5 + $0x168] ss:$16 sps:$4 sm:$0xff]   ;;  %v2903_v56 = vld [vmem:[#allocation5 + $0x180] ss:$16 sps:$4 sm:$0xff]   ;;  %v2904_v57 = vld [vmem:[#allocation5 + $0x1a4] ss:$16 sps:$4 sm:$0xff]  }
  0x6e   :  { %1487 = vmatpush1.bf16.msra.mxu1 %v2852_v21  ;;  %1326 = vmatprep.subr.bf16.mxu0 %v2856_v23  ;;  %v2908_v58 = vld [vmem:[#allocation5 + $0x18c] ss:$16 sps:$4 sm:$0xff]   ;;  %v2906_v59 = vld [vmem:[#allocation5 + $0x188] ss:$16 sps:$4 sm:$0xff]   ;;  %v2909_v60 = vld [vmem:[#allocation5 + $0x1a0] ss:$16 sps:$4 sm:$0xff]  }
  0x6f   :  { %1488 = vmatprep.subr.bf16.mxu1 %v2860_v24  ;;  %1348 = vmatprep.mubr.bf16.mxu0 %v108_v51  ;;  %v2910_v61 = vld [vmem:[#allocation5 + $0x1c4] ss:$16 sps:$4 sm:$0xff]   ;;  %v2914_v62 = vld [vmem:[#allocation5 + $0x1ac] ss:$16 sps:$4 sm:$0xff]   ;;  %v2912_v63 = vld [vmem:[#allocation5 + $0x1a8] ss:$16 sps:$4 sm:$0xff]  }
  0x70   :  { %1512 = vmatprep.mubr.bf16.mxu1 %v108_v51  ;;  %v2915_v1 = vld [vmem:[#allocation5 + $0x1c0] ss:$16 sps:$4 sm:$0xff]   ;;  %v2916_v2 = vld [vmem:[#allocation5 + $0x1e4] ss:$16 sps:$4 sm:$0xff]   ;;  %v2920_v3 = vld [vmem:[#allocation5 + $0x1cc] ss:$16 sps:$4 sm:$0xff]  }
  0x71   :  { %1327 = vmatpush1.bf16.msra.mxu0 %v2861_v25  ;;  %v2918_v4 = vld [vmem:[#allocation5 + $0x1c8] ss:$16 sps:$4 sm:$0xff]   ;;  %v2921_v5 = vld [vmem:[#allocation5 + $0x1e0] ss:$16 sps:$4 sm:$0xff]   ;;  %v2924_v7 = vld [vmem:[#allocation5 + $0x204] ss:$16 sps:$4 sm:$0xff]  }
  0x72   :  { %1489 = vmatpush1.bf16.msra.mxu1 %v2858_v26  ;;  %1328 = vmatprep.subr.bf16.mxu0 %v2862_v27  ;;  %v100_v6 = vld [vmem:[#allocation2] sm:$0xff]  ;;  %v2922_v11 = vld [vmem:[#allocation5 + $0x200] ss:$16 sps:$4 sm:$0xff]   ;;  %v2930_v13 = vld [vmem:[#allocation5 + $0x224] ss:$16 sps:$4 sm:$0xff]   ;;  %s2429_s13 = sshll.u32 %s3394_s12, 4  ;;  %s2430_s13 = int_to_ptr.vmem [resolvable:$true] %s2429_s13 }
  0x73   :  { %1490 = vmatprep.subr.bf16.mxu1 %v2866_v28  ;;  %v2927_v8 = vld [vmem:[#allocation5 + $0x1ec] ss:$16 sps:$4 sm:$0xff]   ;;  %v107_v9 = vpack.c.bf16 %v100_v6, %v100_v6  ;;  %v2925_v12 = vld [vmem:[#allocation5 + $0x1e8] ss:$16 sps:$4 sm:$0xff]   ;;  %v2928_v15 = vld [vmem:[#allocation5 + $0x220] ss:$16 sps:$4 sm:$0xff]   ;;  %p3355_p13 = scmp.lt.s32.totalorder %s2430_s13, %s2430_s13 }
  0x74   :  { %v2933_v14 = vld [vmem:[#allocation5 + $0x20c] ss:$16 sps:$4 sm:$0xff]   ;;  %v2931_v16 = vld [vmem:[#allocation5 + $0x208] ss:$16 sps:$4 sm:$0xff]   ;;  %v2936_v17 = vld [vmem:[#allocation5 + $0x244] ss:$16 sps:$4 sm:$0xff]  }
  0x75   :  { %1329 = vmatpush1.bf16.msra.mxu0 %v2867_v30  ;;  %v2939_v18 = vld [vmem:[#allocation5 + $0x22c] ss:$16 sps:$4 sm:$0xff]   ;;  %v2934_v19 = vld [vmem:[#allocation5 + $0x240] ss:$16 sps:$4 sm:$0xff]   ;;  %v2937_v20 = vld [vmem:[#allocation5 + $0x228] ss:$16 sps:$4 sm:$0xff]  }
  0x76   :  { %1491 = vmatpush1.bf16.msra.mxu1 %v2864_v29  ;;  %1330 = vmatprep.subr.bf16.mxu0 %v2868_v31  ;;  %v2942_v21 = vld [vmem:[#allocation5 + $0x264] ss:$16 sps:$4 sm:$0xff]   ;;  %v2945_v22 = vld [vmem:[#allocation5 + $0x24c] ss:$16 sps:$4 sm:$0xff]   ;;  %v2940_v23 = vld [vmem:[#allocation5 + $0x260] ss:$16 sps:$4 sm:$0xff]  }
  0x77   :  { %1492 = vmatprep.subr.bf16.mxu1 %v2872_v32  ;;  %v2943_v24 = vld [vmem:[#allocation5 + $0x248] ss:$16 sps:$4 sm:$0xff]   ;;  %v2948_v25 = vld [vmem:[#allocation5 + $0x284] ss:$16 sps:$4 sm:$0xff]   ;;  %v2951_v26 = vld [vmem:[#allocation5 + $0x26c] ss:$16 sps:$4 sm:$0xff]  }
  0x78   :  { %v2946_v27 = vld [vmem:[#allocation5 + $0x280] ss:$16 sps:$4 sm:$0xff]   ;;  %v2949_v28 = vld [vmem:[#allocation5 + $0x268] ss:$16 sps:$4 sm:$0xff]   ;;  %v2954_v29 = vld [vmem:[#allocation5 + $0x2a4] ss:$16 sps:$4 sm:$0xff]  }
  0x79   :  { %1331 = vmatpush1.bf16.msra.mxu0 %v2873_v33  ;;  %v2957_v30 = vld [vmem:[#allocation5 + $0x28c] ss:$16 sps:$4 sm:$0xff]   ;;  %v2952_v31 = vld [vmem:[#allocation5 + $0x2a0] ss:$16 sps:$4 sm:$0xff]   ;;  %v2955_v32 = vld [vmem:[#allocation5 + $0x288] ss:$16 sps:$4 sm:$0xff]  }
  0x7a   :  { %1493 = vmatpush1.bf16.msra.mxu1 %v2870_v34  ;;  %1332 = vmatprep.subr.bf16.mxu0 %v2874_v35  ;;  %v2960_v33 = vld [vmem:[#allocation5 + $0x2c4] ss:$16 sps:$4 sm:$0xff]   ;;  %v2963_v34 = vld [vmem:[#allocation5 + $0x2ac] ss:$16 sps:$4 sm:$0xff]   ;;  %v2976_v49 = vld [vmem:[#allocation5 + $0x320] ss:$16 sps:$4 sm:$0xff]  }
  0x7b   :  { %1494 = vmatprep.subr.bf16.mxu1 %v2878_v36  ;;  %v103_v35 = vld [vmem:[#allocation2 + $0x18] sm:$0xff] }
  0x7c   :  { %v110_v36 = vpack.c.bf16 %v103_v35, %v103_v35  ;;  %v2984_v51 = vld [vmem:[#allocation5 + $0x344] ss:$16 sps:$4 sm:$0xff]   ;;  %v3006_v6 = vld [vmem:[#allocation5 + $0x3c0] ss:$16 sps:$4 sm:$0xff]  }
  0x7d   :  { %1333 = vmatpush1.bf16.msra.mxu0 %v2879_v38  ;;  %v2961_v38 = vld [vmem:[#allocation5 + $0x2a8] ss:$16 sps:$4 sm:$0xff]   ;;  %v3042_v35 = vld [vmem:[#allocation5 + $0x480] ss:$16 sps:$4 sm:$0xff]  }
  0x7e   :  { %1495 = vmatpush1.bf16.msra.mxu1 %v2876_v37  ;;  %1334 = vmatprep.subr.bf16.mxu0 %v2880_v39  ;;  %v2958_v37 = vld [vmem:[#allocation5 + $0x2c0] ss:$16 sps:$4 sm:$0xff]   ;;  %v2966_v39 = vld [vmem:[#allocation5 + $0x2e4] ss:$16 sps:$4 sm:$0xff]  }
  0x7f   :  { %1496 = vmatprep.subr.bf16.mxu1 %v2884_v40  ;;  %v2969_v40 = vld [vmem:[#allocation5 + $0x2cc] ss:$16 sps:$4 sm:$0xff]  }
  0x81   :  { %1335 = vmatpush1.bf16.msra.mxu0 %v2885_v41  ;;  %v2964_v41 = vld [vmem:[#allocation5 + $0x2e0] ss:$16 sps:$4 sm:$0xff]  }
  0x82   :  { %1497 = vmatpush1.bf16.msra.mxu1 %v2882_v42  ;;  %1336 = vmatprep.subr.bf16.mxu0 %v2886_v43  ;;  %v2967_v42 = vld [vmem:[#allocation5 + $0x2c8] ss:$16 sps:$4 sm:$0xff]   ;;  %v2972_v43 = vld [vmem:[#allocation5 + $0x304] ss:$16 sps:$4 sm:$0xff]  }
  0x83   :  { %1498 = vmatprep.subr.bf16.mxu1 %v2890_v44  ;;  %v2975_v44 = vld [vmem:[#allocation5 + $0x2ec] ss:$16 sps:$4 sm:$0xff]  }
  0x85   :  { %1337 = vmatpush1.bf16.msra.mxu0 %v2891_v46  ;;  %v2973_v46 = vld [vmem:[#allocation5 + $0x2e8] ss:$16 sps:$4 sm:$0xff]  }
  0x86   :  { %1499 = vmatpush1.bf16.msra.mxu1 %v2888_v45  ;;  %1338 = vmatprep.subr.bf16.mxu0 %v2892_v47  ;;  %v2970_v45 = vld [vmem:[#allocation5 + $0x300] ss:$16 sps:$4 sm:$0xff]   ;;  %v2978_v47 = vld [vmem:[#allocation5 + $0x324] ss:$16 sps:$4 sm:$0xff]  }
  0x87   :  { %1500 = vmatprep.subr.bf16.mxu1 %v2896_v48  ;;  %v2981_v48 = vld [vmem:[#allocation5 + $0x30c] ss:$16 sps:$4 sm:$0xff]  }
  0x89   :  { %1339 = vmatpush1.bf16.msra.mxu0 %v2897_v50  ;;  %v2979_v50 = vld [vmem:[#allocation5 + $0x308] ss:$16 sps:$4 sm:$0xff]  }
  0x8a   :  { %1501 = vmatpush1.bf16.msra.mxu1 %v2894_v52  ;;  %1340 = vmatprep.subr.bf16.mxu0 %v2898_v53  ;;  %v2987_v52 = vld [vmem:[#allocation5 + $0x32c] ss:$16 sps:$4 sm:$0xff]   ;;  %v2982_v53 = vld [vmem:[#allocation5 + $0x340] ss:$16 sps:$4 sm:$0xff]  }
  0x8b   :  { %1502 = vmatprep.subr.bf16.mxu1 %v2902_v54  ;;  %v2985_v54 = vld [vmem:[#allocation5 + $0x328] ss:$16 sps:$4 sm:$0xff]  }
  0x8d   :  { %1341 = vmatpush1.bf16.msra.mxu0 %v2903_v56  ;;  %v2993_v56 = vld [vmem:[#allocation5 + $0x34c] ss:$16 sps:$4 sm:$0xff]  }
  0x8e   :  { %1503 = vmatpush1.bf16.msra.mxu1 %v2900_v55  ;;  %1342 = vmatprep.subr.bf16.mxu0 %v2904_v57  ;;  %v2990_v55 = vld [vmem:[#allocation5 + $0x364] ss:$16 sps:$4 sm:$0xff]   ;;  %v2988_v57 = vld [vmem:[#allocation5 + $0x360] ss:$16 sps:$4 sm:$0xff]  }
  0x8f   :  { %1504 = vmatprep.subr.bf16.mxu1 %v2908_v58  ;;  %v2991_v58 = vld [vmem:[#allocation5 + $0x348] ss:$16 sps:$4 sm:$0xff]  }
  0x91   :  { %1343 = vmatpush1.bf16.msra.mxu0 %v2909_v60  ;;  %v2999_v60 = vld [vmem:[#allocation5 + $0x36c] ss:$16 sps:$4 sm:$0xff]  }
  0x92   :  { %1505 = vmatpush1.bf16.msra.mxu1 %v2906_v59  ;;  %1344 = vmatprep.subr.bf16.mxu0 %v2910_v61  ;;  %v2996_v59 = vld [vmem:[#allocation5 + $0x384] ss:$16 sps:$4 sm:$0xff]   ;;  %v2994_v61 = vld [vmem:[#allocation5 + $0x380] ss:$16 sps:$4 sm:$0xff]  }
  0x93   :  { %1506 = vmatprep.subr.bf16.mxu1 %v2914_v62  ;;  %v2997_v62 = vld [vmem:[#allocation5 + $0x368] ss:$16 sps:$4 sm:$0xff]  }
  0x95   :  { %1345 = vmatpush1.bf16.msra.mxu0 %v2915_v1  ;;  %v3005_v1 = vld [vmem:[#allocation5 + $0x38c] ss:$16 sps:$4 sm:$0xff]  }
  0x96   :  { %1507 = vmatpush1.bf16.msra.mxu1 %v2912_v63  ;;  %1346 = vmatprep.subr.bf16.mxu0 %v2916_v2  ;;  %v3002_v63 = vld [vmem:[#allocation5 + $0x3a4] ss:$16 sps:$4 sm:$0xff]   ;;  %v3000_v2 = vld [vmem:[#allocation5 + $0x3a0] ss:$16 sps:$4 sm:$0xff]  }
  0x97   :  { %1508 = vmatprep.subr.bf16.mxu1 %v2920_v3  ;;  %v3003_v3 = vld [vmem:[#allocation5 + $0x388] ss:$16 sps:$4 sm:$0xff]  }
  0x99   :  { %1347 = vmatpush1.bf16.msra.mxu0 %v2921_v5  ;;  %v3011_v5 = vld [vmem:[#allocation5 + $0x3ac] ss:$16 sps:$4 sm:$0xff]  }
  0x9a   :  { %1509 = vmatpush1.bf16.msra.mxu1 %v2918_v4  ;;  %1357 = vmatprep.subr.bf16.mxu0 %v2924_v7  ;;  %v3008_v4 = vld [vmem:[#allocation5 + $0x3c4] ss:$16 sps:$4 sm:$0xff]   ;;  %v3009_v7 = vld [vmem:[#allocation5 + $0x3a8] ss:$16 sps:$4 sm:$0xff]  }
  0x9b   :  { %1510 = vmatprep.subr.bf16.mxu1 %v2927_v8  ;;  %v3014_v8 = vld [vmem:[#allocation5 + $0x3e4] ss:$16 sps:$4 sm:$0xff]  }
  0x9c   :  { %1349 = vmatmul.mubr.bf16.vlgmr.msra.gmra.mrb[0].mxu0 %v107_v9 }
  0x9d   :  { %1358 = vmatpush1.bf16.msra.mxu0 %v2922_v11  ;;  %1389 = vmatprep.mubr.bf16.mxu0 %v110_v36  ;;  %v3012_v11 = vld [vmem:[#allocation5 + $0x3e0] ss:$16 sps:$4 sm:$0xff]  }
  0x9e   :  { %1511 = vmatpush1.bf16.msra.mxu1 %v2925_v12  ;;  %1359 = vmatprep.subr.bf16.mxu0 %v2930_v13  ;;  %v102_v12 = vld [vmem:[#allocation2 + $0x10] sm:$0xff] }
  0x9f   :  { %1521 = vmatprep.subr.bf16.mxu1 %v2933_v14  ;;  %v3015_v13 = vld [vmem:[#allocation5 + $0x3c8] ss:$16 sps:$4 sm:$0xff]   ;;  %v3020_v14 = vld [vmem:[#allocation5 + $0x404] ss:$16 sps:$4 sm:$0xff]  }
  0xa1   :  { %1360 = vmatpush1.bf16.msra.mxu0 %v2928_v15  ;;  %1513 = vmatmul.mubr.bf16.vlgmr.msra.gmra.mrb[4].mxu1 %v107_v9  ;;  %v3017_v9 = vld [vmem:[#allocation5 + $0x3cc] ss:$16 sps:$4 sm:$0xff]  }
  0xa2   :  { %1522 = vmatpush1.bf16.msra.mxu1 %v2931_v16  ;;  %1361 = vmatprep.subr.bf16.mxu0 %v2936_v17  ;;  %v3023_v15 = vld [vmem:[#allocation5 + $0x3ec] ss:$16 sps:$4 sm:$0xff]   ;;  %v109_v16 = vpack.c.bf16 %v102_v12, %v102_v12  ;;  %v3018_v17 = vld [vmem:[#allocation5 + $0x400] ss:$16 sps:$4 sm:$0xff]  }
  0xa3   :  { %1523 = vmatprep.subr.bf16.mxu1 %v2939_v18  ;;  %1553 = vmatprep.mubr.bf16.mxu1 %v110_v36  ;;  %v3021_v18 = vld [vmem:[#allocation5 + $0x3e8] ss:$16 sps:$4 sm:$0xff]   ;;  %v3107_v12 = vld [vmem:[#allocation5 + $0x5ac] ss:$16 sps:$4 sm:$0xff]  }
  0xa4   :  { %v3045_v36 = vld [vmem:[#allocation5 + $0x468] ss:$16 sps:$4 sm:$0xff]  }
  0xa5   :  { %1362 = vmatpush1.bf16.msra.mxu0 %v2934_v19  ;;  %v3026_v19 = vld [vmem:[#allocation5 + $0x424] ss:$16 sps:$4 sm:$0xff]  }
  0xa6   :  { %1524 = vmatpush1.bf16.msra.mxu1 %v2937_v20  ;;  %1363 = vmatprep.subr.bf16.mxu0 %v2942_v21  ;;  %v105_v20 = vld [vmem:[#allocation2 + $0x28] sm:$0xff]  ;;  %v3029_v21 = vld [vmem:[#allocation5 + $0x40c] ss:$16 sps:$4 sm:$0xff]  }
  0xa7   :  { %1525 = vmatprep.subr.bf16.mxu1 %v2945_v22  ;;  %v112_v22 = vpack.c.bf16 %v105_v20, %v105_v20  ;;  %v3122_v20 = vld [vmem:[#allocation7 + $0x4] ss:$8 sps:$4 sm:$0xff]  }
  0xa9   :  { %1364 = vmatpush1.bf16.msra.mxu0 %v2940_v23  ;;  %v3024_v23 = vld [vmem:[#allocation5 + $0x420] ss:$16 sps:$4 sm:$0xff]  }
  0xaa   :  { %1526 = vmatpush1.bf16.msra.mxu1 %v2943_v24  ;;  %1365 = vmatprep.subr.bf16.mxu0 %v2948_v25  ;;  %v3027_v24 = vld [vmem:[#allocation5 + $0x408] ss:$16 sps:$4 sm:$0xff]   ;;  %v3032_v25 = vld [vmem:[#allocation5 + $0x444] ss:$16 sps:$4 sm:$0xff]  }
  0xab   :  { %1527 = vmatprep.subr.bf16.mxu1 %v2951_v26  ;;  %v3035_v26 = vld [vmem:[#allocation5 + $0x42c] ss:$16 sps:$4 sm:$0xff]  }
  0xad   :  { %1366 = vmatpush1.bf16.msra.mxu0 %v2946_v27  ;;  %v3030_v27 = vld [vmem:[#allocation5 + $0x440] ss:$16 sps:$4 sm:$0xff]  }
  0xae   :  { %1528 = vmatpush1.bf16.msra.mxu1 %v2949_v28  ;;  %1367 = vmatprep.subr.bf16.mxu0 %v2954_v29  ;;  %v3033_v28 = vld [vmem:[#allocation5 + $0x428] ss:$16 sps:$4 sm:$0xff]   ;;  %v3038_v29 = vld [vmem:[#allocation5 + $0x464] ss:$16 sps:$4 sm:$0xff]  }
  0xaf   :  { %1529 = vmatprep.subr.bf16.mxu1 %v2957_v30  ;;  %v3041_v30 = vld [vmem:[#allocation5 + $0x44c] ss:$16 sps:$4 sm:$0xff]  }
  0xb1   :  { %1368 = vmatpush1.bf16.msra.mxu0 %v2952_v31  ;;  %v3036_v31 = vld [vmem:[#allocation5 + $0x460] ss:$16 sps:$4 sm:$0xff]  }
  0xb2   :  { %1530 = vmatpush1.bf16.msra.mxu1 %v2955_v32  ;;  %1369 = vmatprep.subr.bf16.mxu0 %v2960_v33  ;;  %v3039_v32 = vld [vmem:[#allocation5 + $0x448] ss:$16 sps:$4 sm:$0xff]   ;;  %v3044_v33 = vld [vmem:[#allocation5 + $0x484] ss:$16 sps:$4 sm:$0xff]  }
  0xb3   :  { %1531 = vmatprep.subr.bf16.mxu1 %v2963_v34  ;;  %v3047_v34 = vld [vmem:[#allocation5 + $0x46c] ss:$16 sps:$4 sm:$0xff]  }
  0xb5   :  { %1370 = vmatpush1.bf16.msra.mxu0 %v2958_v37  ;;  %v3050_v37 = vld [vmem:[#allocation5 + $0x4a4] ss:$16 sps:$4 sm:$0xff]  }
  0xb6   :  { %1532 = vmatpush1.bf16.msra.mxu1 %v2961_v38  ;;  %1371 = vmatprep.subr.bf16.mxu0 %v2966_v39  ;;  %v3053_v38 = vld [vmem:[#allocation5 + $0x48c] ss:$16 sps:$4 sm:$0xff]   ;;  %v3048_v39 = vld [vmem:[#allocation5 + $0x4a0] ss:$16 sps:$4 sm:$0xff]  }
  0xb7   :  { %1533 = vmatprep.subr.bf16.mxu1 %v2969_v40  ;;  %v3051_v40 = vld [vmem:[#allocation5 + $0x488] ss:$16 sps:$4 sm:$0xff]  }
  0xb9   :  { %1372 = vmatpush1.bf16.msra.mxu0 %v2964_v41  ;;  %v3056_v41 = vld [vmem:[#allocation5 + $0x4c4] ss:$16 sps:$4 sm:$0xff]  }
  0xba   :  { %1534 = vmatpush1.bf16.msra.mxu1 %v2967_v42  ;;  %1373 = vmatprep.subr.bf16.mxu0 %v2972_v43  ;;  %v3059_v42 = vld [vmem:[#allocation5 + $0x4ac] ss:$16 sps:$4 sm:$0xff]   ;;  %v3054_v43 = vld [vmem:[#allocation5 + $0x4c0] ss:$16 sps:$4 sm:$0xff]  }
  0xbb   :  { %1535 = vmatprep.subr.bf16.mxu1 %v2975_v44  ;;  %v3057_v44 = vld [vmem:[#allocation5 + $0x4a8] ss:$16 sps:$4 sm:$0xff]  }
  0xbd   :  { %1374 = vmatpush1.bf16.msra.mxu0 %v2970_v45  ;;  %v3062_v45 = vld [vmem:[#allocation5 + $0x4e4] ss:$16 sps:$4 sm:$0xff]  }
  0xbe   :  { %1536 = vmatpush1.bf16.msra.mxu1 %v2973_v46  ;;  %1375 = vmatprep.subr.bf16.mxu0 %v2978_v47  ;;  %v3065_v46 = vld [vmem:[#allocation5 + $0x4cc] ss:$16 sps:$4 sm:$0xff]   ;;  %v3060_v47 = vld [vmem:[#allocation5 + $0x4e0] ss:$16 sps:$4 sm:$0xff]  }
  0xbf   :  { %1537 = vmatprep.subr.bf16.mxu1 %v2981_v48  ;;  %v3063_v48 = vld [vmem:[#allocation5 + $0x4c8] ss:$16 sps:$4 sm:$0xff]  }
  0xc1   :  { %1376 = vmatpush1.bf16.msra.mxu0 %v2976_v49  ;;  %v3068_v49 = vld [vmem:[#allocation5 + $0x504] ss:$16 sps:$4 sm:$0xff]  }
  0xc2   :  { %1538 = vmatpush1.bf16.msra.mxu1 %v2979_v50  ;;  %1377 = vmatprep.subr.bf16.mxu0 %v2984_v51  ;;  %v3071_v50 = vld [vmem:[#allocation5 + $0x4ec] ss:$16 sps:$4 sm:$0xff]   ;;  %v3066_v51 = vld [vmem:[#allocation5 + $0x500] ss:$16 sps:$4 sm:$0xff]  }
  0xc3   :  { %1539 = vmatprep.subr.bf16.mxu1 %v2987_v52  ;;  %v3069_v52 = vld [vmem:[#allocation5 + $0x4e8] ss:$16 sps:$4 sm:$0xff]  }
  0xc5   :  { %1378 = vmatpush1.bf16.msra.mxu0 %v2982_v53  ;;  %v3074_v53 = vld [vmem:[#allocation5 + $0x524] ss:$16 sps:$4 sm:$0xff]  }
  0xc6   :  { %1540 = vmatpush1.bf16.msra.mxu1 %v2985_v54  ;;  %1379 = vmatprep.subr.bf16.mxu0 %v2990_v55  ;;  %v3077_v54 = vld [vmem:[#allocation5 + $0x50c] ss:$16 sps:$4 sm:$0xff]   ;;  %v3072_v55 = vld [vmem:[#allocation5 + $0x520] ss:$16 sps:$4 sm:$0xff]  }
  0xc7   :  { %1541 = vmatprep.subr.bf16.mxu1 %v2993_v56  ;;  %v3075_v56 = vld [vmem:[#allocation5 + $0x508] ss:$16 sps:$4 sm:$0xff]  }
  0xc9   :  { %1380 = vmatpush1.bf16.msra.mxu0 %v2988_v57  ;;  %v3080_v57 = vld [vmem:[#allocation5 + $0x544] ss:$16 sps:$4 sm:$0xff]  }
  0xca   :  { %1542 = vmatpush1.bf16.msra.mxu1 %v2991_v58  ;;  %1381 = vmatprep.subr.bf16.mxu0 %v2996_v59  ;;  %v3083_v58 = vld [vmem:[#allocation5 + $0x52c] ss:$16 sps:$4 sm:$0xff]   ;;  %v3078_v59 = vld [vmem:[#allocation5 + $0x540] ss:$16 sps:$4 sm:$0xff]  }
  0xcb   :  { %1543 = vmatprep.subr.bf16.mxu1 %v2999_v60  ;;  %v3081_v60 = vld [vmem:[#allocation5 + $0x528] ss:$16 sps:$4 sm:$0xff]  }
  0xcd   :  { %1382 = vmatpush1.bf16.msra.mxu0 %v2994_v61  ;;  %v3086_v61 = vld [vmem:[#allocation5 + $0x564] ss:$16 sps:$4 sm:$0xff]  }
  0xce   :  { %1544 = vmatpush1.bf16.msra.mxu1 %v2997_v62  ;;  %1383 = vmatprep.subr.bf16.mxu0 %v3002_v63  ;;  %v3089_v62 = vld [vmem:[#allocation5 + $0x54c] ss:$16 sps:$4 sm:$0xff]   ;;  %v3084_v63 = vld [vmem:[#allocation5 + $0x560] ss:$16 sps:$4 sm:$0xff]  }
  0xcf   :  { %1545 = vmatprep.subr.bf16.mxu1 %v3005_v1  ;;  %v3087_v1 = vld [vmem:[#allocation5 + $0x548] ss:$16 sps:$4 sm:$0xff]  }
  0xd1   :  { %1384 = vmatpush1.bf16.msra.mxu0 %v3000_v2  ;;  %v3092_v2 = vld [vmem:[#allocation5 + $0x584] ss:$16 sps:$4 sm:$0xff]  }
  0xd2   :  { %1546 = vmatpush1.bf16.msra.mxu1 %v3003_v3  ;;  %1385 = vmatprep.subr.bf16.mxu0 %v3008_v4  ;;  %v3095_v3 = vld [vmem:[#allocation5 + $0x56c] ss:$16 sps:$4 sm:$0xff]   ;;  %v3090_v4 = vld [vmem:[#allocation5 + $0x580] ss:$16 sps:$4 sm:$0xff]  }
  0xd3   :  { %1547 = vmatprep.subr.bf16.mxu1 %v3011_v5  ;;  %v3093_v5 = vld [vmem:[#allocation5 + $0x568] ss:$16 sps:$4 sm:$0xff]  }
  0xd5   :  { %1386 = vmatpush1.bf16.msra.mxu0 %v3006_v6  ;;  %v3098_v6 = vld [vmem:[#allocation5 + $0x5a4] ss:$16 sps:$4 sm:$0xff]  }
  0xd6   :  { %1548 = vmatpush1.bf16.msra.mxu1 %v3009_v7  ;;  %1387 = vmatprep.subr.bf16.mxu0 %v3014_v8  ;;  %v3101_v7 = vld [vmem:[#allocation5 + $0x58c] ss:$16 sps:$4 sm:$0xff]   ;;  %v3096_v8 = vld [vmem:[#allocation5 + $0x5a0] ss:$16 sps:$4 sm:$0xff]  }
  0xd7   :  { %1549 = vmatprep.subr.bf16.mxu1 %v3017_v9  ;;  %v3099_v9 = vld [vmem:[#allocation5 + $0x588] ss:$16 sps:$4 sm:$0xff]  }
  0xd9   :  { %1388 = vmatpush1.bf16.msra.mxu0 %v3012_v11  ;;  %v3104_v11 = vld [vmem:[#allocation5 + $0x5c4] ss:$16 sps:$4 sm:$0xff]  }
  0xda   :  { %1550 = vmatpush1.bf16.msra.mxu1 %v3015_v13  ;;  %1398 = vmatprep.subr.bf16.mxu0 %v3020_v14  ;;  %v3102_v13 = vld [vmem:[#allocation5 + $0x5c0] ss:$16 sps:$4 sm:$0xff]   ;;  %v3105_v14 = vld [vmem:[#allocation5 + $0x5a8] ss:$16 sps:$4 sm:$0xff]  }
  0xdb   :  { %1551 = vmatprep.subr.bf16.mxu1 %v3023_v15  ;;  %v3110_v15 = vld [vmem:[#allocation5 + $0x5e4] ss:$16 sps:$4 sm:$0xff]  }
  0xdc   :  { %1390 = vmatmul.mubr.bf16.vlgmr.msra.gmra.mrb[0].mxu0 %v109_v16 }
  0xdd   :  { %1399 = vmatpush1.bf16.msra.mxu0 %v3018_v17  ;;  %1430 = vmatprep.mubr.bf16.mxu0 %v112_v22  ;;  %v3108_v17 = vld [vmem:[#allocation5 + $0x5e0] ss:$16 sps:$4 sm:$0xff]  }
  0xde   :  { %1552 = vmatpush1.bf16.msra.mxu1 %v3021_v18  ;;  %1400 = vmatprep.subr.bf16.mxu0 %v3026_v19  ;;  %v104_v18 = vld [vmem:[#allocation2 + $0x20] sm:$0xff] }
  0xdf   :  { %1562 = vmatprep.subr.bf16.mxu1 %v3029_v21  ;;  %v3111_v19 = vld [vmem:[#allocation5 + $0x5c8] ss:$16 sps:$4 sm:$0xff]   ;;  %v3116_v21 = vld [vmem:[#allocation5 + $0x5ec] ss:$16 sps:$4 sm:$0xff]  }
  0xe1   :  { %1401 = vmatpush1.bf16.msra.mxu0 %v3024_v23  ;;  %1554 = vmatmul.mubr.bf16.vlgmr.msra.gmra.mrb[4].mxu1 %v109_v16  ;;  %v3113_v16 = vld [vmem:[#allocation5 + $0x5cc] ss:$16 sps:$4 sm:$0xff]   ;;  %v3120_v23 = vld [vmem:[#allocation7] ss:$8 sps:$4 sm:$0xff]  }
  0xe2   :  { %1563 = vmatpush1.bf16.msra.mxu1 %v3027_v24  ;;  %1402 = vmatprep.subr.bf16.mxu0 %v3032_v25  ;;  %v3114_v24 = vld [vmem:[#allocation5 + $0x5e8] ss:$16 sps:$4 sm:$0xff]   ;;  %v3125_v25 = vld [vmem:[#allocation7 + $0x14] ss:$8 sps:$4 sm:$0xff]  }
  0xe3   :  { %1564 = vmatprep.subr.bf16.mxu1 %v3035_v26  ;;  %1594 = vmatprep.mubr.bf16.mxu1 %v112_v22  ;;  %v111_v22 = vpack.c.bf16 %v104_v18, %v104_v18  ;;  %v3119_v26 = vld [vmem:[#allocation5 + $0x60c] ss:$16 sps:$4 sm:$0xff]  }
  0xe5   :  { %1403 = vmatpush1.bf16.msra.mxu0 %v3030_v27  ;;  %v3123_v27 = vld [vmem:[#allocation7 + $0x10] ss:$8 sps:$4 sm:$0xff]  }
  0xe6   :  { %1565 = vmatpush1.bf16.msra.mxu1 %v3033_v28  ;;  %1404 = vmatprep.subr.bf16.mxu0 %v3038_v29  ;;  %v3117_v28 = vld [vmem:[#allocation5 + $0x608] ss:$16 sps:$4 sm:$0xff]   ;;  %v3128_v29 = vld [vmem:[#allocation7 + $0x24] ss:$8 sps:$4 sm:$0xff]  }
  0xe7   :  { %1566 = vmatprep.subr.bf16.mxu1 %v3041_v30  ;;  %v3126_v30 = vld [vmem:[#allocation7 + $0x20] ss:$8 sps:$4 sm:$0xff]  }
  0xe9   :  { %1405 = vmatpush1.bf16.msra.mxu0 %v3036_v31  ;;  %v3131_v31 = vld [vmem:[#allocation7 + $0x34] ss:$8 sps:$4 sm:$0xff]  }
  0xea   :  { %1567 = vmatpush1.bf16.msra.mxu1 %v3039_v32  ;;  %1406 = vmatprep.subr.bf16.mxu0 %v3044_v33  ;;  %v3129_v32 = vld [vmem:[#allocation7 + $0x30] ss:$8 sps:$4 sm:$0xff]   ;;  %v3134_v33 = vld [vmem:[#allocation7 + $0x44] ss:$8 sps:$4 sm:$0xff]  }
  0xeb   :  { %1568 = vmatprep.subr.bf16.mxu1 %v3047_v34  ;;  %v3132_v34 = vld [vmem:[#allocation7 + $0x40] ss:$8 sps:$4 sm:$0xff]  }
  0xed   :  { %1407 = vmatpush1.bf16.msra.mxu0 %v3042_v35  ;;  %v3137_v35 = vld [vmem:[#allocation7 + $0x54] ss:$8 sps:$4 sm:$0xff]  }
  0xee   :  { %1569 = vmatpush1.bf16.msra.mxu1 %v3045_v36  ;;  %1408 = vmatprep.subr.bf16.mxu0 %v3050_v37  ;;  %v3135_v36 = vld [vmem:[#allocation7 + $0x50] ss:$8 sps:$4 sm:$0xff]   ;;  %v3140_v37 = vld [vmem:[#allocation7 + $0x64] ss:$8 sps:$4 sm:$0xff]  }
  0xef   :  { %1570 = vmatprep.subr.bf16.mxu1 %v3053_v38  ;;  %v3138_v38 = vld [vmem:[#allocation7 + $0x60] ss:$8 sps:$4 sm:$0xff]  }
  0xf1   :  { %1409 = vmatpush1.bf16.msra.mxu0 %v3048_v39 }
  0xf2   :  { %1571 = vmatpush1.bf16.msra.mxu1 %v3051_v40  ;;  %1410 = vmatprep.subr.bf16.mxu0 %v3056_v41  ;;  %v3141_v41 = vld [vmem:[#allocation7 + $0x70] ss:$8 sps:$4 sm:$0xff]  }
  0xf3   :  { %1572 = vmatprep.subr.bf16.mxu1 %v3059_v42 }
  0xf5   :  { %1411 = vmatpush1.bf16.msra.mxu0 %v3054_v43  ;;  %v3146_v43 = vld [vmem:[#allocation7 + $0x84] ss:$8 sps:$4 sm:$0xff]  }
  0xf6   :  { %1573 = vmatpush1.bf16.msra.mxu1 %v3057_v44  ;;  %1412 = vmatprep.subr.bf16.mxu0 %v3062_v45  ;;  %v3149_v45 = vld [vmem:[#allocation7 + $0x94] ss:$8 sps:$4 sm:$0xff]  }
  0xf7   :  { %1574 = vmatprep.subr.bf16.mxu1 %v3065_v46  ;;  %v3147_v46 = vld [vmem:[#allocation7 + $0x90] ss:$8 sps:$4 sm:$0xff]  }
  0xf9   :  { %1413 = vmatpush1.bf16.msra.mxu0 %v3060_v47  ;;  %v3152_v47 = vld [vmem:[#allocation7 + $0xa4] ss:$8 sps:$4 sm:$0xff]  }
  0xfa   :  { %1575 = vmatpush1.bf16.msra.mxu1 %v3063_v48  ;;  %1414 = vmatprep.subr.bf16.mxu0 %v3068_v49  ;;  %v3150_v48 = vld [vmem:[#allocation7 + $0xa0] ss:$8 sps:$4 sm:$0xff]   ;;  %v3155_v49 = vld [vmem:[#allocation7 + $0xb4] ss:$8 sps:$4 sm:$0xff]  }
  0xfb   :  { %1576 = vmatprep.subr.bf16.mxu1 %v3071_v50  ;;  %v3153_v50 = vld [vmem:[#allocation7 + $0xb0] ss:$8 sps:$4 sm:$0xff]  }
  0xfd   :  { %1415 = vmatpush1.bf16.msra.mxu0 %v3066_v51  ;;  %v3158_v51 = vld [vmem:[#allocation7 + $0xc4] ss:$8 sps:$4 sm:$0xff]  }
  0xfe   :  { %1577 = vmatpush1.bf16.msra.mxu1 %v3069_v52  ;;  %1416 = vmatprep.subr.bf16.mxu0 %v3074_v53  ;;  %v3156_v52 = vld [vmem:[#allocation7 + $0xc0] ss:$8 sps:$4 sm:$0xff]   ;;  %v3161_v53 = vld [vmem:[#allocation7 + $0xd4] ss:$8 sps:$4 sm:$0xff]  }
  0xff   :  { %1578 = vmatprep.subr.bf16.mxu1 %v3077_v54  ;;  %v3159_v54 = vld [vmem:[#allocation7 + $0xd0] ss:$8 sps:$4 sm:$0xff]  }
 0x101   :  { %1417 = vmatpush1.bf16.msra.mxu0 %v3072_v55  ;;  %v3164_v55 = vld [vmem:[#allocation7 + $0xe4] ss:$8 sps:$4 sm:$0xff]  }
 0x102   :  { %1579 = vmatpush1.bf16.msra.mxu1 %v3075_v56  ;;  %1418 = vmatprep.subr.bf16.mxu0 %v3080_v57  ;;  %v3162_v56 = vld [vmem:[#allocation7 + $0xe0] ss:$8 sps:$4 sm:$0xff]   ;;  %v3167_v57 = vld [vmem:[#allocation7 + $0xf4] ss:$8 sps:$4 sm:$0xff]  }
 0x103   :  { %1580 = vmatprep.subr.bf16.mxu1 %v3083_v58  ;;  %v3165_v58 = vld [vmem:[#allocation7 + $0xf0] ss:$8 sps:$4 sm:$0xff]  }
 0x105   :  { %1419 = vmatpush1.bf16.msra.mxu0 %v3078_v59  ;;  %v3170_v59 = vld [vmem:[#allocation7 + $0x104] ss:$8 sps:$4 sm:$0xff]  }
 0x106   :  { %1581 = vmatpush1.bf16.msra.mxu1 %v3081_v60  ;;  %1420 = vmatprep.subr.bf16.mxu0 %v3086_v61  ;;  %v3216_v60 = vld [vmem:[#allocation8 + $0x40] sm:$0xff]  }
 0x107   :  { %1582 = vmatprep.subr.bf16.mxu1 %v3089_v62  ;;  %v3217_v61 = vld [vmem:[#allocation8] sm:$0xff]   ;;  %v3218_v62 = vld [vmem:[#allocation8 + $0x48] sm:$0xff]  }
 0x109   :  { %1421 = vmatpush1.bf16.msra.mxu0 %v3084_v63  ;;  %v3219_v63 = vld [vmem:[#allocation8 + $0x8] sm:$0xff]  }
 0x10a   :  { %1583 = vmatpush1.bf16.msra.mxu1 %v3087_v1  ;;  %1422 = vmatprep.subr.bf16.mxu0 %v3092_v2  ;;  %v3220_v1 = vld [vmem:[#allocation8 + $0x50] sm:$0xff]  }
 0x10b   :  { %1584 = vmatprep.subr.bf16.mxu1 %v3095_v3  ;;  %v3221_v2 = vld [vmem:[#allocation8 + $0x10] sm:$0xff]   ;;  %v3222_v3 = vld [vmem:[#allocation8 + $0x58] sm:$0xff]  }
 0x10d   :  { %1423 = vmatpush1.bf16.msra.mxu0 %v3090_v4  ;;  %v3223_v4 = vld [vmem:[#allocation8 + $0x18] sm:$0xff]  }
 0x10e   :  { %1585 = vmatpush1.bf16.msra.mxu1 %v3093_v5  ;;  %1424 = vmatprep.subr.bf16.mxu0 %v3098_v6  ;;  %v3224_v5 = vld [vmem:[#allocation8 + $0x60] sm:$0xff]  }
 0x10f   :  { %1586 = vmatprep.subr.bf16.mxu1 %v3101_v7  ;;  %v3225_v6 = vld [vmem:[#allocation8 + $0x20] sm:$0xff]   ;;  %v3226_v7 = vld [vmem:[#allocation8 + $0x68] sm:$0xff]  }
 0x111   :  { %1425 = vmatpush1.bf16.msra.mxu0 %v3096_v8  ;;  %v3227_v8 = vld [vmem:[#allocation8 + $0x28] sm:$0xff]  }
 0x112   :  { %1587 = vmatpush1.bf16.msra.mxu1 %v3099_v9  ;;  %1426 = vmatprep.subr.bf16.mxu0 %v3104_v11  ;;  %v312_v9 = vlaneseq }
 0x113   :  { %1588 = vmatprep.subr.bf16.mxu1 %v3107_v12 }
 0x114   :  { %v3530_v11 = vshrl.u32 %v312_v9, 7  ;;  %v3228_v9 = vld [vmem:[#allocation8 + $0x70] sm:$0xff]  }
 0x115   :  { %1427 = vmatpush1.bf16.msra.mxu0 %v3102_v13  ;;  %v3536_v13 = vld [vmem:[%s3578_s2] sm:$0xf] }
 0x116   :  { %1589 = vmatpush1.bf16.msra.mxu1 %v3105_v14  ;;  %1428 = vmatprep.subr.bf16.mxu0 %v3110_v15  ;;  %v314_v12 = vsub.s32 0, %v3530_v11  ;;  %v318_v14 = vsub.s32 1, %v3530_v11 }
 0x117   :  { %1590 = vmatprep.subr.bf16.mxu1 %v3113_v16 }
 0x118   :  { %v315_v15 = vrot.slane %v3536_v13, %v314_v12  ;;  %v319_v16 = vrot.slane %v3536_v13, %v318_v14 }
 0x119   :  { %1429 = vmatpush1.bf16.msra.mxu0 %v3108_v17 }
 0x11a   :  { %1591 = vmatpush1.bf16.msra.mxu1 %v3111_v19  ;;  %2048 = vmatprep.subr.bf16.mxu0 %v3122_v20 }
 0x11b   :  { %1592 = vmatprep.subr.bf16.mxu1 %v3116_v21 }
 0x11c   :  { %1431 = vmatmul.mubr.bf16.vlgmr.msra.gmra.mrb[0].mxu0 %v111_v22 }
 0x11d   :  { %2049 = vmatpush1.bf16.msra.mxu0 %v3120_v23 }
 0x11e   :  { %1593 = vmatpush1.bf16.msra.mxu1 %v3114_v24  ;;  %2050 = vmatprep.subr.bf16.mxu0 %v3125_v25 }
 0x11f   :  { %1603 = vmatprep.subr.bf16.mxu1 %v3119_v26 }
 0x121   :  { %1595 = vmatmul.mubr.bf16.vlgmr.msra.gmra.mrb[4].mxu1 %v111_v22  ;;  %2051 = vmatpush1.bf16.msra.mxu0 %v3123_v27 }
 0x122   :  { %1604 = vmatpush1.bf16.msra.mxu1 %v3117_v28  ;;  %1635 = vmatprep.mubr.bf16.mxu1 %v3391_v0  ;;  %v3143_v0 = vld [vmem:[#allocation7 + $0x74] ss:$8 sps:$4 sm:$0xff]   ;;  %v3168_v28 = vld [vmem:[#allocation7 + $0x100] ss:$8 sps:$4 sm:$0xff]  }
 0x123   :  { %2052 = vmatprep.subr.bf16.mxu0 %v3128_v29  ;;  %2728 = vmatprep.subr.bf16.mxu1 %v3216_v60  ;;  %v3204_v60 = vld [vmem:[#allocation7 + $0x1c0] ss:$8 sps:$4 sm:$0xff]  }
 0x125   :  { %2053 = vmatpush1.bf16.msra.mxu0 %v3126_v30  ;;  %v3173_v30 = vld [vmem:[#allocation7 + $0x114] ss:$8 sps:$4 sm:$0xff]  }
 0x126   :  { %2054 = vmatprep.subr.bf16.mxu0 %v3131_v31  ;;  %v326_v31 = vsub.s32 3, %v3530_v11 }
 0x129   :  { %2055 = vmatpush1.bf16.msra.mxu0 %v3129_v32  ;;  %v3171_v32 = vld [vmem:[#allocation7 + $0x110] ss:$8 sps:$4 sm:$0xff]  }
 0x12a   :  { %2056 = vmatprep.subr.bf16.mxu0 %v3134_v33  ;;  %v3176_v33 = vld [vmem:[#allocation7 + $0x124] ss:$8 sps:$4 sm:$0xff]  }
 0x12d   :  { %2637 = vmatmul.mubr.msk.bf16.vlgmr.msra.gmra.mrb[4].mxu1 %vm1312_vm0, %v3519_v10  ;;  %2057 = vmatpush1.bf16.msra.mxu0 %v3132_v34  ;;  %v3144_v10 = vld [vmem:[#allocation7 + $0x80] ss:$8 sps:$4 sm:$0xff]   ;;  %v327_v34 = vrot.slane %v3536_v13, %v326_v31 }
 0x12e   :  { %2058 = vmatprep.subr.bf16.mxu0 %v3137_v35  ;;  %2729 = vmatpush3.bf16.msra.mxu1 %v3217_v61  ;;  %v3174_v35 = vld [vmem:[#allocation7 + $0x120] ss:$8 sps:$4 sm:$0xff]   ;;  %v322_v61 = vsub.s32 2, %v3530_v11  ;;  %v3235_v11 = vld [vmem:[#allocation10 + $0x18] sm:$0xff]  }
 0x12f   :  { %2730 = vmatprep.subr.bf16.mxu1 %v3218_v62  ;;  %v3209_v62 = vld [vmem:[#allocation7 + $0x1d4] ss:$8 sps:$4 sm:$0xff]  }
 0x131   :  { %2059 = vmatpush1.bf16.msra.mxu0 %v3135_v36 }
 0x132   :  { %2060 = vmatprep.subr.bf16.mxu0 %v3140_v37  ;;  %2731 = vmatpush3.bf16.msra.mxu1 %v3219_v63  ;;  %v3179_v37 = vld [vmem:[#allocation7 + $0x134] ss:$8 sps:$4 sm:$0xff]   ;;  %v3207_v63 = vld [vmem:[#allocation7 + $0x1d0] ss:$8 sps:$4 sm:$0xff]  }
 0x133   :  { %2732 = vmatprep.subr.bf16.mxu1 %v3220_v1  ;;  %v323_v1 = vrot.slane %v3536_v13, %v322_v61  ;;  %v3231_v13 = vld [vmem:[#allocation8 + $0x38] sm:$0xff]  }
 0x134   :  { %v3526_v39 = vpop.f32.mrb[0].mxu1 }
 0x135   :  { %v3528_v40 = vpop.f32.mrb[1].mxu1  ;;  %2061 = vmatpush1.bf16.msra.mxu0 %v3138_v38 }
 0x136   :  { %v1477_v42 = vpop.f32.mrb[2].mxu1  ;;  %2062 = vmatprep.subr.bf16.mxu0 %v3143_v0  ;;  %2733 = vmatpush3.bf16.msra.mxu1 %v3221_v2  ;;  %v3212_v2 = vld [vmem:[#allocation7 + $0x1e4] ss:$8 sps:$4 sm:$0xff]  }
 0x137   :  { %v1478_v44 = vpop.f32.mrb[3].mxu1  ;;  %2734 = vmatprep.subr.bf16.mxu1 %v3222_v3  ;;  %v3210_v3 = vld [vmem:[#allocation7 + $0x1e0] ss:$8 sps:$4 sm:$0xff]  }
 0x139   :  { %2063 = vmatpush1.bf16.msra.mxu0 %v3141_v41  ;;  %v3177_v41 = vld [vmem:[#allocation7 + $0x130] ss:$8 sps:$4 sm:$0xff]  }
 0x13a   :  { %2064 = vmatprep.subr.bf16.mxu0 %v3146_v43  ;;  %2735 = vmatpush3.bf16.msra.mxu1 %v3223_v4  ;;  %v3182_v43 = vld [vmem:[#allocation7 + $0x144] ss:$8 sps:$4 sm:$0xff]  }
 0x13b   :  { %2736 = vmatprep.subr.bf16.mxu1 %v3224_v5  ;;  %v3215_v5 = vld [vmem:[#allocation7 + $0x1f4] ss:$8 sps:$4 sm:$0xff]  }
 0x13d   :  { %2065 = vmatpush1.bf16.msra.mxu0 %v3144_v10  ;;  %v3180_v10 = vld [vmem:[#allocation7 + $0x140] ss:$8 sps:$4 sm:$0xff]  }
 0x13e   :  { %2066 = vmatprep.subr.bf16.mxu0 %v3149_v45  ;;  %2737 = vmatpush3.bf16.msra.mxu1 %v3225_v6  ;;  %v3185_v45 = vld [vmem:[#allocation7 + $0x154] ss:$8 sps:$4 sm:$0xff]   ;;  %v3213_v6 = vld [vmem:[#allocation7 + $0x1f0] ss:$8 sps:$4 sm:$0xff]  }
 0x13f   :  { %2738 = vmatprep.subr.bf16.mxu1 %v3226_v7 }
 0x141   :  { %2067 = vmatpush1.bf16.msra.mxu0 %v3147_v46  ;;  %v3183_v46 = vld [vmem:[#allocation7 + $0x150] ss:$8 sps:$4 sm:$0xff]  }
 0x142   :  { %2068 = vmatprep.subr.bf16.mxu0 %v3152_v47  ;;  %2739 = vmatpush3.bf16.msra.mxu1 %v3227_v8  ;;  %v3188_v47 = vld [vmem:[#allocation7 + $0x164] ss:$8 sps:$4 sm:$0xff]  }
 0x143   :  { %2740 = vmatprep.subr.bf16.mxu1 %v3228_v9 }
 0x145   :  { %2069 = vmatpush1.bf16.msra.mxu0 %v3150_v48  ;;  %v3186_v48 = vld [vmem:[#allocation7 + $0x160] ss:$8 sps:$4 sm:$0xff]  }
 0x146   :  { %2070 = vmatprep.subr.bf16.mxu0 %v3155_v49  ;;  %v3191_v49 = vld [vmem:[#allocation7 + $0x174] ss:$8 sps:$4 sm:$0xff]  }
 0x149   :  { %2071 = vmatpush1.bf16.msra.mxu0 %v3153_v50  ;;  %v3189_v50 = vld [vmem:[#allocation7 + $0x170] ss:$8 sps:$4 sm:$0xff]  }
 0x14a   :  { %2072 = vmatprep.subr.bf16.mxu0 %v3158_v51  ;;  %v3194_v51 = vld [vmem:[#allocation7 + $0x184] ss:$8 sps:$4 sm:$0xff]  }
 0x14d   :  { %2073 = vmatpush1.bf16.msra.mxu0 %v3156_v52  ;;  %v3192_v52 = vld [vmem:[#allocation7 + $0x180] ss:$8 sps:$4 sm:$0xff]  }
 0x14e   :  { %2074 = vmatprep.subr.bf16.mxu0 %v3161_v53  ;;  %v3197_v53 = vld [vmem:[#allocation7 + $0x194] ss:$8 sps:$4 sm:$0xff]  }
 0x151   :  { %2075 = vmatpush1.bf16.msra.mxu0 %v3159_v54  ;;  %v3195_v54 = vld [vmem:[#allocation7 + $0x190] ss:$8 sps:$4 sm:$0xff]  }
 0x152   :  { %2076 = vmatprep.subr.bf16.mxu0 %v3164_v55  ;;  %v3200_v55 = vld [vmem:[#allocation7 + $0x1a4] ss:$8 sps:$4 sm:$0xff]  }
 0x155   :  { %2077 = vmatpush1.bf16.msra.mxu0 %v3162_v56  ;;  %v3198_v56 = vld [vmem:[#allocation7 + $0x1a0] ss:$8 sps:$4 sm:$0xff]  }
 0x156   :  { %2078 = vmatprep.subr.bf16.mxu0 %v3167_v57  ;;  %v3203_v57 = vld [vmem:[#allocation7 + $0x1b4] ss:$8 sps:$4 sm:$0xff]  }
 0x159   :  { %2079 = vmatpush1.bf16.msra.mxu0 %v3165_v58  ;;  %v3201_v58 = vld [vmem:[#allocation7 + $0x1b0] ss:$8 sps:$4 sm:$0xff]  }
 0x15a   :  { %2089 = vmatprep.subr.bf16.mxu0 %v3170_v59  ;;  %v3206_v59 = vld [vmem:[#allocation7 + $0x1c4] ss:$8 sps:$4 sm:$0xff]  }
 0x1ef   :  { %v1432_v17 = vpop.f32.mrb[0].mxu0 }
 0x1f0   :  { %v2779_v18 = vadd.f32 %v1432_v17, %v315_v15  ;;  %v1434_v19 = vpop.f32.mrb[1].mxu0  ;;  %v3229_v15 = vld [vmem:[#allocation8 + $0x30] sm:$0xff]   ;;  %v3392_v17 = vmov 0.0  }
 0x1f1   :  { %v2781_v20 = vadd.f32 %v1434_v19, %v319_v16  ;;  %v1436_v21 = vpop.f32.mrb[2].mxu0  ;;  %2741 = vmatpush3.bf16.msra.mxu1 %v3229_v15  ;;  %v3230_v16 = vld [vmem:[#allocation8 + $0x78] sm:$0xff]  }
 0x1f2   :  { %v2780_v22 = vadd.f32 %v2779_v18, %v3526_v39  ;;  %v1437_v23 = vpop.f32.mrb[3].mxu0  ;;  %2742 = vmatprep.subr.bf16.mxu1 %v3230_v16  ;;  %v1716_v18 = vld [vmem:[%s3580_s4] sm:$0x3] }
 0x1f3   :  { %v2782_v24 = vadd.f32 %v2781_v20, %v3528_v40  ;;  %v1721_v19 = vrot.slane %v1716_v18, %v314_v12  ;;  %v1725_v20 = vrot.slane %v1716_v18, %v318_v14  ;;  %v3234_v12 = vld [vmem:[#allocation10 + $0x10] sm:$0xff]   ;;  %v3236_v14 = vld [vmem:[#allocation10 + $0x20] sm:$0xff]  }
 0x1f4   :  { %v1644_v25 = vmax.f32 %v2780_v22, 0.0 }
 0x1f5   :  { %v1645_v26 = vmax.f32 %v2782_v24, 0.0  ;;  %2743 = vmatpush3.bf16.msra.mxu1 %v3231_v13 }
 0x1f6   :  { %v1648_v29 = vpack.c.bf16 %v1644_v25, %v1644_v25  ;;  %2759 = vmatprep.subr.bf16.mxu1 %v3392_v17 }
 0x1f7   :  { %v1649_v27 = vpack.c.bf16 %v1645_v26, %v1645_v26 }
 0x1f9   :  { %2080 = vmatprep.mubr.bf16.mxu0 %v1649_v27 }
 0x1fa   :  { %2081 = vmatmul.mubr.bf16.vlgmr.msra.gmra.mrb[4].mxu0 %v1648_v29 }
 0x1fb   :  { %2090 = vmatpush1.bf16.msra.mxu0 %v3168_v28 }
 0x1fc   :  { %2091 = vmatprep.subr.bf16.mxu0 %v3173_v30  ;;  %v3232_v30 = vld [vmem:[#allocation10] sm:$0xff]  }
 0x1ff   :  { %2092 = vmatpush1.bf16.msra.mxu0 %v3171_v32  ;;  %v3233_v32 = vld [vmem:[#allocation10 + $0x8] sm:$0xff]  }
 0x200   :  { %v1637_v36 = vpop.f32.mrb[4].mxu1  ;;  %2093 = vmatprep.subr.bf16.mxu0 %v3176_v33  ;;  %v3237_v33 = vld [vmem:[#allocation10 + $0x28] sm:$0xff]  }
 0x201   :  { %v1639_v38 = vpop.f32.mrb[5].mxu1  ;;  %v2783_v4 = vadd.f32 %v1637_v36, %v323_v1 }
 0x202   :  { %v2784_v0 = vadd.f32 %v1639_v38, %v327_v34  ;;  %v1641_v39 = vpop.f32.mrb[6].mxu1  ;;  %v3238_v34 = vld [vmem:[#allocation10 + $0x30] sm:$0xff]  }
 0x203   :  { %v1642_v40 = vpop.f32.mrb[7].mxu1  ;;  %2094 = vmatpush1.bf16.msra.mxu0 %v3174_v35  ;;  %v1646_v7 = vmax.f32 %v2783_v4, 0.0  ;;  %v3239_v35 = vld [vmem:[#allocation10 + $0x38] sm:$0xff]  }
 0x204   :  { %v1647_v42 = vmax.f32 %v2784_v0, 0.0  ;;  %2095 = vmatprep.subr.bf16.mxu0 %v3179_v37  ;;  %v2702_v37 = vld [vmem:[%s3582_s6] ss:$0 sm:$0xff]  ;;  %s3350_s6 = scalar_lea.vmem %s2430_s13, 128 }
 0x205   :  { %v1650_v8 = vpack.c.bf16 %v1646_v7, %v1646_v7  ;;  %p3351_p12 = scmp.ne.s32.totalorder %s2430_s13, %s3350_s6  ;;  %p3356_p0 = scmp.lt.s32.totalorder %s3350_s6, %s3350_s6 }
 0x206   :  { %v1651_v44 = vpack.c.bf16 %v1647_v42, %v1647_v42 }
 0x207   :  { %2096 = vmatpush1.bf16.msra.mxu0 %v3177_v41  ;;  %p3357_p1 = por %p3356_p0, %p3355_p13 }
 0x208   :  { %2121 = vmatprep.mubr.bf16.mxu0 %v1651_v44  ;;  %2097 = vmatprep.subr.bf16.mxu0 %v3182_v43  ;;  %v2719_v44 = vld [vmem:[%s3584_s8] ss:$0 sm:$0xff] }
 0x209   :  { %p3358_p2 = pnand %p3357_p1, %p3351_p12 }
 0x20b   :  { %2098 = vmatpush1.bf16.msra.mxu0 %v3180_v10 }
 0x20c   :  { %2099 = vmatprep.subr.bf16.mxu0 %v3185_v45 }
 0x20f   :  { %2100 = vmatpush1.bf16.msra.mxu0 %v3183_v46 }
 0x210   :  { %2101 = vmatprep.subr.bf16.mxu0 %v3188_v47 }
 0x213   :  { %2102 = vmatpush1.bf16.msra.mxu0 %v3186_v48 }
 0x214   :  { %2103 = vmatprep.subr.bf16.mxu0 %v3191_v49 }
 0x217   :  { %2104 = vmatpush1.bf16.msra.mxu0 %v3189_v50 }
 0x218   :  { %2105 = vmatprep.subr.bf16.mxu0 %v3194_v51 }
 0x21b   :  { %2106 = vmatpush1.bf16.msra.mxu0 %v3192_v52 }
 0x21c   :  { %2107 = vmatprep.subr.bf16.mxu0 %v3197_v53 }
 0x21f   :  { %2108 = vmatpush1.bf16.msra.mxu0 %v3195_v54 }
 0x220   :  { %2109 = vmatprep.subr.bf16.mxu0 %v3200_v55 }
 0x223   :  { %2110 = vmatpush1.bf16.msra.mxu0 %v3198_v56 }
 0x224   :  { %2111 = vmatprep.subr.bf16.mxu0 %v3203_v57 }
 0x227   :  { %2112 = vmatpush1.bf16.msra.mxu0 %v3201_v58 }
 0x228   :  { %2113 = vmatprep.subr.bf16.mxu0 %v3206_v59 }
 0x22b   :  { %2114 = vmatpush1.bf16.msra.mxu0 %v3204_v60 }
 0x22c   :  { %2115 = vmatprep.subr.bf16.mxu0 %v3209_v62 }
 0x22f   :  { %2116 = vmatpush1.bf16.msra.mxu0 %v3207_v63 }
 0x230   :  { %2117 = vmatprep.subr.bf16.mxu0 %v3212_v2 }
 0x233   :  { %2118 = vmatpush1.bf16.msra.mxu0 %v3210_v3 }
 0x234   :  { %2119 = vmatprep.subr.bf16.mxu0 %v3215_v5 }
 0x237   :  { %2120 = vmatpush1.bf16.msra.mxu0 %v3213_v6 }
 0x23a   :  { %2122 = vmatmul.mubr.bf16.vlgmr.msra.gmra.mrb[4].mxu0 %v1650_v8 }
 0x30d   :  { %v2123_v21 = vpop.f32.mrb[4].mxu0 }
 0x30e   :  { %v2785_v22 = vadd.f32 %v2123_v21, %v1721_v19  ;;  %v2125_v23 = vpop.f32.mrb[5].mxu0 }
 0x30f   :  { %v2786_v24 = vadd.f32 %v2125_v23, %v1725_v20  ;;  %v2127_v25 = vpop.f32.mrb[6].mxu0 }
 0x310   :  { %v2130_v26 = vmax.f32 %v2785_v22, 0.0  ;;  %v2128_v27 = vpop.f32.mrb[7].mxu0 }
 0x311   :  { %v2131_v28 = vmax.f32 %v2786_v24, 0.0 }
 0x312   :  { %v2132_v31 = vpack.c.bf16 %v2130_v26, %v2130_v26 }
 0x313   :  { %v2133_v29 = vpack.c.bf16 %v2131_v28, %v2131_v28 }
 0x315   :  { %2301 = vmatprep.mubr.bf16.mxu1 %v2133_v29 }
 0x316   :  { %2302 = vmatmul.mubr.bf16.vlgmr.msra.gmra.mrb[8].mxu1 %v2132_v31 }
 0x317   :  { %2760 = vmatpush3.bf16.msra.mxu1 %v3232_v30  ;;  %2775 = vmatprep.mubr.msk.bf16.mxu1 %vm3393_vm1, %v3392_v17 }
 0x318   :  { %2761 = vmatprep.subr.bf16.mxu1 %v3392_v17 }
 0x31b   :  { %2762 = vmatpush3.bf16.msra.mxu1 %v3233_v32 }
 0x31c   :  { %2763 = vmatprep.subr.bf16.mxu1 %v3392_v17 }
 0x31f   :  { %2764 = vmatpush3.bf16.msra.mxu1 %v3234_v12 }
 0x320   :  { %2765 = vmatprep.subr.bf16.mxu1 %v3392_v17 }
 0x323   :  { %2766 = vmatpush3.bf16.msra.mxu1 %v3235_v11 }
 0x324   :  { %2767 = vmatprep.subr.bf16.mxu1 %v3392_v17 }
 0x327   :  { %2768 = vmatpush3.bf16.msra.mxu1 %v3236_v14 }
 0x328   :  { %2769 = vmatprep.subr.bf16.mxu1 %v3392_v17 }
 0x32b   :  { %2770 = vmatpush3.bf16.msra.mxu1 %v3237_v33 }
 0x32c   :  { %2771 = vmatprep.subr.bf16.mxu1 %v3392_v17 }
 0x32f   :  { %2772 = vmatpush3.bf16.msra.mxu1 %v3238_v34 }
 0x330   :  { %2773 = vmatprep.subr.bf16.mxu1 %v3392_v17 }
 0x333   :  { %2774 = vmatpush3.bf16.msra.mxu1 %v3239_v35 }
 0x3e9   :  { %v2744_v36 = vpop.f32.mrb[8].mxu1 }
 0x3ea   :  { %v2745_v38 = vpop.f32.mrb[9].mxu1 }
 0x3eb   :  { %v2746_v0 = vadd.f32 %v2745_v38, %v2744_v36  ;;  %v2747_v39 = vpop.f32.mrb[10].mxu1 }
 0x3ec   :  { %v2748_v40 = vpop.f32.mrb[11].mxu1 }
 0x3ed   :  { %v2304_v41 = vadd.f32 %v2746_v0, %v2702_v37 }
 0x3ef   :  { %v2309_v42 = vmax.f32 %v2304_v41, 0.0 }
 0x3f1   :  { %v2310_v43 = vpack.c.bf16 %v2309_v42, %v2309_v42 }
 0x3f3   :  { %2776 = vmatmul.mubr.bf16.vlgmr.msra.gmra.mrb[12].mxu1 %v2310_v43 }
 0x4c6   :  { %v2416_v10 = vpop.f32.mrb[12].mxu1 }
 0x4c7   :  { %v2417_v45 = vadd.f32 %v2719_v44, %v2416_v10  ;;  %v2777_v46 = vpop.f32.mrb[13].mxu1 }
 0x4c8   :  { %v2419_v47 = vpop.f32.mrb[14].mxu1 }
 0x4c9   :  { %2422 = vst [vmem:[#allocation11] sm:$0xff] %v2417_v45  ;;  %v2778_v48 = vpop.f32.mrb[15].mxu1 }
 0x4ca   :  { %3361 = shalt.err (!%p3358_p2)
}
 0x4cb   :  { %s3362_s8 = scalar_lea.hbm %s3585_s9, 128 }
 0x4cc   :  { %p3363_p3 = scmp.ne.s32.totalorder %s3585_s9, %s3362_s8  ;;  %p3366_p4 = scmp.lt.u32.totalorder %s3362_s8, %s3585_s9 }
 0x4ce   :  { %p3368_p5 = pnand %p3366_p4, %p3363_p3 }
 0x4d0   :  { %3371 = shalt.err (!%p3368_p5)
}
 0x4d1   :  { %2432 = dma.vmem_to_hbm [thread:$0]  %s2430_s13, 128, %s3585_s9, [#allocation4]  }
 0x4d2   :  { %3378 = dma.done.wait [#allocation4], 128  }
 0x4d3   :  { %3379 = vsyncadd [#allocation4], 4294967168 }
 0x4d4   :  { %2436 = vsyncpa [#allocation3], 1 }
 0x4d5   :  { %2437 = vsyncpa [#allocation6], 1 }
 0x4d6   :  { %2438 = vsyncpa [#allocation9], 1 }
 0x4d7   :  { %2439 = vsyncpa [#allocation4], 1 }

// kernel: tpu_custom_call.1
= control target key start
LH: loop header
LB: loop body
LE: loop exit
PB: predicated region body
PF: predicated region fallthrough
CT: control target
= control target key end

     0   :  { %14 = vsyncpa [#allocation3], 0  ;;  %s3576_s0 = inlined_call_operand.hbm [shape: f32[8,784], index: 0, kind: input, shape index: {}]   ;;  %s3577_s1 = inlined_call_operand.hbm [shape: bf16[784,512], index: 1, kind: input, shape index: {}]   ;;  %s3578_s2 = inlined_call_operand.vmem [shape: f32[1,512], index: 2, kind: input, shape index: {}]   ;;  %s3579_s3 = inlined_call_operand.hbm [shape: bf16[512,256], index: 3, kind: input, shape index: {}]   ;;  %s3580_s4 = inlined_call_operand.vmem [shape: f32[1,256], index: 4, kind: input, shape index: {}]   ;;  %s3581_s5 = inlined_call_operand.hbm [shape: bf16[256,128], index: 5, kind: input, shape index: {}]   ;;  %s3582_s6 = inlined_call_operand.vmem [shape: f32[1,128], index: 6, kind: input, shape index: {}]   ;;  %s3583_s7 = inlined_call_operand.hbm [shape: bf16[128,128], index: 7, kind: input, shape index: {}]   ;;  %s3584_s8 = inlined_call_operand.vmem [shape: f32[1,128], index: 8, kind: input, shape index: {}]   ;;  %s3585_s9 = inlined_call_operand.hbm [shape: f32[8,128], index: 9, kind: output, shape index: {}]  }
   0x1   :  { %15 = vsyncpa [#allocation6], 0 }
   0x2   :  { %16 = vsyncpa [#allocation9], 0 }
   0x3   :  { %17 = vsyncpa [#allocation4], 0  ;;  %s3380_s30 = smov [#allocation5]   ;;  %s3240_s13 = scalar_lea.hbm %s3577_s1, 25088 }
   0x4   :  { %s33_s10 = sshll.u32 %s3380_s30, 4  ;;  %p3241_p0 = scmp.ne.s32.totalorder %s3577_s1, %s3240_s13  ;;  %s34_s10 = int_to_ptr.vmem [resolvable:$true] %s33_s10 }
   0x5   :  { %p3244_p1 = scmp.lt.u32.totalorder %s3240_s13, %s3577_s1 }
   0x7   :  { %p3246_p2 = pnand %p3244_p1, %p3241_p0 }
   0x9   :  { %3249 = shalt.err (!%p3246_p2)
}
   0xa   :  { %s3250_s18 = scalar_lea.vmem %s34_s10, 25088  ;;  %p3255_p4 = scmp.lt.s32.totalorder %s34_s10, %s34_s10 }
   0xb   :  { %p3251_p3 = scmp.ne.s32.totalorder %s34_s10, %s3250_s18  ;;  %p3256_p5 = scmp.lt.s32.totalorder %s3250_s18, %s3250_s18 }
   0xd   :  { %p3257_p6 = por %p3256_p5, %p3255_p4 }
   0xf   :  { %p3258_p7 = pnand %p3257_p6, %p3251_p3 }
  0x11   :  { %3261 = shalt.err (!%p3258_p7)
}
  0x12   :  { %s3381_s19 = smov 256   ;;  %s3382_s20 = smov 16  }
  0x13   :  { %39 = dma.hbm_to_vmem [thread:$0]  %s3577_s1, 25088, %s34_s10, [#allocation6], %s3381_s19, %s3381_s19, %s3382_s20  }
  0x14   :  { %s3383_s23 = smov [#allocation8]   ;;  %s3262_s27 = scalar_lea.hbm %s3581_s5, 2048 }
  0x15   :  { %s61_s24 = sshll.u32 %s3383_s23, 4  ;;  %p3263_p8 = scmp.ne.s32.totalorder %s3581_s5, %s3262_s27  ;;  %s62_s24 = int_to_ptr.vmem [resolvable:$true] %s61_s24 }
  0x16   :  { %p3266_p9 = scmp.lt.u32.totalorder %s3262_s27, %s3581_s5 }
  0x18   :  { %p3268_p10 = pnand %p3266_p9, %p3263_p8 }
  0x1a   :  { %3271 = shalt.err (!%p3268_p10)
}
  0x1b   :  { %s3272_s12 = scalar_lea.vmem %s62_s24, 2048  ;;  %p3277_p12 = scmp.lt.s32.totalorder %s62_s24, %s62_s24 }
  0x1c   :  { %p3273_p11 = scmp.ne.s32.totalorder %s62_s24, %s3272_s12  ;;  %p3278_p13 = scmp.lt.s32.totalorder %s3272_s12, %s3272_s12 }
  0x1e   :  { %p3279_p0 = por %p3278_p13, %p3277_p12 }
  0x20   :  { %p3280_p1 = pnand %p3279_p0, %p3273_p11 }
  0x22   :  { %3283 = shalt.err (!%p3280_p1)
}
  0x23   :  { %s3384_s1 = smov 64   ;;  %s3385_s10 = smov 4  }
  0x24   :  { %67 = dma.hbm_to_vmem [thread:$0]  %s3581_s5, 2048, %s62_s24, [#allocation9], %s3384_s1, %s3384_s1, %s3385_s10  }
  0x25   :  { %s3386_s15 = smov [#allocation2]   ;;  %s3387_s17 = smov [#allocation7]  }
  0x26   :  { %s24_s16 = sshll.u32 %s3386_s15, 4  ;;  %s47_s18 = sshll.u32 %s3387_s17, 4  ;;  %s25_s16 = int_to_ptr.vmem [resolvable:$true] %s24_s16  ;;  %s3472_s18 = int_to_ptr.vmem [resolvable:$true] %s47_s18 }
  0x27   :  { %s3284_s21 = scalar_lea.hbm %s3576_s0, 896 }
  0x28   :  { %p3285_p2 = scmp.ne.s32.totalorder %s3576_s0, %s3284_s21  ;;  %p3288_p3 = scmp.lt.u32.totalorder %s3284_s21, %s3576_s0 }
  0x2a   :  { %p3290_p4 = pnand %p3288_p3, %p3285_p2 }
  0x2c   :  { %3293 = shalt.err (!%p3290_p4)
}
  0x2d   :  { %s3294_s5 = scalar_lea.vmem %s25_s16, 896  ;;  %p3299_p6 = scmp.lt.s32.totalorder %s25_s16, %s25_s16 }
  0x2e   :  { %p3295_p5 = scmp.ne.s32.totalorder %s25_s16, %s3294_s5  ;;  %p3300_p7 = scmp.lt.s32.totalorder %s3294_s5, %s3294_s5 }
  0x30   :  { %p3301_p8 = por %p3300_p7, %p3299_p6 }
  0x32   :  { %p3302_p9 = pnand %p3301_p8, %p3295_p5 }
  0x34   :  { %3305 = shalt.err (!%p3302_p9)
}
  0x35   :  { %27 = dma.hbm_to_vmem [thread:$0]  %s3576_s0, 896, %s25_s16, [#allocation3]  }
  0x36   :  { %s3306_s30 = scalar_lea.hbm %s3579_s3, 8192 }
  0x37   :  { %p3307_p10 = scmp.ne.s32.totalorder %s3579_s3, %s3306_s30  ;;  %p3310_p11 = scmp.lt.u32.totalorder %s3306_s30, %s3579_s3 }
  0x39   :  { %p3312_p12 = pnand %p3310_p11, %p3307_p10 }
  0x3b   :  { %3315 = shalt.err (!%p3312_p12)
}
  0x3c   :  { %s3316_s15 = scalar_lea.vmem %s3472_s18, 8192  ;;  %p3321_p0 = scmp.lt.s32.totalorder %s3472_s18, %s3472_s18 }
  0x3d   :  { %p3317_p13 = scmp.ne.s32.totalorder %s3472_s18, %s3316_s15  ;;  %p3322_p1 = scmp.lt.s32.totalorder %s3316_s15, %s3316_s15 }
  0x3f   :  { %p3323_p2 = por %p3322_p1, %p3321_p0 }
  0x41   :  { %p3324_p3 = pnand %p3323_p2, %p3317_p13 }
  0x43   :  { %3327 = shalt.err (!%p3324_p3)
}
  0x44   :  { %s3388_s0 = smov 128   ;;  %s3389_s16 = smov 8  }
  0x45   :  { %53 = dma.hbm_to_vmem [thread:$0]  %s3579_s3, 8192, %s3472_s18, [#allocation6], %s3388_s0, %s3388_s0, %s3389_s16  }
  0x46   :  { %s3390_s20 = smov [#allocation10]   ;;  %s3328_s25 = scalar_lea.hbm %s3583_s7, 1024 }
  0x47   :  { %s75_s21 = sshll.u32 %s3390_s20, 4  ;;  %p3329_p4 = scmp.ne.s32.totalorder %s3583_s7, %s3328_s25  ;;  %s76_s21 = int_to_ptr.vmem [resolvable:$true] %s75_s21 }
  0x48   :  { %p3332_p5 = scmp.lt.u32.totalorder %s3328_s25, %s3583_s7 }
  0x4a   :  { %p3334_p6 = pnand %p3332_p5, %p3329_p4 }
  0x4c   :  { %3337 = shalt.err (!%p3334_p6)
}
  0x4d   :  { %s3338_s28 = scalar_lea.vmem %s76_s21, 1024  ;;  %p3343_p8 = scmp.lt.s32.totalorder %s76_s21, %s76_s21 }
  0x4e   :  { %p3339_p7 = scmp.ne.s32.totalorder %s76_s21, %s3338_s28  ;;  %p3344_p9 = scmp.lt.s32.totalorder %s3338_s28, %s3338_s28 }
  0x50   :  { %p3345_p10 = por %p3344_p9, %p3343_p8 }
  0x52   :  { %p3346_p11 = pnand %p3345_p10, %p3339_p7 }
  0x54   :  { %3349 = shalt.err (!%p3346_p11)
}
  0x55   :  { %81 = dma.hbm_to_vmem [thread:$0]  %s3583_s7, 1024, %s76_s21, [#allocation9], %s3384_s1, %s3384_s1, %s3385_s10  }
  0x56   :  { %3372 = dma.done.wait [#allocation3], 896  }
  0x57   :  { %3373 = vsyncadd [#allocation3], 4294966400 }
  0x58   :  { %3374 = dma.done.wait [#allocation6], 33280  }
  0x59   :  { %3375 = vsyncadd [#allocation6], 4294934016 }
  0x5a   :  { %3376 = dma.done.wait [#allocation9], 3072  }
  0x5b   :  { %3377 = vsyncadd [#allocation9], 4294964224  ;;  %v3391_v0 = vmov 0   ;;  %v2826_v1 = vld [vmem:[#allocation5 + $0x4] ss:$16 sps:$4 sm:$0xff]   ;;  %v106_v9 = vld [vmem:[#allocation2 + $0x30] sm:$0xff] }
  0x5c   :  { %1471 = vmatprep.mubr.bf16.mxu1 %v3391_v0  ;;  %v2828_v2 = vld [vmem:[#allocation5 + $0x604] ss:$16 sps:$4 sm:$0xff]   ;;  %1316 = vmatprep.subr.bf16.mxu0 %v2826_v1  ;;  %v2830_v3 = vld [vmem:[#allocation5] ss:$16 sps:$4 sm:$0xff]   ;;  %v2834_v6 = vld [vmem:[#allocation5 + $0x8] ss:$16 sps:$4 sm:$0xff]   ;;  %v3519_v10 = vpack.c.bf16 %v106_v9, %v106_v9 }
  0x5d   :  { %v2831_v4 = vld [vmem:[#allocation5 + $0x600] ss:$16 sps:$4 sm:$0xff]   ;;  %1439 = vmatprep.subr.bf16.mxu1 %v2828_v2  ;;  %v2832_v5 = vld [vmem:[#allocation5 + $0x24] ss:$16 sps:$4 sm:$0xff]   ;;  %1317 = vmatpush1.bf16.msra.mxu0 %v2830_v3  ;;  %v2836_v7 = vld [vmem:[#allocation5 + $0xc] ss:$16 sps:$4 sm:$0xff]  }
  0x5e   :  { %1440 = vmatpush1.bf16.msra.mxu1 %v2831_v4  ;;  %1318 = vmatprep.subr.bf16.mxu0 %v2832_v5  ;;  %v2837_v8 = vld [vmem:[#allocation5 + $0x20] ss:$16 sps:$4 sm:$0xff]   ;;  %vm1312_vm0 = vcmask 130048   ;;  %v2838_v11 = vld [vmem:[#allocation5 + $0x44] ss:$16 sps:$4 sm:$0xff]   ;;  %vm3393_vm1 = vmmov 0  }
  0x5f   :  { %1480 = vmatprep.subr.bf16.mxu1 %v2836_v7  ;;  %v2840_v12 = vld [vmem:[#allocation5 + $0x28] ss:$16 sps:$4 sm:$0xff]   ;;  %v2842_v13 = vld [vmem:[#allocation5 + $0x2c] ss:$16 sps:$4 sm:$0xff]   ;;  %v2843_v14 = vld [vmem:[#allocation5 + $0x40] ss:$16 sps:$4 sm:$0xff]  }
  0x60   :  { %v2844_v15 = vld [vmem:[#allocation5 + $0x64] ss:$16 sps:$4 sm:$0xff]   ;;  %v2848_v16 = vld [vmem:[#allocation5 + $0x4c] ss:$16 sps:$4 sm:$0xff]   ;;  %v2849_v17 = vld [vmem:[#allocation5 + $0x60] ss:$16 sps:$4 sm:$0xff]  }
  0x61   :  { %1319 = vmatpush1.bf16.msra.mxu0 %v2837_v8  ;;  %2636 = vmatmul.mubr.msk.bf16.vlgmr.msra.gmra.mrb[0].mxu1 %vm1312_vm0, %v3519_v10  ;;  %v2846_v18 = vld [vmem:[#allocation5 + $0x48] ss:$16 sps:$4 sm:$0xff]   ;;  %v2850_v19 = vld [vmem:[#allocation5 + $0x84] ss:$16 sps:$4 sm:$0xff]   ;;  %v2854_v20 = vld [vmem:[#allocation5 + $0x6c] ss:$16 sps:$4 sm:$0xff]  }
  0x62   :  { %1481 = vmatpush1.bf16.msra.mxu1 %v2834_v6  ;;  %1320 = vmatprep.subr.bf16.mxu0 %v2838_v11  ;;  %v2852_v21 = vld [vmem:[#allocation5 + $0x68] ss:$16 sps:$4 sm:$0xff]   ;;  %v2855_v22 = vld [vmem:[#allocation5 + $0x80] ss:$16 sps:$4 sm:$0xff]   ;;  %v2856_v23 = vld [vmem:[#allocation5 + $0xa4] ss:$16 sps:$4 sm:$0xff]  }
  0x63   :  { %1482 = vmatprep.subr.bf16.mxu1 %v2842_v13  ;;  %v2860_v24 = vld [vmem:[#allocation5 + $0x8c] ss:$16 sps:$4 sm:$0xff]   ;;  %v2861_v25 = vld [vmem:[#allocation5 + $0xa0] ss:$16 sps:$4 sm:$0xff]   ;;  %v2858_v26 = vld [vmem:[#allocation5 + $0x88] ss:$16 sps:$4 sm:$0xff]  }
  0x64   :  { %v2862_v27 = vld [vmem:[#allocation5 + $0xc4] ss:$16 sps:$4 sm:$0xff]   ;;  %v2866_v28 = vld [vmem:[#allocation5 + $0xac] ss:$16 sps:$4 sm:$0xff]   ;;  %v2864_v29 = vld [vmem:[#allocation5 + $0xa8] ss:$16 sps:$4 sm:$0xff]  }
  0x65   :  { %1321 = vmatpush1.bf16.msra.mxu0 %v2843_v14  ;;  %v2867_v30 = vld [vmem:[#allocation5 + $0xc0] ss:$16 sps:$4 sm:$0xff]   ;;  %v2868_v31 = vld [vmem:[#allocation5 + $0xe4] ss:$16 sps:$4 sm:$0xff]   ;;  %v2872_v32 = vld [vmem:[#allocation5 + $0xcc] ss:$16 sps:$4 sm:$0xff]  }
  0x66   :  { %1483 = vmatpush1.bf16.msra.mxu1 %v2840_v12  ;;  %1322 = vmatprep.subr.bf16.mxu0 %v2844_v15  ;;  %v2873_v33 = vld [vmem:[#allocation5 + $0xe0] ss:$16 sps:$4 sm:$0xff]   ;;  %v2870_v34 = vld [vmem:[#allocation5 + $0xc8] ss:$16 sps:$4 sm:$0xff]   ;;  %v2874_v35 = vld [vmem:[#allocation5 + $0x104] ss:$16 sps:$4 sm:$0xff]  }
  0x67   :  { %1484 = vmatprep.subr.bf16.mxu1 %v2848_v16  ;;  %v2878_v36 = vld [vmem:[#allocation5 + $0xec] ss:$16 sps:$4 sm:$0xff]   ;;  %v2876_v37 = vld [vmem:[#allocation5 + $0xe8] ss:$16 sps:$4 sm:$0xff]   ;;  %v2879_v38 = vld [vmem:[#allocation5 + $0x100] ss:$16 sps:$4 sm:$0xff]  }
  0x68   :  { %v2880_v39 = vld [vmem:[#allocation5 + $0x124] ss:$16 sps:$4 sm:$0xff]   ;;  %v2884_v40 = vld [vmem:[#allocation5 + $0x10c] ss:$16 sps:$4 sm:$0xff]   ;;  %v2885_v41 = vld [vmem:[#allocation5 + $0x120] ss:$16 sps:$4 sm:$0xff]  }
  0x69   :  { %1323 = vmatpush1.bf16.msra.mxu0 %v2849_v17  ;;  %v2882_v42 = vld [vmem:[#allocation5 + $0x108] ss:$16 sps:$4 sm:$0xff]   ;;  %v2886_v43 = vld [vmem:[#allocation5 + $0x144] ss:$16 sps:$4 sm:$0xff]   ;;  %v2890_v44 = vld [vmem:[#allocation5 + $0x12c] ss:$16 sps:$4 sm:$0xff]  }
  0x6a   :  { %1485 = vmatpush1.bf16.msra.mxu1 %v2846_v18  ;;  %1324 = vmatprep.subr.bf16.mxu0 %v2850_v19  ;;  %v2888_v45 = vld [vmem:[#allocation5 + $0x128] ss:$16 sps:$4 sm:$0xff]   ;;  %v2891_v46 = vld [vmem:[#allocation5 + $0x140] ss:$16 sps:$4 sm:$0xff]   ;;  %v2892_v47 = vld [vmem:[#allocation5 + $0x164] ss:$16 sps:$4 sm:$0xff]  }
  0x6b   :  { %1486 = vmatprep.subr.bf16.mxu1 %v2854_v20  ;;  %v2896_v48 = vld [vmem:[#allocation5 + $0x14c] ss:$16 sps:$4 sm:$0xff]   ;;  %v101_v49 = vld [vmem:[#allocation2 + $0x8] sm:$0xff]  ;;  %v2894_v52 = vld [vmem:[#allocation5 + $0x148] ss:$16 sps:$4 sm:$0xff]   ;;  %s3394_s12 = smov [#allocation11]  }
  0x6c   :  { %v2897_v50 = vld [vmem:[#allocation5 + $0x160] ss:$16 sps:$4 sm:$0xff]   ;;  %v108_v51 = vpack.c.bf16 %v101_v49, %v101_v49  ;;  %v2898_v53 = vld [vmem:[#allocation5 + $0x184] ss:$16 sps:$4 sm:$0xff]   ;;  %v2902_v54 = vld [vmem:[#allocation5 + $0x16c] ss:$16 sps:$4 sm:$0xff]  }
  0x6d   :  { %1325 = vmatpush1.bf16.msra.mxu0 %v2855_v22  ;;  %v2900_v55 = vld [vmem:[#allocation5 + $0x168] ss:$16 sps:$4 sm:$0xff]   ;;  %v2903_v56 = vld [vmem:[#allocation5 + $0x180] ss:$16 sps:$4 sm:$0xff]   ;;  %v2904_v57 = vld [vmem:[#allocation5 + $0x1a4] ss:$16 sps:$4 sm:$0xff]  }
  0x6e   :  { %1487 = vmatpush1.bf16.msra.mxu1 %v2852_v21  ;;  %1326 = vmatprep.subr.bf16.mxu0 %v2856_v23  ;;  %v2908_v58 = vld [vmem:[#allocation5 + $0x18c] ss:$16 sps:$4 sm:$0xff]   ;;  %v2906_v59 = vld [vmem:[#allocation5 + $0x188] ss:$16 sps:$4 sm:$0xff]   ;;  %v2909_v60 = vld [vmem:[#allocation5 + $0x1a0] ss:$16 sps:$4 sm:$0xff]  }
  0x6f   :  { %1488 = vmatprep.subr.bf16.mxu1 %v2860_v24  ;;  %1348 = vmatprep.mubr.bf16.mxu0 %v108_v51  ;;  %v2910_v61 = vld [vmem:[#allocation5 + $0x1c4] ss:$16 sps:$4 sm:$0xff]   ;;  %v2914_v62 = vld [vmem:[#allocation5 + $0x1ac] ss:$16 sps:$4 sm:$0xff]   ;;  %v2912_v63 = vld [vmem:[#allocation5 + $0x1a8] ss:$16 sps:$4 sm:$0xff]  }
  0x70   :  { %1512 = vmatprep.mubr.bf16.mxu1 %v108_v51  ;;  %v2915_v1 = vld [vmem:[#allocation5 + $0x1c0] ss:$16 sps:$4 sm:$0xff]   ;;  %v2916_v2 = vld [vmem:[#allocation5 + $0x1e4] ss:$16 sps:$4 sm:$0xff]   ;;  %v2920_v3 = vld [vmem:[#allocation5 + $0x1cc] ss:$16 sps:$4 sm:$0xff]  }
  0x71   :  { %1327 = vmatpush1.bf16.msra.mxu0 %v2861_v25  ;;  %v2918_v4 = vld [vmem:[#allocation5 + $0x1c8] ss:$16 sps:$4 sm:$0xff]   ;;  %v2921_v5 = vld [vmem:[#allocation5 + $0x1e0] ss:$16 sps:$4 sm:$0xff]   ;;  %v2924_v7 = vld [vmem:[#allocation5 + $0x204] ss:$16 sps:$4 sm:$0xff]  }
  0x72   :  { %1489 = vmatpush1.bf16.msra.mxu1 %v2858_v26  ;;  %1328 = vmatprep.subr.bf16.mxu0 %v2862_v27  ;;  %v100_v6 = vld [vmem:[#allocation2] sm:$0xff]  ;;  %v2922_v11 = vld [vmem:[#allocation5 + $0x200] ss:$16 sps:$4 sm:$0xff]   ;;  %v2930_v13 = vld [vmem:[#allocation5 + $0x224] ss:$16 sps:$4 sm:$0xff]   ;;  %s2429_s13 = sshll.u32 %s3394_s12, 4  ;;  %s2430_s13 = int_to_ptr.vmem [resolvable:$true] %s2429_s13 }
  0x73   :  { %1490 = vmatprep.subr.bf16.mxu1 %v2866_v28  ;;  %v2927_v8 = vld [vmem:[#allocation5 + $0x1ec] ss:$16 sps:$4 sm:$0xff]   ;;  %v107_v9 = vpack.c.bf16 %v100_v6, %v100_v6  ;;  %v2925_v12 = vld [vmem:[#allocation5 + $0x1e8] ss:$16 sps:$4 sm:$0xff]   ;;  %v2928_v15 = vld [vmem:[#allocation5 + $0x220] ss:$16 sps:$4 sm:$0xff]   ;;  %p3355_p13 = scmp.lt.s32.totalorder %s2430_s13, %s2430_s13 }
  0x74   :  { %v2933_v14 = vld [vmem:[#allocation5 + $0x20c] ss:$16 sps:$4 sm:$0xff]   ;;  %v2931_v16 = vld [vmem:[#allocation5 + $0x208] ss:$16 sps:$4 sm:$0xff]   ;;  %v2936_v17 = vld [vmem:[#allocation5 + $0x244] ss:$16 sps:$4 sm:$0xff]  }
  0x75   :  { %1329 = vmatpush1.bf16.msra.mxu0 %v2867_v30  ;;  %v2939_v18 = vld [vmem:[#allocation5 + $0x22c] ss:$16 sps:$4 sm:$0xff]   ;;  %v2934_v19 = vld [vmem:[#allocation5 + $0x240] ss:$16 sps:$4 sm:$0xff]   ;;  %v2937_v20 = vld [vmem:[#allocation5 + $0x228] ss:$16 sps:$4 sm:$0xff]  }
  0x76   :  { %1491 = vmatpush1.bf16.msra.mxu1 %v2864_v29  ;;  %1330 = vmatprep.subr.bf16.mxu0 %v2868_v31  ;;  %v2942_v21 = vld [vmem:[#allocation5 + $0x264] ss:$16 sps:$4 sm:$0xff]   ;;  %v2945_v22 = vld [vmem:[#allocation5 + $0x24c] ss:$16 sps:$4 sm:$0xff]   ;;  %v2940_v23 = vld [vmem:[#allocation5 + $0x260] ss:$16 sps:$4 sm:$0xff]  }
  0x77   :  { %1492 = vmatprep.subr.bf16.mxu1 %v2872_v32  ;;  %v2943_v24 = vld [vmem:[#allocation5 + $0x248] ss:$16 sps:$4 sm:$0xff]   ;;  %v2948_v25 = vld [vmem:[#allocation5 + $0x284] ss:$16 sps:$4 sm:$0xff]   ;;  %v2951_v26 = vld [vmem:[#allocation5 + $0x26c] ss:$16 sps:$4 sm:$0xff]  }
  0x78   :  { %v2946_v27 = vld [vmem:[#allocation5 + $0x280] ss:$16 sps:$4 sm:$0xff]   ;;  %v2949_v28 = vld [vmem:[#allocation5 + $0x268] ss:$16 sps:$4 sm:$0xff]   ;;  %v2954_v29 = vld [vmem:[#allocation5 + $0x2a4] ss:$16 sps:$4 sm:$0xff]  }
  0x79   :  { %1331 = vmatpush1.bf16.msra.mxu0 %v2873_v33  ;;  %v2957_v30 = vld [vmem:[#allocation5 + $0x28c] ss:$16 sps:$4 sm:$0xff]   ;;  %v2952_v31 = vld [vmem:[#allocation5 + $0x2a0] ss:$16 sps:$4 sm:$0xff]   ;;  %v2955_v32 = vld [vmem:[#allocation5 + $0x288] ss:$16 sps:$4 sm:$0xff]  }
  0x7a   :  { %1493 = vmatpush1.bf16.msra.mxu1 %v2870_v34  ;;  %1332 = vmatprep.subr.bf16.mxu0 %v2874_v35  ;;  %v2960_v33 = vld [vmem:[#allocation5 + $0x2c4] ss:$16 sps:$4 sm:$0xff]   ;;  %v2963_v34 = vld [vmem:[#allocation5 + $0x2ac] ss:$16 sps:$4 sm:$0xff]   ;;  %v2976_v49 = vld [vmem:[#allocation5 + $0x320] ss:$16 sps:$4 sm:$0xff]  }
  0x7b   :  { %1494 = vmatprep.subr.bf16.mxu1 %v2878_v36  ;;  %v103_v35 = vld [vmem:[#allocation2 + $0x18] sm:$0xff] }
  0x7c   :  { %v110_v36 = vpack.c.bf16 %v103_v35, %v103_v35  ;;  %v2984_v51 = vld [vmem:[#allocation5 + $0x344] ss:$16 sps:$4 sm:$0xff]   ;;  %v3006_v6 = vld [vmem:[#allocation5 + $0x3c0] ss:$16 sps:$4 sm:$0xff]  }
  0x7d   :  { %1333 = vmatpush1.bf16.msra.mxu0 %v2879_v38  ;;  %v2961_v38 = vld [vmem:[#allocation5 + $0x2a8] ss:$16 sps:$4 sm:$0xff]   ;;  %v3042_v35 = vld [vmem:[#allocation5 + $0x480] ss:$16 sps:$4 sm:$0xff]  }
  0x7e   :  { %1495 = vmatpush1.bf16.msra.mxu1 %v2876_v37  ;;  %1334 = vmatprep.subr.bf16.mxu0 %v2880_v39  ;;  %v2958_v37 = vld [vmem:[#allocation5 + $0x2c0] ss:$16 sps:$4 sm:$0xff]   ;;  %v2966_v39 = vld [vmem:[#allocation5 + $0x2e4] ss:$16 sps:$4 sm:$0xff]  }
  0x7f   :  { %1496 = vmatprep.subr.bf16.mxu1 %v2884_v40  ;;  %v2969_v40 = vld [vmem:[#allocation5 + $0x2cc] ss:$16 sps:$4 sm:$0xff]  }
  0x81   :  { %1335 = vmatpush1.bf16.msra.mxu0 %v2885_v41  ;;  %v2964_v41 = vld [vmem:[#allocation5 + $0x2e0] ss:$16 sps:$4 sm:$0xff]  }
  0x82   :  { %1497 = vmatpush1.bf16.msra.mxu1 %v2882_v42  ;;  %1336 = vmatprep.subr.bf16.mxu0 %v2886_v43  ;;  %v2967_v42 = vld [vmem:[#allocation5 + $0x2c8] ss:$16 sps:$4 sm:$0xff]   ;;  %v2972_v43 = vld [vmem:[#allocation5 + $0x304] ss:$16 sps:$4 sm:$0xff]  }
  0x83   :  { %1498 = vmatprep.subr.bf16.mxu1 %v2890_v44  ;;  %v2975_v44 = vld [vmem:[#allocation5 + $0x2ec] ss:$16 sps:$4 sm:$0xff]  }
  0x85   :  { %1337 = vmatpush1.bf16.msra.mxu0 %v2891_v46  ;;  %v2973_v46 = vld [vmem:[#allocation5 + $0x2e8] ss:$16 sps:$4 sm:$0xff]  }
  0x86   :  { %1499 = vmatpush1.bf16.msra.mxu1 %v2888_v45  ;;  %1338 = vmatprep.subr.bf16.mxu0 %v2892_v47  ;;  %v2970_v45 = vld [vmem:[#allocation5 + $0x300] ss:$16 sps:$4 sm:$0xff]   ;;  %v2978_v47 = vld [vmem:[#allocation5 + $0x324] ss:$16 sps:$4 sm:$0xff]  }
  0x87   :  { %1500 = vmatprep.subr.bf16.mxu1 %v2896_v48  ;;  %v2981_v48 = vld [vmem:[#allocation5 + $0x30c] ss:$16 sps:$4 sm:$0xff]  }
  0x89   :  { %1339 = vmatpush1.bf16.msra.mxu0 %v2897_v50  ;;  %v2979_v50 = vld [vmem:[#allocation5 + $0x308] ss:$16 sps:$4 sm:$0xff]  }
  0x8a   :  { %1501 = vmatpush1.bf16.msra.mxu1 %v2894_v52  ;;  %1340 = vmatprep.subr.bf16.mxu0 %v2898_v53  ;;  %v2987_v52 = vld [vmem:[#allocation5 + $0x32c] ss:$16 sps:$4 sm:$0xff]   ;;  %v2982_v53 = vld [vmem:[#allocation5 + $0x340] ss:$16 sps:$4 sm:$0xff]  }
  0x8b   :  { %1502 = vmatprep.subr.bf16.mxu1 %v2902_v54  ;;  %v2985_v54 = vld [vmem:[#allocation5 + $0x328] ss:$16 sps:$4 sm:$0xff]  }
  0x8d   :  { %1341 = vmatpush1.bf16.msra.mxu0 %v2903_v56  ;;  %v2993_v56 = vld [vmem:[#allocation5 + $0x34c] ss:$16 sps:$4 sm:$0xff]  }
  0x8e   :  { %1503 = vmatpush1.bf16.msra.mxu1 %v2900_v55  ;;  %1342 = vmatprep.subr.bf16.mxu0 %v2904_v57  ;;  %v2990_v55 = vld [vmem:[#allocation5 + $0x364] ss:$16 sps:$4 sm:$0xff]   ;;  %v2988_v57 = vld [vmem:[#allocation5 + $0x360] ss:$16 sps:$4 sm:$0xff]  }
  0x8f   :  { %1504 = vmatprep.subr.bf16.mxu1 %v2908_v58  ;;  %v2991_v58 = vld [vmem:[#allocation5 + $0x348] ss:$16 sps:$4 sm:$0xff]  }
  0x91   :  { %1343 = vmatpush1.bf16.msra.mxu0 %v2909_v60  ;;  %v2999_v60 = vld [vmem:[#allocation5 + $0x36c] ss:$16 sps:$4 sm:$0xff]  }
  0x92   :  { %1505 = vmatpush1.bf16.msra.mxu1 %v2906_v59  ;;  %1344 = vmatprep.subr.bf16.mxu0 %v2910_v61  ;;  %v2996_v59 = vld [vmem:[#allocation5 + $0x384] ss:$16 sps:$4 sm:$0xff]   ;;  %v2994_v61 = vld [vmem:[#allocation5 + $0x380] ss:$16 sps:$4 sm:$0xff]  }
  0x93   :  { %1506 = vmatprep.subr.bf16.mxu1 %v2914_v62  ;;  %v2997_v62 = vld [vmem:[#allocation5 + $0x368] ss:$16 sps:$4 sm:$0xff]  }
  0x95   :  { %1345 = vmatpush1.bf16.msra.mxu0 %v2915_v1  ;;  %v3005_v1 = vld [vmem:[#allocation5 + $0x38c] ss:$16 sps:$4 sm:$0xff]  }
  0x96   :  { %1507 = vmatpush1.bf16.msra.mxu1 %v2912_v63  ;;  %1346 = vmatprep.subr.bf16.mxu0 %v2916_v2  ;;  %v3002_v63 = vld [vmem:[#allocation5 + $0x3a4] ss:$16 sps:$4 sm:$0xff]   ;;  %v3000_v2 = vld [vmem:[#allocation5 + $0x3a0] ss:$16 sps:$4 sm:$0xff]  }
  0x97   :  { %1508 = vmatprep.subr.bf16.mxu1 %v2920_v3  ;;  %v3003_v3 = vld [vmem:[#allocation5 + $0x388] ss:$16 sps:$4 sm:$0xff]  }
  0x99   :  { %1347 = vmatpush1.bf16.msra.mxu0 %v2921_v5  ;;  %v3011_v5 = vld [vmem:[#allocation5 + $0x3ac] ss:$16 sps:$4 sm:$0xff]  }
  0x9a   :  { %1509 = vmatpush1.bf16.msra.mxu1 %v2918_v4  ;;  %1357 = vmatprep.subr.bf16.mxu0 %v2924_v7  ;;  %v3008_v4 = vld [vmem:[#allocation5 + $0x3c4] ss:$16 sps:$4 sm:$0xff]   ;;  %v3009_v7 = vld [vmem:[#allocation5 + $0x3a8] ss:$16 sps:$4 sm:$0xff]  }
  0x9b   :  { %1510 = vmatprep.subr.bf16.mxu1 %v2927_v8  ;;  %v3014_v8 = vld [vmem:[#allocation5 + $0x3e4] ss:$16 sps:$4 sm:$0xff]  }
  0x9c   :  { %1349 = vmatmul.mubr.bf16.vlgmr.msra.gmra.mrb[0].mxu0 %v107_v9 }
  0x9d   :  { %1358 = vmatpush1.bf16.msra.mxu0 %v2922_v11  ;;  %1389 = vmatprep.mubr.bf16.mxu0 %v110_v36  ;;  %v3012_v11 = vld [vmem:[#allocation5 + $0x3e0] ss:$16 sps:$4 sm:$0xff]  }
  0x9e   :  { %1511 = vmatpush1.bf16.msra.mxu1 %v2925_v12  ;;  %1359 = vmatprep.subr.bf16.mxu0 %v2930_v13  ;;  %v102_v12 = vld [vmem:[#allocation2 + $0x10] sm:$0xff] }
  0x9f   :  { %1521 = vmatprep.subr.bf16.mxu1 %v2933_v14  ;;  %v3015_v13 = vld [vmem:[#allocation5 + $0x3c8] ss:$16 sps:$4 sm:$0xff]   ;;  %v3020_v14 = vld [vmem:[#allocation5 + $0x404] ss:$16 sps:$4 sm:$0xff]  }
  0xa1   :  { %1360 = vmatpush1.bf16.msra.mxu0 %v2928_v15  ;;  %1513 = vmatmul.mubr.bf16.vlgmr.msra.gmra.mrb[4].mxu1 %v107_v9  ;;  %v3017_v9 = vld [vmem:[#allocation5 + $0x3cc] ss:$16 sps:$4 sm:$0xff]  }
  0xa2   :  { %1522 = vmatpush1.bf16.msra.mxu1 %v2931_v16  ;;  %1361 = vmatprep.subr.bf16.mxu0 %v2936_v17  ;;  %v3023_v15 = vld [vmem:[#allocation5 + $0x3ec] ss:$16 sps:$4 sm:$0xff]   ;;  %v109_v16 = vpack.c.bf16 %v102_v12, %v102_v12  ;;  %v3018_v17 = vld [vmem:[#allocation5 + $0x400] ss:$16 sps:$4 sm:$0xff]  }
  0xa3   :  { %1523 = vmatprep.subr.bf16.mxu1 %v2939_v18  ;;  %1553 = vmatprep.mubr.bf16.mxu1 %v110_v36  ;;  %v3021_v18 = vld [vmem:[#allocation5 + $0x3e8] ss:$16 sps:$4 sm:$0xff]   ;;  %v3107_v12 = vld [vmem:[#allocation5 + $0x5ac] ss:$16 sps:$4 sm:$0xff]  }
  0xa4   :  { %v3045_v36 = vld [vmem:[#allocation5 + $0x468] ss:$16 sps:$4 sm:$0xff]  }
  0xa5   :  { %1362 = vmatpush1.bf16.msra.mxu0 %v2934_v19  ;;  %v3026_v19 = vld [vmem:[#allocation5 + $0x424] ss:$16 sps:$4 sm:$0xff]  }
  0xa6   :  { %1524 = vmatpush1.bf16.msra.mxu1 %v2937_v20  ;;  %1363 = vmatprep.subr.bf16.mxu0 %v2942_v21  ;;  %v105_v20 = vld [vmem:[#allocation2 + $0x28] sm:$0xff]  ;;  %v3029_v21 = vld [vmem:[#allocation5 + $0x40c] ss:$16 sps:$4 sm:$0xff]  }
  0xa7   :  { %1525 = vmatprep.subr.bf16.mxu1 %v2945_v22  ;;  %v112_v22 = vpack.c.bf16 %v105_v20, %v105_v20  ;;  %v3122_v20 = vld [vmem:[#allocation7 + $0x4] ss:$8 sps:$4 sm:$0xff]  }
  0xa9   :  { %1364 = vmatpush1.bf16.msra.mxu0 %v2940_v23  ;;  %v3024_v23 = vld [vmem:[#allocation5 + $0x420] ss:$16 sps:$4 sm:$0xff]  }
  0xaa   :  { %1526 = vmatpush1.bf16.msra.mxu1 %v2943_v24  ;;  %1365 = vmatprep.subr.bf16.mxu0 %v2948_v25  ;;  %v3027_v24 = vld [vmem:[#allocation5 + $0x408] ss:$16 sps:$4 sm:$0xff]   ;;  %v3032_v25 = vld [vmem:[#allocation5 + $0x444] ss:$16 sps:$4 sm:$0xff]  }
  0xab   :  { %1527 = vmatprep.subr.bf16.mxu1 %v2951_v26  ;;  %v3035_v26 = vld [vmem:[#allocation5 + $0x42c] ss:$16 sps:$4 sm:$0xff]  }
  0xad   :  { %1366 = vmatpush1.bf16.msra.mxu0 %v2946_v27  ;;  %v3030_v27 = vld [vmem:[#allocation5 + $0x440] ss:$16 sps:$4 sm:$0xff]  }
  0xae   :  { %1528 = vmatpush1.bf16.msra.mxu1 %v2949_v28  ;;  %1367 = vmatprep.subr.bf16.mxu0 %v2954_v29  ;;  %v3033_v28 = vld [vmem:[#allocation5 + $0x428] ss:$16 sps:$4 sm:$0xff]   ;;  %v3038_v29 = vld [vmem:[#allocation5 + $0x464] ss:$16 sps:$4 sm:$0xff]  }
  0xaf   :  { %1529 = vmatprep.subr.bf16.mxu1 %v2957_v30  ;;  %v3041_v30 = vld [vmem:[#allocation5 + $0x44c] ss:$16 sps:$4 sm:$0xff]  }
  0xb1   :  { %1368 = vmatpush1.bf16.msra.mxu0 %v2952_v31  ;;  %v3036_v31 = vld [vmem:[#allocation5 + $0x460] ss:$16 sps:$4 sm:$0xff]  }
  0xb2   :  { %1530 = vmatpush1.bf16.msra.mxu1 %v2955_v32  ;;  %1369 = vmatprep.subr.bf16.mxu0 %v2960_v33  ;;  %v3039_v32 = vld [vmem:[#allocation5 + $0x448] ss:$16 sps:$4 sm:$0xff]   ;;  %v3044_v33 = vld [vmem:[#allocation5 + $0x484] ss:$16 sps:$4 sm:$0xff]  }
  0xb3   :  { %1531 = vmatprep.subr.bf16.mxu1 %v2963_v34  ;;  %v3047_v34 = vld [vmem:[#allocation5 + $0x46c] ss:$16 sps:$4 sm:$0xff]  }
  0xb5   :  { %1370 = vmatpush1.bf16.msra.mxu0 %v2958_v37  ;;  %v3050_v37 = vld [vmem:[#allocation5 + $0x4a4] ss:$16 sps:$4 sm:$0xff]  }
  0xb6   :  { %1532 = vmatpush1.bf16.msra.mxu1 %v2961_v38  ;;  %1371 = vmatprep.subr.bf16.mxu0 %v2966_v39  ;;  %v3053_v38 = vld [vmem:[#allocation5 + $0x48c] ss:$16 sps:$4 sm:$0xff]   ;;  %v3048_v39 = vld [vmem:[#allocation5 + $0x4a0] ss:$16 sps:$4 sm:$0xff]  }
  0xb7   :  { %1533 = vmatprep.subr.bf16.mxu1 %v2969_v40  ;;  %v3051_v40 = vld [vmem:[#allocation5 + $0x488] ss:$16 sps:$4 sm:$0xff]  }
  0xb9   :  { %1372 = vmatpush1.bf16.msra.mxu0 %v2964_v41  ;;  %v3056_v41 = vld [vmem:[#allocation5 + $0x4c4] ss:$16 sps:$4 sm:$0xff]  }
  0xba   :  { %1534 = vmatpush1.bf16.msra.mxu1 %v2967_v42  ;;  %1373 = vmatprep.subr.bf16.mxu0 %v2972_v43  ;;  %v3059_v42 = vld [vmem:[#allocation5 + $0x4ac] ss:$16 sps:$4 sm:$0xff]   ;;  %v3054_v43 = vld [vmem:[#allocation5 + $0x4c0] ss:$16 sps:$4 sm:$0xff]  }
  0xbb   :  { %1535 = vmatprep.subr.bf16.mxu1 %v2975_v44  ;;  %v3057_v44 = vld [vmem:[#allocation5 + $0x4a8] ss:$16 sps:$4 sm:$0xff]  }
  0xbd   :  { %1374 = vmatpush1.bf16.msra.mxu0 %v2970_v45  ;;  %v3062_v45 = vld [vmem:[#allocation5 + $0x4e4] ss:$16 sps:$4 sm:$0xff]  }
  0xbe   :  { %1536 = vmatpush1.bf16.msra.mxu1 %v2973_v46  ;;  %1375 = vmatprep.subr.bf16.mxu0 %v2978_v47  ;;  %v3065_v46 = vld [vmem:[#allocation5 + $0x4cc] ss:$16 sps:$4 sm:$0xff]   ;;  %v3060_v47 = vld [vmem:[#allocation5 + $0x4e0] ss:$16 sps:$4 sm:$0xff]  }
  0xbf   :  { %1537 = vmatprep.subr.bf16.mxu1 %v2981_v48  ;;  %v3063_v48 = vld [vmem:[#allocation5 + $0x4c8] ss:$16 sps:$4 sm:$0xff]  }
  0xc1   :  { %1376 = vmatpush1.bf16.msra.mxu0 %v2976_v49  ;;  %v3068_v49 = vld [vmem:[#allocation5 + $0x504] ss:$16 sps:$4 sm:$0xff]  }
  0xc2   :  { %1538 = vmatpush1.bf16.msra.mxu1 %v2979_v50  ;;  %1377 = vmatprep.subr.bf16.mxu0 %v2984_v51  ;;  %v3071_v50 = vld [vmem:[#allocation5 + $0x4ec] ss:$16 sps:$4 sm:$0xff]   ;;  %v3066_v51 = vld [vmem:[#allocation5 + $0x500] ss:$16 sps:$4 sm:$0xff]  }
  0xc3   :  { %1539 = vmatprep.subr.bf16.mxu1 %v2987_v52  ;;  %v3069_v52 = vld [vmem:[#allocation5 + $0x4e8] ss:$16 sps:$4 sm:$0xff]  }
  0xc5   :  { %1378 = vmatpush1.bf16.msra.mxu0 %v2982_v53  ;;  %v3074_v53 = vld [vmem:[#allocation5 + $0x524] ss:$16 sps:$4 sm:$0xff]  }
  0xc6   :  { %1540 = vmatpush1.bf16.msra.mxu1 %v2985_v54  ;;  %1379 = vmatprep.subr.bf16.mxu0 %v2990_v55  ;;  %v3077_v54 = vld [vmem:[#allocation5 + $0x50c] ss:$16 sps:$4 sm:$0xff]   ;;  %v3072_v55 = vld [vmem:[#allocation5 + $0x520] ss:$16 sps:$4 sm:$0xff]  }
  0xc7   :  { %1541 = vmatprep.subr.bf16.mxu1 %v2993_v56  ;;  %v3075_v56 = vld [vmem:[#allocation5 + $0x508] ss:$16 sps:$4 sm:$0xff]  }
  0xc9   :  { %1380 = vmatpush1.bf16.msra.mxu0 %v2988_v57  ;;  %v3080_v57 = vld [vmem:[#allocation5 + $0x544] ss:$16 sps:$4 sm:$0xff]  }
  0xca   :  { %1542 = vmatpush1.bf16.msra.mxu1 %v2991_v58  ;;  %1381 = vmatprep.subr.bf16.mxu0 %v2996_v59  ;;  %v3083_v58 = vld [vmem:[#allocation5 + $0x52c] ss:$16 sps:$4 sm:$0xff]   ;;  %v3078_v59 = vld [vmem:[#allocation5 + $0x540] ss:$16 sps:$4 sm:$0xff]  }
  0xcb   :  { %1543 = vmatprep.subr.bf16.mxu1 %v2999_v60  ;;  %v3081_v60 = vld [vmem:[#allocation5 + $0x528] ss:$16 sps:$4 sm:$0xff]  }
  0xcd   :  { %1382 = vmatpush1.bf16.msra.mxu0 %v2994_v61  ;;  %v3086_v61 = vld [vmem:[#allocation5 + $0x564] ss:$16 sps:$4 sm:$0xff]  }
  0xce   :  { %1544 = vmatpush1.bf16.msra.mxu1 %v2997_v62  ;;  %1383 = vmatprep.subr.bf16.mxu0 %v3002_v63  ;;  %v3089_v62 = vld [vmem:[#allocation5 + $0x54c] ss:$16 sps:$4 sm:$0xff]   ;;  %v3084_v63 = vld [vmem:[#allocation5 + $0x560] ss:$16 sps:$4 sm:$0xff]  }
  0xcf   :  { %1545 = vmatprep.subr.bf16.mxu1 %v3005_v1  ;;  %v3087_v1 = vld [vmem:[#allocation5 + $0x548] ss:$16 sps:$4 sm:$0xff]  }
  0xd1   :  { %1384 = vmatpush1.bf16.msra.mxu0 %v3000_v2  ;;  %v3092_v2 = vld [vmem:[#allocation5 + $0x584] ss:$16 sps:$4 sm:$0xff]  }
  0xd2   :  { %1546 = vmatpush1.bf16.msra.mxu1 %v3003_v3  ;;  %1385 = vmatprep.subr.bf16.mxu0 %v3008_v4  ;;  %v3095_v3 = vld [vmem:[#allocation5 + $0x56c] ss:$16 sps:$4 sm:$0xff]   ;;  %v3090_v4 = vld [vmem:[#allocation5 + $0x580] ss:$16 sps:$4 sm:$0xff]  }
  0xd3   :  { %1547 = vmatprep.subr.bf16.mxu1 %v3011_v5  ;;  %v3093_v5 = vld [vmem:[#allocation5 + $0x568] ss:$16 sps:$4 sm:$0xff]  }
  0xd5   :  { %1386 = vmatpush1.bf16.msra.mxu0 %v3006_v6  ;;  %v3098_v6 = vld [vmem:[#allocation5 + $0x5a4] ss:$16 sps:$4 sm:$0xff]  }
  0xd6   :  { %1548 = vmatpush1.bf16.msra.mxu1 %v3009_v7  ;;  %1387 = vmatprep.subr.bf16.mxu0 %v3014_v8  ;;  %v3101_v7 = vld [vmem:[#allocation5 + $0x58c] ss:$16 sps:$4 sm:$0xff]   ;;  %v3096_v8 = vld [vmem:[#allocation5 + $0x5a0] ss:$16 sps:$4 sm:$0xff]  }
  0xd7   :  { %1549 = vmatprep.subr.bf16.mxu1 %v3017_v9  ;;  %v3099_v9 = vld [vmem:[#allocation5 + $0x588] ss:$16 sps:$4 sm:$0xff]  }
  0xd9   :  { %1388 = vmatpush1.bf16.msra.mxu0 %v3012_v11  ;;  %v3104_v11 = vld [vmem:[#allocation5 + $0x5c4] ss:$16 sps:$4 sm:$0xff]  }
  0xda   :  { %1550 = vmatpush1.bf16.msra.mxu1 %v3015_v13  ;;  %1398 = vmatprep.subr.bf16.mxu0 %v3020_v14  ;;  %v3102_v13 = vld [vmem:[#allocation5 + $0x5c0] ss:$16 sps:$4 sm:$0xff]   ;;  %v3105_v14 = vld [vmem:[#allocation5 + $0x5a8] ss:$16 sps:$4 sm:$0xff]  }
  0xdb   :  { %1551 = vmatprep.subr.bf16.mxu1 %v3023_v15  ;;  %v3110_v15 = vld [vmem:[#allocation5 + $0x5e4] ss:$16 sps:$4 sm:$0xff]  }
  0xdc   :  { %1390 = vmatmul.mubr.bf16.vlgmr.msra.gmra.mrb[0].mxu0 %v109_v16 }
  0xdd   :  { %1399 = vmatpush1.bf16.msra.mxu0 %v3018_v17  ;;  %1430 = vmatprep.mubr.bf16.mxu0 %v112_v22  ;;  %v3108_v17 = vld [vmem:[#allocation5 + $0x5e0] ss:$16 sps:$4 sm:$0xff]  }
  0xde   :  { %1552 = vmatpush1.bf16.msra.mxu1 %v3021_v18  ;;  %1400 = vmatprep.subr.bf16.mxu0 %v3026_v19  ;;  %v104_v18 = vld [vmem:[#allocation2 + $0x20] sm:$0xff] }
  0xdf   :  { %1562 = vmatprep.subr.bf16.mxu1 %v3029_v21  ;;  %v3111_v19 = vld [vmem:[#allocation5 + $0x5c8] ss:$16 sps:$4 sm:$0xff]   ;;  %v3116_v21 = vld [vmem:[#allocation5 + $0x5ec] ss:$16 sps:$4 sm:$0xff]  }
  0xe1   :  { %1401 = vmatpush1.bf16.msra.mxu0 %v3024_v23  ;;  %1554 = vmatmul.mubr.bf16.vlgmr.msra.gmra.mrb[4].mxu1 %v109_v16  ;;  %v3113_v16 = vld [vmem:[#allocation5 + $0x5cc] ss:$16 sps:$4 sm:$0xff]   ;;  %v3120_v23 = vld [vmem:[#allocation7] ss:$8 sps:$4 sm:$0xff]  }
  0xe2   :  { %1563 = vmatpush1.bf16.msra.mxu1 %v3027_v24  ;;  %1402 = vmatprep.subr.bf16.mxu0 %v3032_v25  ;;  %v3114_v24 = vld [vmem:[#allocation5 + $0x5e8] ss:$16 sps:$4 sm:$0xff]   ;;  %v3125_v25 = vld [vmem:[#allocation7 + $0x14] ss:$8 sps:$4 sm:$0xff]  }
  0xe3   :  { %1564 = vmatprep.subr.bf16.mxu1 %v3035_v26  ;;  %1594 = vmatprep.mubr.bf16.mxu1 %v112_v22  ;;  %v111_v22 = vpack.c.bf16 %v104_v18, %v104_v18  ;;  %v3119_v26 = vld [vmem:[#allocation5 + $0x60c] ss:$16 sps:$4 sm:$0xff]  }
  0xe5   :  { %1403 = vmatpush1.bf16.msra.mxu0 %v3030_v27  ;;  %v3123_v27 = vld [vmem:[#allocation7 + $0x10] ss:$8 sps:$4 sm:$0xff]  }
  0xe6   :  { %1565 = vmatpush1.bf16.msra.mxu1 %v3033_v28  ;;  %1404 = vmatprep.subr.bf16.mxu0 %v3038_v29  ;;  %v3117_v28 = vld [vmem:[#allocation5 + $0x608] ss:$16 sps:$4 sm:$0xff]   ;;  %v3128_v29 = vld [vmem:[#allocation7 + $0x24] ss:$8 sps:$4 sm:$0xff]  }
  0xe7   :  { %1566 = vmatprep.subr.bf16.mxu1 %v3041_v30  ;;  %v3126_v30 = vld [vmem:[#allocation7 + $0x20] ss:$8 sps:$4 sm:$0xff]  }
  0xe9   :  { %1405 = vmatpush1.bf16.msra.mxu0 %v3036_v31  ;;  %v3131_v31 = vld [vmem:[#allocation7 + $0x34] ss:$8 sps:$4 sm:$0xff]  }
  0xea   :  { %1567 = vmatpush1.bf16.msra.mxu1 %v3039_v32  ;;  %1406 = vmatprep.subr.bf16.mxu0 %v3044_v33  ;;  %v3129_v32 = vld [vmem:[#allocation7 + $0x30] ss:$8 sps:$4 sm:$0xff]   ;;  %v3134_v33 = vld [vmem:[#allocation7 + $0x44] ss:$8 sps:$4 sm:$0xff]  }
  0xeb   :  { %1568 = vmatprep.subr.bf16.mxu1 %v3047_v34  ;;  %v3132_v34 = vld [vmem:[#allocation7 + $0x40] ss:$8 sps:$4 sm:$0xff]  }
  0xed   :  { %1407 = vmatpush1.bf16.msra.mxu0 %v3042_v35  ;;  %v3137_v35 = vld [vmem:[#allocation7 + $0x54] ss:$8 sps:$4 sm:$0xff]  }
  0xee   :  { %1569 = vmatpush1.bf16.msra.mxu1 %v3045_v36  ;;  %1408 = vmatprep.subr.bf16.mxu0 %v3050_v37  ;;  %v3135_v36 = vld [vmem:[#allocation7 + $0x50] ss:$8 sps:$4 sm:$0xff]   ;;  %v3140_v37 = vld [vmem:[#allocation7 + $0x64] ss:$8 sps:$4 sm:$0xff]  }
  0xef   :  { %1570 = vmatprep.subr.bf16.mxu1 %v3053_v38  ;;  %v3138_v38 = vld [vmem:[#allocation7 + $0x60] ss:$8 sps:$4 sm:$0xff]  }
  0xf1   :  { %1409 = vmatpush1.bf16.msra.mxu0 %v3048_v39 }
  0xf2   :  { %1571 = vmatpush1.bf16.msra.mxu1 %v3051_v40  ;;  %1410 = vmatprep.subr.bf16.mxu0 %v3056_v41  ;;  %v3141_v41 = vld [vmem:[#allocation7 + $0x70] ss:$8 sps:$4 sm:$0xff]  }
  0xf3   :  { %1572 = vmatprep.subr.bf16.mxu1 %v3059_v42 }
  0xf5   :  { %1411 = vmatpush1.bf16.msra.mxu0 %v3054_v43  ;;  %v3146_v43 = vld [vmem:[#allocation7 + $0x84] ss:$8 sps:$4 sm:$0xff]  }
  0xf6   :  { %1573 = vmatpush1.bf16.msra.mxu1 %v3057_v44  ;;  %1412 = vmatprep.subr.bf16.mxu0 %v3062_v45  ;;  %v3149_v45 = vld [vmem:[#allocation7 + $0x94] ss:$8 sps:$4 sm:$0xff]  }
  0xf7   :  { %1574 = vmatprep.subr.bf16.mxu1 %v3065_v46  ;;  %v3147_v46 = vld [vmem:[#allocation7 + $0x90] ss:$8 sps:$4 sm:$0xff]  }
  0xf9   :  { %1413 = vmatpush1.bf16.msra.mxu0 %v3060_v47  ;;  %v3152_v47 = vld [vmem:[#allocation7 + $0xa4] ss:$8 sps:$4 sm:$0xff]  }
  0xfa   :  { %1575 = vmatpush1.bf16.msra.mxu1 %v3063_v48  ;;  %1414 = vmatprep.subr.bf16.mxu0 %v3068_v49  ;;  %v3150_v48 = vld [vmem:[#allocation7 + $0xa0] ss:$8 sps:$4 sm:$0xff]   ;;  %v3155_v49 = vld [vmem:[#allocation7 + $0xb4] ss:$8 sps:$4 sm:$0xff]  }
  0xfb   :  { %1576 = vmatprep.subr.bf16.mxu1 %v3071_v50  ;;  %v3153_v50 = vld [vmem:[#allocation7 + $0xb0] ss:$8 sps:$4 sm:$0xff]  }
  0xfd   :  { %1415 = vmatpush1.bf16.msra.mxu0 %v3066_v51  ;;  %v3158_v51 = vld [vmem:[#allocation7 + $0xc4] ss:$8 sps:$4 sm:$0xff]  }
  0xfe   :  { %1577 = vmatpush1.bf16.msra.mxu1 %v3069_v52  ;;  %1416 = vmatprep.subr.bf16.mxu0 %v3074_v53  ;;  %v3156_v52 = vld [vmem:[#allocation7 + $0xc0] ss:$8 sps:$4 sm:$0xff]   ;;  %v3161_v53 = vld [vmem:[#allocation7 + $0xd4] ss:$8 sps:$4 sm:$0xff]  }
  0xff   :  { %1578 = vmatprep.subr.bf16.mxu1 %v3077_v54  ;;  %v3159_v54 = vld [vmem:[#allocation7 + $0xd0] ss:$8 sps:$4 sm:$0xff]  }
 0x101   :  { %1417 = vmatpush1.bf16.msra.mxu0 %v3072_v55  ;;  %v3164_v55 = vld [vmem:[#allocation7 + $0xe4] ss:$8 sps:$4 sm:$0xff]  }
 0x102   :  { %1579 = vmatpush1.bf16.msra.mxu1 %v3075_v56  ;;  %1418 = vmatprep.subr.bf16.mxu0 %v3080_v57  ;;  %v3162_v56 = vld [vmem:[#allocation7 + $0xe0] ss:$8 sps:$4 sm:$0xff]   ;;  %v3167_v57 = vld [vmem:[#allocation7 + $0xf4] ss:$8 sps:$4 sm:$0xff]  }
 0x103   :  { %1580 = vmatprep.subr.bf16.mxu1 %v3083_v58  ;;  %v3165_v58 = vld [vmem:[#allocation7 + $0xf0] ss:$8 sps:$4 sm:$0xff]  }
 0x105   :  { %1419 = vmatpush1.bf16.msra.mxu0 %v3078_v59  ;;  %v3170_v59 = vld [vmem:[#allocation7 + $0x104] ss:$8 sps:$4 sm:$0xff]  }
 0x106   :  { %1581 = vmatpush1.bf16.msra.mxu1 %v3081_v60  ;;  %1420 = vmatprep.subr.bf16.mxu0 %v3086_v61  ;;  %v3216_v60 = vld [vmem:[#allocation8 + $0x40] sm:$0xff]  }
 0x107   :  { %1582 = vmatprep.subr.bf16.mxu1 %v3089_v62  ;;  %v3217_v61 = vld [vmem:[#allocation8] sm:$0xff]   ;;  %v3218_v62 = vld [vmem:[#allocation8 + $0x48] sm:$0xff]  }
 0x109   :  { %1421 = vmatpush1.bf16.msra.mxu0 %v3084_v63  ;;  %v3219_v63 = vld [vmem:[#allocation8 + $0x8] sm:$0xff]  }
 0x10a   :  { %1583 = vmatpush1.bf16.msra.mxu1 %v3087_v1  ;;  %1422 = vmatprep.subr.bf16.mxu0 %v3092_v2  ;;  %v3220_v1 = vld [vmem:[#allocation8 + $0x50] sm:$0xff]  }
 0x10b   :  { %1584 = vmatprep.subr.bf16.mxu1 %v3095_v3  ;;  %v3221_v2 = vld [vmem:[#allocation8 + $0x10] sm:$0xff]   ;;  %v3222_v3 = vld [vmem:[#allocation8 + $0x58] sm:$0xff]  }
 0x10d   :  { %1423 = vmatpush1.bf16.msra.mxu0 %v3090_v4  ;;  %v3223_v4 = vld [vmem:[#allocation8 + $0x18] sm:$0xff]  }
 0x10e   :  { %1585 = vmatpush1.bf16.msra.mxu1 %v3093_v5  ;;  %1424 = vmatprep.subr.bf16.mxu0 %v3098_v6  ;;  %v3224_v5 = vld [vmem:[#allocation8 + $0x60] sm:$0xff]  }
 0x10f   :  { %1586 = vmatprep.subr.bf16.mxu1 %v3101_v7  ;;  %v3225_v6 = vld [vmem:[#allocation8 + $0x20] sm:$0xff]   ;;  %v3226_v7 = vld [vmem:[#allocation8 + $0x68] sm:$0xff]  }
 0x111   :  { %1425 = vmatpush1.bf16.msra.mxu0 %v3096_v8  ;;  %v3227_v8 = vld [vmem:[#allocation8 + $0x28] sm:$0xff]  }
 0x112   :  { %1587 = vmatpush1.bf16.msra.mxu1 %v3099_v9  ;;  %1426 = vmatprep.subr.bf16.mxu0 %v3104_v11  ;;  %v312_v9 = vlaneseq }
 0x113   :  { %1588 = vmatprep.subr.bf16.mxu1 %v3107_v12 }
 0x114   :  { %v3530_v11 = vshrl.u32 %v312_v9, 7  ;;  %v3228_v9 = vld [vmem:[#allocation8 + $0x70] sm:$0xff]  }
 0x115   :  { %1427 = vmatpush1.bf16.msra.mxu0 %v3102_v13  ;;  %v3536_v13 = vld [vmem:[%s3578_s2] sm:$0xf] }
 0x116   :  { %1589 = vmatpush1.bf16.msra.mxu1 %v3105_v14  ;;  %1428 = vmatprep.subr.bf16.mxu0 %v3110_v15  ;;  %v314_v12 = vsub.s32 0, %v3530_v11  ;;  %v318_v14 = vsub.s32 1, %v3530_v11 }
 0x117   :  { %1590 = vmatprep.subr.bf16.mxu1 %v3113_v16 }
 0x118   :  { %v315_v15 = vrot.slane %v3536_v13, %v314_v12  ;;  %v319_v16 = vrot.slane %v3536_v13, %v318_v14 }
 0x119   :  { %1429 = vmatpush1.bf16.msra.mxu0 %v3108_v17 }
 0x11a   :  { %1591 = vmatpush1.bf16.msra.mxu1 %v3111_v19  ;;  %2048 = vmatprep.subr.bf16.mxu0 %v3122_v20 }
 0x11b   :  { %1592 = vmatprep.subr.bf16.mxu1 %v3116_v21 }
 0x11c   :  { %1431 = vmatmul.mubr.bf16.vlgmr.msra.gmra.mrb[0].mxu0 %v111_v22 }
 0x11d   :  { %2049 = vmatpush1.bf16.msra.mxu0 %v3120_v23 }
 0x11e   :  { %1593 = vmatpush1.bf16.msra.mxu1 %v3114_v24  ;;  %2050 = vmatprep.subr.bf16.mxu0 %v3125_v25 }
 0x11f   :  { %1603 = vmatprep.subr.bf16.mxu1 %v3119_v26 }
 0x121   :  { %1595 = vmatmul.mubr.bf16.vlgmr.msra.gmra.mrb[4].mxu1 %v111_v22  ;;  %2051 = vmatpush1.bf16.msra.mxu0 %v3123_v27 }
 0x122   :  { %1604 = vmatpush1.bf16.msra.mxu1 %v3117_v28  ;;  %1635 = vmatprep.mubr.bf16.mxu1 %v3391_v0  ;;  %v3143_v0 = vld [vmem:[#allocation7 + $0x74] ss:$8 sps:$4 sm:$0xff]   ;;  %v3168_v28 = vld [vmem:[#allocation7 + $0x100] ss:$8 sps:$4 sm:$0xff]  }
 0x123   :  { %2052 = vmatprep.subr.bf16.mxu0 %v3128_v29  ;;  %2728 = vmatprep.subr.bf16.mxu1 %v3216_v60  ;;  %v3204_v60 = vld [vmem:[#allocation7 + $0x1c0] ss:$8 sps:$4 sm:$0xff]  }
 0x125   :  { %2053 = vmatpush1.bf16.msra.mxu0 %v3126_v30  ;;  %v3173_v30 = vld [vmem:[#allocation7 + $0x114] ss:$8 sps:$4 sm:$0xff]  }
 0x126   :  { %2054 = vmatprep.subr.bf16.mxu0 %v3131_v31  ;;  %v326_v31 = vsub.s32 3, %v3530_v11 }
 0x129   :  { %2055 = vmatpush1.bf16.msra.mxu0 %v3129_v32  ;;  %v3171_v32 = vld [vmem:[#allocation7 + $0x110] ss:$8 sps:$4 sm:$0xff]  }
 0x12a   :  { %2056 = vmatprep.subr.bf16.mxu0 %v3134_v33  ;;  %v3176_v33 = vld [vmem:[#allocation7 + $0x124] ss:$8 sps:$4 sm:$0xff]  }
 0x12d   :  { %2637 = vmatmul.mubr.msk.bf16.vlgmr.msra.gmra.mrb[4].mxu1 %vm1312_vm0, %v3519_v10  ;;  %2057 = vmatpush1.bf16.msra.mxu0 %v3132_v34  ;;  %v3144_v10 = vld [vmem:[#allocation7 + $0x80] ss:$8 sps:$4 sm:$0xff]   ;;  %v327_v34 = vrot.slane %v3536_v13, %v326_v31 }
 0x12e   :  { %2058 = vmatprep.subr.bf16.mxu0 %v3137_v35  ;;  %2729 = vmatpush3.bf16.msra.mxu1 %v3217_v61  ;;  %v3174_v35 = vld [vmem:[#allocation7 + $0x120] ss:$8 sps:$4 sm:$0xff]   ;;  %v322_v61 = vsub.s32 2, %v3530_v11  ;;  %v3235_v11 = vld [vmem:[#allocation10 + $0x18] sm:$0xff]  }
 0x12f   :  { %2730 = vmatprep.subr.bf16.mxu1 %v3218_v62  ;;  %v3209_v62 = vld [vmem:[#allocation7 + $0x1d4] ss:$8 sps:$4 sm:$0xff]  }
 0x131   :  { %2059 = vmatpush1.bf16.msra.mxu0 %v3135_v36 }
 0x132   :  { %2060 = vmatprep.subr.bf16.mxu0 %v3140_v37  ;;  %2731 = vmatpush3.bf16.msra.mxu1 %v3219_v63  ;;  %v3179_v37 = vld [vmem:[#allocation7 + $0x134] ss:$8 sps:$4 sm:$0xff]   ;;  %v3207_v63 = vld [vmem:[#allocation7 + $0x1d0] ss:$8 sps:$4 sm:$0xff]  }
 0x133   :  { %2732 = vmatprep.subr.bf16.mxu1 %v3220_v1  ;;  %v323_v1 = vrot.slane %v3536_v13, %v322_v61  ;;  %v3231_v13 = vld [vmem:[#allocation8 + $0x38] sm:$0xff]  }
 0x134   :  { %v3526_v39 = vpop.f32.mrb[0].mxu1 }
 0x135   :  { %v3528_v40 = vpop.f32.mrb[1].mxu1  ;;  %2061 = vmatpush1.bf16.msra.mxu0 %v3138_v38 }
 0x136   :  { %v1477_v42 = vpop.f32.mrb[2].mxu1  ;;  %2062 = vmatprep.subr.bf16.mxu0 %v3143_v0  ;;  %2733 = vmatpush3.bf16.msra.mxu1 %v3221_v2  ;;  %v3212_v2 = vld [vmem:[#allocation7 + $0x1e4] ss:$8 sps:$4 sm:$0xff]  }
 0x137   :  { %v1478_v44 = vpop.f32.mrb[3].mxu1  ;;  %2734 = vmatprep.subr.bf16.mxu1 %v3222_v3  ;;  %v3210_v3 = vld [vmem:[#allocation7 + $0x1e0] ss:$8 sps:$4 sm:$0xff]  }
 0x139   :  { %2063 = vmatpush1.bf16.msra.mxu0 %v3141_v41  ;;  %v3177_v41 = vld [vmem:[#allocation7 + $0x130] ss:$8 sps:$4 sm:$0xff]  }
 0x13a   :  { %2064 = vmatprep.subr.bf16.mxu0 %v3146_v43  ;;  %2735 = vmatpush3.bf16.msra.mxu1 %v3223_v4  ;;  %v3182_v43 = vld [vmem:[#allocation7 + $0x144] ss:$8 sps:$4 sm:$0xff]  }
 0x13b   :  { %2736 = vmatprep.subr.bf16.mxu1 %v3224_v5  ;;  %v3215_v5 = vld [vmem:[#allocation7 + $0x1f4] ss:$8 sps:$4 sm:$0xff]  }
 0x13d   :  { %2065 = vmatpush1.bf16.msra.mxu0 %v3144_v10  ;;  %v3180_v10 = vld [vmem:[#allocation7 + $0x140] ss:$8 sps:$4 sm:$0xff]  }
 0x13e   :  { %2066 = vmatprep.subr.bf16.mxu0 %v3149_v45  ;;  %2737 = vmatpush3.bf16.msra.mxu1 %v3225_v6  ;;  %v3185_v45 = vld [vmem:[#allocation7 + $0x154] ss:$8 sps:$4 sm:$0xff]   ;;  %v3213_v6 = vld [vmem:[#allocation7 + $0x1f0] ss:$8 sps:$4 sm:$0xff]  }
 0x13f   :  { %2738 = vmatprep.subr.bf16.mxu1 %v3226_v7 }
 0x141   :  { %2067 = vmatpush1.bf16.msra.mxu0 %v3147_v46  ;;  %v3183_v46 = vld [vmem:[#allocation7 + $0x150] ss:$8 sps:$4 sm:$0xff]  }
 0x142   :  { %2068 = vmatprep.subr.bf16.mxu0 %v3152_v47  ;;  %2739 = vmatpush3.bf16.msra.mxu1 %v3227_v8  ;;  %v3188_v47 = vld [vmem:[#allocation7 + $0x164] ss:$8 sps:$4 sm:$0xff]  }
 0x143   :  { %2740 = vmatprep.subr.bf16.mxu1 %v3228_v9 }
 0x145   :  { %2069 = vmatpush1.bf16.msra.mxu0 %v3150_v48  ;;  %v3186_v48 = vld [vmem:[#allocation7 + $0x160] ss:$8 sps:$4 sm:$0xff]  }
 0x146   :  { %2070 = vmatprep.subr.bf16.mxu0 %v3155_v49  ;;  %v3191_v49 = vld [vmem:[#allocation7 + $0x174] ss:$8 sps:$4 sm:$0xff]  }
 0x149   :  { %2071 = vmatpush1.bf16.msra.mxu0 %v3153_v50  ;;  %v3189_v50 = vld [vmem:[#allocation7 + $0x170] ss:$8 sps:$4 sm:$0xff]  }
 0x14a   :  { %2072 = vmatprep.subr.bf16.mxu0 %v3158_v51  ;;  %v3194_v51 = vld [vmem:[#allocation7 + $0x184] ss:$8 sps:$4 sm:$0xff]  }
 0x14d   :  { %2073 = vmatpush1.bf16.msra.mxu0 %v3156_v52  ;;  %v3192_v52 = vld [vmem:[#allocation7 + $0x180] ss:$8 sps:$4 sm:$0xff]  }
 0x14e   :  { %2074 = vmatprep.subr.bf16.mxu0 %v3161_v53  ;;  %v3197_v53 = vld [vmem:[#allocation7 + $0x194] ss:$8 sps:$4 sm:$0xff]  }
 0x151   :  { %2075 = vmatpush1.bf16.msra.mxu0 %v3159_v54  ;;  %v3195_v54 = vld [vmem:[#allocation7 + $0x190] ss:$8 sps:$4 sm:$0xff]  }
 0x152   :  { %2076 = vmatprep.subr.bf16.mxu0 %v3164_v55  ;;  %v3200_v55 = vld [vmem:[#allocation7 + $0x1a4] ss:$8 sps:$4 sm:$0xff]  }
 0x155   :  { %2077 = vmatpush1.bf16.msra.mxu0 %v3162_v56  ;;  %v3198_v56 = vld [vmem:[#allocation7 + $0x1a0] ss:$8 sps:$4 sm:$0xff]  }
 0x156   :  { %2078 = vmatprep.subr.bf16.mxu0 %v3167_v57  ;;  %v3203_v57 = vld [vmem:[#allocation7 + $0x1b4] ss:$8 sps:$4 sm:$0xff]  }
 0x159   :  { %2079 = vmatpush1.bf16.msra.mxu0 %v3165_v58  ;;  %v3201_v58 = vld [vmem:[#allocation7 + $0x1b0] ss:$8 sps:$4 sm:$0xff]  }
 0x15a   :  { %2089 = vmatprep.subr.bf16.mxu0 %v3170_v59  ;;  %v3206_v59 = vld [vmem:[#allocation7 + $0x1c4] ss:$8 sps:$4 sm:$0xff]  }
 0x1ef   :  { %v1432_v17 = vpop.f32.mrb[0].mxu0 }
 0x1f0   :  { %v2779_v18 = vadd.f32 %v1432_v17, %v315_v15  ;;  %v1434_v19 = vpop.f32.mrb[1].mxu0  ;;  %v3229_v15 = vld [vmem:[#allocation8 + $0x30] sm:$0xff]   ;;  %v3392_v17 = vmov 0.0  }
 0x1f1   :  { %v2781_v20 = vadd.f32 %v1434_v19, %v319_v16  ;;  %v1436_v21 = vpop.f32.mrb[2].mxu0  ;;  %2741 = vmatpush3.bf16.msra.mxu1 %v3229_v15  ;;  %v3230_v16 = vld [vmem:[#allocation8 + $0x78] sm:$0xff]  }
 0x1f2   :  { %v2780_v22 = vadd.f32 %v2779_v18, %v3526_v39  ;;  %v1437_v23 = vpop.f32.mrb[3].mxu0  ;;  %2742 = vmatprep.subr.bf16.mxu1 %v3230_v16  ;;  %v1716_v18 = vld [vmem:[%s3580_s4] sm:$0x3] }
 0x1f3   :  { %v2782_v24 = vadd.f32 %v2781_v20, %v3528_v40  ;;  %v1721_v19 = vrot.slane %v1716_v18, %v314_v12  ;;  %v1725_v20 = vrot.slane %v1716_v18, %v318_v14  ;;  %v3234_v12 = vld [vmem:[#allocation10 + $0x10] sm:$0xff]   ;;  %v3236_v14 = vld [vmem:[#allocation10 + $0x20] sm:$0xff]  }
 0x1f4   :  { %v1644_v25 = vmax.f32 %v2780_v22, 0.0 }
 0x1f5   :  { %v1645_v26 = vmax.f32 %v2782_v24, 0.0  ;;  %2743 = vmatpush3.bf16.msra.mxu1 %v3231_v13 }
 0x1f6   :  { %v1648_v29 = vpack.c.bf16 %v1644_v25, %v1644_v25  ;;  %2759 = vmatprep.subr.bf16.mxu1 %v3392_v17 }
 0x1f7   :  { %v1649_v27 = vpack.c.bf16 %v1645_v26, %v1645_v26 }
 0x1f9   :  { %2080 = vmatprep.mubr.bf16.mxu0 %v1649_v27 }
 0x1fa   :  { %2081 = vmatmul.mubr.bf16.vlgmr.msra.gmra.mrb[4].mxu0 %v1648_v29 }
 0x1fb   :  { %2090 = vmatpush1.bf16.msra.mxu0 %v3168_v28 }
 0x1fc   :  { %2091 = vmatprep.subr.bf16.mxu0 %v3173_v30  ;;  %v3232_v30 = vld [vmem:[#allocation10] sm:$0xff]  }
 0x1ff   :  { %2092 = vmatpush1.bf16.msra.mxu0 %v3171_v32  ;;  %v3233_v32 = vld [vmem:[#allocation10 + $0x8] sm:$0xff]  }
 0x200   :  { %v1637_v36 = vpop.f32.mrb[4].mxu1  ;;  %2093 = vmatprep.subr.bf16.mxu0 %v3176_v33  ;;  %v3237_v33 = vld [vmem:[#allocation10 + $0x28] sm:$0xff]  }
 0x201   :  { %v1639_v38 = vpop.f32.mrb[5].mxu1  ;;  %v2783_v4 = vadd.f32 %v1637_v36, %v323_v1 }
 0x202   :  { %v2784_v0 = vadd.f32 %v1639_v38, %v327_v34  ;;  %v1641_v39 = vpop.f32.mrb[6].mxu1  ;;  %v3238_v34 = vld [vmem:[#allocation10 + $0x30] sm:$0xff]  }
 0x203   :  { %v1642_v40 = vpop.f32.mrb[7].mxu1  ;;  %2094 = vmatpush1.bf16.msra.mxu0 %v3174_v35  ;;  %v1646_v7 = vmax.f32 %v2783_v4, 0.0  ;;  %v3239_v35 = vld [vmem:[#allocation10 + $0x38] sm:$0xff]  }
 0x204   :  { %v1647_v42 = vmax.f32 %v2784_v0, 0.0  ;;  %2095 = vmatprep.subr.bf16.mxu0 %v3179_v37  ;;  %v2702_v37 = vld [vmem:[%s3582_s6] ss:$0 sm:$0xff]  ;;  %s3350_s6 = scalar_lea.vmem %s2430_s13, 128 }
 0x205   :  { %v1650_v8 = vpack.c.bf16 %v1646_v7, %v1646_v7  ;;  %p3351_p12 = scmp.ne.s32.totalorder %s2430_s13, %s3350_s6  ;;  %p3356_p0 = scmp.lt.s32.totalorder %s3350_s6, %s3350_s6 }
 0x206   :  { %v1651_v44 = vpack.c.bf16 %v1647_v42, %v1647_v42 }
 0x207   :  { %2096 = vmatpush1.bf16.msra.mxu0 %v3177_v41  ;;  %p3357_p1 = por %p3356_p0, %p3355_p13 }
 0x208   :  { %2121 = vmatprep.mubr.bf16.mxu0 %v1651_v44  ;;  %2097 = vmatprep.subr.bf16.mxu0 %v3182_v43  ;;  %v2719_v44 = vld [vmem:[%s3584_s8] ss:$0 sm:$0xff] }
 0x209   :  { %p3358_p2 = pnand %p3357_p1, %p3351_p12 }
 0x20b   :  { %2098 = vmatpush1.bf16.msra.mxu0 %v3180_v10 }
 0x20c   :  { %2099 = vmatprep.subr.bf16.mxu0 %v3185_v45 }
 0x20f   :  { %2100 = vmatpush1.bf16.msra.mxu0 %v3183_v46 }
 0x210   :  { %2101 = vmatprep.subr.bf16.mxu0 %v3188_v47 }
 0x213   :  { %2102 = vmatpush1.bf16.msra.mxu0 %v3186_v48 }
 0x214   :  { %2103 = vmatprep.subr.bf16.mxu0 %v3191_v49 }
 0x217   :  { %2104 = vmatpush1.bf16.msra.mxu0 %v3189_v50 }
 0x218   :  { %2105 = vmatprep.subr.bf16.mxu0 %v3194_v51 }
 0x21b   :  { %2106 = vmatpush1.bf16.msra.mxu0 %v3192_v52 }
 0x21c   :  { %2107 = vmatprep.subr.bf16.mxu0 %v3197_v53 }
 0x21f   :  { %2108 = vmatpush1.bf16.msra.mxu0 %v3195_v54 }
 0x220   :  { %2109 = vmatprep.subr.bf16.mxu0 %v3200_v55 }
 0x223   :  { %2110 = vmatpush1.bf16.msra.mxu0 %v3198_v56 }
 0x224   :  { %2111 = vmatprep.subr.bf16.mxu0 %v3203_v57 }
 0x227   :  { %2112 = vmatpush1.bf16.msra.mxu0 %v3201_v58 }
 0x228   :  { %2113 = vmatprep.subr.bf16.mxu0 %v3206_v59 }
 0x22b   :  { %2114 = vmatpush1.bf16.msra.mxu0 %v3204_v60 }
 0x22c   :  { %2115 = vmatprep.subr.bf16.mxu0 %v3209_v62 }
 0x22f   :  { %2116 = vmatpush1.bf16.msra.mxu0 %v3207_v63 }
 0x230   :  { %2117 = vmatprep.subr.bf16.mxu0 %v3212_v2 }
 0x233   :  { %2118 = vmatpush1.bf16.msra.mxu0 %v3210_v3 }
 0x234   :  { %2119 = vmatprep.subr.bf16.mxu0 %v3215_v5 }
 0x237   :  { %2120 = vmatpush1.bf16.msra.mxu0 %v3213_v6 }
 0x23a   :  { %2122 = vmatmul.mubr.bf16.vlgmr.msra.gmra.mrb[4].mxu0 %v1650_v8 }
 0x30d   :  { %v2123_v21 = vpop.f32.mrb[4].mxu0 }
 0x30e   :  { %v2785_v22 = vadd.f32 %v2123_v21, %v1721_v19  ;;  %v2125_v23 = vpop.f32.mrb[5].mxu0 }
 0x30f   :  { %v2786_v24 = vadd.f32 %v2125_v23, %v1725_v20  ;;  %v2127_v25 = vpop.f32.mrb[6].mxu0 }
 0x310   :  { %v2130_v26 = vmax.f32 %v2785_v22, 0.0  ;;  %v2128_v27 = vpop.f32.mrb[7].mxu0 }
 0x311   :  { %v2131_v28 = vmax.f32 %v2786_v24, 0.0 }
 0x312   :  { %v2132_v31 = vpack.c.bf16 %v2130_v26, %v2130_v26 }
 0x313   :  { %v2133_v29 = vpack.c.bf16 %v2131_v28, %v2131_v28 }
 0x315   :  { %2301 = vmatprep.mubr.bf16.mxu1 %v2133_v29 }
 0x316   :  { %2302 = vmatmul.mubr.bf16.vlgmr.msra.gmra.mrb[8].mxu1 %v2132_v31 }
 0x317   :  { %2760 = vmatpush3.bf16.msra.mxu1 %v3232_v30  ;;  %2775 = vmatprep.mubr.msk.bf16.mxu1 %vm3393_vm1, %v3392_v17 }
 0x318   :  { %2761 = vmatprep.subr.bf16.mxu1 %v3392_v17 }
 0x31b   :  { %2762 = vmatpush3.bf16.msra.mxu1 %v3233_v32 }
 0x31c   :  { %2763 = vmatprep.subr.bf16.mxu1 %v3392_v17 }
 0x31f   :  { %2764 = vmatpush3.bf16.msra.mxu1 %v3234_v12 }
 0x320   :  { %2765 = vmatprep.subr.bf16.mxu1 %v3392_v17 }
 0x323   :  { %2766 = vmatpush3.bf16.msra.mxu1 %v3235_v11 }
 0x324   :  { %2767 = vmatprep.subr.bf16.mxu1 %v3392_v17 }
 0x327   :  { %2768 = vmatpush3.bf16.msra.mxu1 %v3236_v14 }
 0x328   :  { %2769 = vmatprep.subr.bf16.mxu1 %v3392_v17 }
 0x32b   :  { %2770 = vmatpush3.bf16.msra.mxu1 %v3237_v33 }
 0x32c   :  { %2771 = vmatprep.subr.bf16.mxu1 %v3392_v17 }
 0x32f   :  { %2772 = vmatpush3.bf16.msra.mxu1 %v3238_v34 }
 0x330   :  { %2773 = vmatprep.subr.bf16.mxu1 %v3392_v17 }
 0x333   :  { %2774 = vmatpush3.bf16.msra.mxu1 %v3239_v35 }
 0x3e9   :  { %v2744_v36 = vpop.f32.mrb[8].mxu1 }
 0x3ea   :  { %v2745_v38 = vpop.f32.mrb[9].mxu1 }
 0x3eb   :  { %v2746_v0 = vadd.f32 %v2745_v38, %v2744_v36  ;;  %v2747_v39 = vpop.f32.mrb[10].mxu1 }
 0x3ec   :  { %v2748_v40 = vpop.f32.mrb[11].mxu1 }
 0x3ed   :  { %v2304_v41 = vadd.f32 %v2746_v0, %v2702_v37 }
 0x3ef   :  { %v2309_v42 = vmax.f32 %v2304_v41, 0.0 }
 0x3f1   :  { %v2310_v43 = vpack.c.bf16 %v2309_v42, %v2309_v42 }
 0x3f3   :  { %2776 = vmatmul.mubr.bf16.vlgmr.msra.gmra.mrb[12].mxu1 %v2310_v43 }
 0x4c6   :  { %v2416_v10 = vpop.f32.mrb[12].mxu1 }
 0x4c7   :  { %v2417_v45 = vadd.f32 %v2719_v44, %v2416_v10  ;;  %v2777_v46 = vpop.f32.mrb[13].mxu1 }
 0x4c8   :  { %v2419_v47 = vpop.f32.mrb[14].mxu1 }
 0x4c9   :  { %2422 = vst [vmem:[#allocation11] sm:$0xff] %v2417_v45  ;;  %v2778_v48 = vpop.f32.mrb[15].mxu1 }
 0x4ca   :  { %3361 = shalt.err (!%p3358_p2)
}
 0x4cb   :  { %s3362_s8 = scalar_lea.hbm %s3585_s9, 128 }
 0x4cc   :  { %p3363_p3 = scmp.ne.s32.totalorder %s3585_s9, %s3362_s8  ;;  %p3366_p4 = scmp.lt.u32.totalorder %s3362_s8, %s3585_s9 }
 0x4ce   :  { %p3368_p5 = pnand %p3366_p4, %p3363_p3 }
 0x4d0   :  { %3371 = shalt.err (!%p3368_p5)
}
 0x4d1   :  { %2432 = dma.vmem_to_hbm [thread:$0]  %s2430_s13, 128, %s3585_s9, [#allocation4]  }
 0x4d2   :  { %3378 = dma.done.wait [#allocation4], 128  }
 0x4d3   :  { %3379 = vsyncadd [#allocation4], 4294967168 }
 0x4d4   :  { %2436 = vsyncpa [#allocation3], 1 }
 0x4d5   :  { %2437 = vsyncpa [#allocation6], 1 }
 0x4d6   :  { %2438 = vsyncpa [#allocation9], 1 }
 0x4d7   :  { %2439 = vsyncpa [#allocation4], 1 }

</bundles_post_ra>
